<compile_context>
chip_gen: v6e
topology: v6e:2x2x1
jax: 0.10.0
libtpu: 0.0.40
codegen_flags: <defaults>
</compile_context>

<pallas_src>
import numpy as np
import jax
import jax.numpy as jnp
from jax.experimental import pallas as pl
from jax.experimental.pallas import tpu as pltpu

# ----------------------------- fixed LeNet geometry --------------------------
C0, H0, W0 = 3, 32, 32          # input (NCHW)
K = 5                           # conv kernel size
C1, OH1, OW1 = 6, 28, 28        # conv1 output
PH1, PW1 = 14, 14               # after pool1
C2, OH2, OW2 = 16, 10, 10       # conv2 output
PH2, PW2 = 5, 5                 # after pool2
NFC1 = 128                      # fc1 out 120 -> padded to 128 lanes
NFC2 = 128                      # fc2 out  84 -> padded to 128 lanes
NOUT = 10                       # logits


# ------------------------------ fused kernel ---------------------------------

def _pool2x2(a):
    """Exact 2x2 / stride-2 max pool of a per-image slab laid out (h, c*W + w).

    Implemented with 0/1 selection matmuls (rows, then columns) so it lowers to
    plain MXU dots + jnp.maximum.  Selecting even/odd columns works across the
    channel blocks because the per-channel width (28 resp. 10) is even, so input
    column 2*m is exactly channel block c, column 2*j for m = c*(W/2) + j.
    The selection is numerically exact (multiply by 1.0, add 0.0)."""
    rin, cin = a.shape
    rout, cout = rin // 2, cin // 2
    # rows:  t[i, :] = max(a[2i, :], a[2i+1, :])
    ri = jax.lax.broadcasted_iota(jnp.int32, (rout, rin), 1)
    ro = jax.lax.broadcasted_iota(jnp.int32, (rout, rin), 0)
    t = jnp.maximum(
        jnp.dot((ri == 2 * ro).astype(a.dtype), a,
                preferred_element_type=jnp.float32),
        jnp.dot((ri == 2 * ro + 1).astype(a.dtype), a,
                preferred_element_type=jnp.float32))
    # cols:  p[:, m] = max(t[:, 2m], t[:, 2m+1])
    ci = jax.lax.broadcasted_iota(jnp.int32, (cin, cout), 0)
    cc = jax.lax.broadcasted_iota(jnp.int32, (cin, cout), 1)
    return jnp.maximum(
        jnp.dot(t, (ci == 2 * cc).astype(a.dtype),
                preferred_element_type=jnp.float32),
        jnp.dot(t, (ci == 2 * cc + 1).astype(a.dtype),
                preferred_element_type=jnp.float32))


def _lenet_kernel(x_ref, w1_ref, b1_ref, w2_ref, b2_ref,
                  fc1_ref, bf1_ref, fc2_ref, bf2_ref, fc3_ref, bf3_ref,
                  out_ref, p1_s, p2_s):
    f32 = jnp.float32

    # ---- conv1 + bias + relu : NCHW image -> (28, C1*28) activations --------
    acc1 = jnp.zeros((OH1, C1 * OW1), f32)
    for kh in range(K):
        for c in range(C0):
            acc1 = acc1 + jnp.dot(x_ref[0, c, kh:kh + OH1, :], w1_ref[kh, c],
                                  preferred_element_type=f32)
    a1 = jnp.maximum(acc1 + b1_ref[...], 0.0)

    # ---- pool1 -> VMEM scratch (14, C1*14) -----------------------------------
    p1_s[...] = _pool2x2(a1)

    # ---- conv2 + bias + relu : (14, C1*14) -> (10, C2*10) --------------------
    acc2 = jnp.zeros((OH2, C2 * OW2), f32)
    for kh in range(K):
        acc2 = acc2 + jnp.dot(p1_s[kh:kh + OH2, :], w2_ref[kh],
                              preferred_element_type=f32)
    a2 = jnp.maximum(acc2 + b2_ref[...], 0.0)

    # ---- pool2 -> VMEM scratch (5, C2*5) --------------------------------------
    p2_s[...] = _pool2x2(a2)

    # ---- fc1 + relu (torch flatten order folded into per-row weight chunks) --
    h = bf1_ref[...]                                   # (1, 128)
    for r in range(PH2):
        h = h + jnp.dot(p2_s[r:r + 1, :], fc1_ref[r],
                        preferred_element_type=f32)
    h = jnp.maximum(h, 0.0)

    # ---- fc2 + relu ------------------------------------------------------------
    h = jnp.maximum(jnp.dot(h, fc2_ref[...], preferred_element_type=f32)
                    + bf2_ref[...], 0.0)

    # ---- fc3 (logits) ----------------------------------------------------------
    out_ref[0] = (jnp.dot(h, fc3_ref[...], preferred_element_type=f32)
                  + bf3_ref[...]).astype(out_ref.dtype)


# ------------------------------ wrapper ---------------------------------------

def forward(packed, x_nchw):
    """x_nchw: (B, 3, 32, 32) float32 -> logits (B, 10)."""
    B, C, H, W = x_nchw.shape
    assert (C, H, W) == (C0, H0, W0), (C, H, W)
    out = pl.pallas_call(
        _lenet_kernel,
        out_shape=jax.ShapeDtypeStruct((B, 1, NOUT), jnp.float32),
        grid_spec=pltpu.PrefetchScalarGridSpec(
            num_scalar_prefetch=0,
            grid=(B,),
            in_specs=[
                pl.BlockSpec((1, C0, H0, W0), lambda b: (b, 0, 0, 0)),        # x
                pl.BlockSpec((K, C0, W0, C1 * OW1), lambda b: (0, 0, 0, 0)),  # w1 (banded)
                pl.BlockSpec((1, C1 * OW1), lambda b: (0, 0)),                # b1
                pl.BlockSpec((K, C1 * PW1, C2 * OW2), lambda b: (0, 0, 0)),   # w2 (banded)
                pl.BlockSpec((1, C2 * OW2), lambda b: (0, 0)),                # b2
                pl.BlockSpec((PH2, C2 * PW2, NFC1), lambda b: (0, 0, 0)),     # fc1 chunks
                pl.BlockSpec((1, NFC1), lambda b: (0, 0)),                    # fc1 bias
                pl.BlockSpec((NFC1, NFC2), lambda b: (0, 0)),                 # fc2
                pl.BlockSpec((1, NFC2), lambda b: (0, 0)),                    # fc2 bias
                pl.BlockSpec((NFC2, NOUT), lambda b: (0, 0)),                 # fc3
                pl.BlockSpec((1, NOUT), lambda b: (0, 0)),                    # fc3 bias
            ],
            out_specs=pl.BlockSpec((1, 1, NOUT), lambda b: (b, 0, 0)),
            scratch_shapes=[pltpu.VMEM((PH1, C1 * PW1), jnp.float32),
                            pltpu.VMEM((PH2, C2 * PW2), jnp.float32)],
        ),
        compiler_params=pltpu.CompilerParams(
            dimension_semantics=("parallel",)),
    )(x_nchw,
      packed["w1"], packed["b1"], packed["w2"], packed["b2"],
      packed["fc1"], packed["bf1"], packed["fc2"], packed["bf2"],
      packed["fc3"], packed["bf3"])
    return out.reshape(B, NOUT)


# -------------------- one-time host-side parameter packing --------------------

def _band_conv(w, win):
    """Repack a (Cout, Cin, k, k) conv weight into k banded matrices of shape
    (Cin*win, Cout*wout) so that, with activations laid out (h, c*win + w),
        out[oh, co*wout + ow] = sum_kh  act[oh+kh, :] @ band[kh]
    equals PyTorch's 'valid' stride-1 cross-correlation."""
    w = np.asarray(w, np.float32)
    cout, cin, k, _ = w.shape
    wout = win - k + 1
    band = np.zeros((k, cin * win, cout * wout), np.float32)
    ow = np.arange(wout)
    for kh in range(k):
        for kw in range(k):
            for c in range(cin):
                for co in range(cout):
                    band[kh, c * win + ow + kw, co * wout + ow] = w[co, c, kh, kw]
    return band


def pack_params(params):
    """One-time host-side repack of PyTorch-layout params into kernel layouts."""
    # conv1: keep per-(kh, c) bands so the NCHW input is consumed without transposes.
    w1 = _band_conv(params["conv1_w"], W0).reshape(K, C0, W0, C1 * OW1)
    w2 = _band_conv(params["conv2_w"], PW1)                       # (K, 84, 160)
    b1 = np.repeat(np.asarray(params["conv1_b"], np.float32), OW1)[None, :]
    b2 = np.repeat(np.asarray(params["conv2_b"], np.float32), OW2)[None, :]

    # fc1: fold torch.flatten's (c, h, w) order and the kernel's (h, c*W + w)
    # activation layout into per-row weight chunks; pad out-features 120 -> 128.
    fw = np.asarray(params["fc1_w"], np.float32)                  # (400, 120), (in, out)
    fw = fw.reshape(C2, PH2, PW2, 120).transpose(1, 0, 2, 3).reshape(PH2, C2 * PW2, 120)
    fc1 = np.zeros((PH2, C2 * PW2, NFC1), np.float32)
    fc1[..., :120] = fw
    bf1 = np.zeros((1, NFC1), np.float32)
    bf1[0, :120] = np.asarray(params["fc1_b"], np.float32)

    fc2 = np.zeros((NFC1, NFC2), np.float32)
    fc2[:120, :84] = np.asarray(params["fc2_w"], np.float32)
    bf2 = np.zeros((1, NFC2), np.float32)
    bf2[0, :84] = np.asarray(params["fc2_b"], np.float32)

    fc3 = np.zeros((NFC2, NOUT), np.float32)
    fc3[:84, :] = np.asarray(params["fc3_w"], np.float32)
    bf3 = np.asarray(params["fc3_b"], np.float32)[None, :]

    packed = dict(w1=w1, b1=b1, w2=w2, b2=b2, fc1=fc1, bf1=bf1,
                  fc2=fc2, bf2=bf2, fc3=fc3, bf3=bf3)
    return {k: jnp.asarray(v) for k, v in packed.items()}


def init_params(key):
    """Deterministic init (PyTorch-style uniform(+-1/sqrt(fan_in))); fc weights (in, out)."""
    ks = jax.random.split(key, 10)

    def u(k_, shape, fan_in):
        bound = 1.0 / float(fan_in) ** 0.5
        return jax.random.uniform(k_, shape, jnp.float32, -bound, bound)

    return {
        "conv1_w": u(ks[0], (6, 3, 5, 5), 3 * 5 * 5),
        "conv1_b": u(ks[1], (6,), 3 * 5 * 5),
        "conv2_w": u(ks[2], (16, 6, 5, 5), 6 * 5 * 5),
        "conv2_b": u(ks[3], (16,), 6 * 5 * 5),
        "fc1_w": u(ks[4], (16 * 5 * 5, 120), 16 * 5 * 5),
        "fc1_b": u(ks[5], (120,), 16 * 5 * 5),
        "fc2_w": u(ks[6], (120, 84), 120),
        "fc2_b": u(ks[7], (84,), 120),
        "fc3_w": u(ks[8], (84, 10), 84),
        "fc3_b": u(ks[9], (10,), 84),
    }


def forward_reference(params, x):
    """Pure-JAX (XLA) reference matching the PyTorch module, for a sanity check."""
    def conv(h, w, b):
        return jax.lax.conv(h, w, (1, 1), "VALID") + b[None, :, None, None]

    def pool(h):
        return jax.lax.reduce_window(h, -jnp.inf, jax.lax.max,
                                     (1, 1, 2, 2), (1, 1, 2, 2), "VALID")

    h = pool(jax.nn.relu(conv(x, params["conv1_w"], params["conv1_b"])))
    h = pool(jax.nn.relu(conv(h, params["conv2_w"], params["conv2_b"])))
    h = h.reshape(x.shape[0], -1)
    h = jax.nn.relu(h @ params["fc1_w"] + params["fc1_b"])
    h = jax.nn.relu(h @ params["fc2_w"] + params["fc2_b"])
    return h @ params["fc3_w"] + params["fc3_b"]


if __name__ == "__main__":
    key = jax.random.PRNGKey(0)
    k_params, k_x = jax.random.split(key)
    params = init_params(k_params)
    packed = pack_params(params)
    # LeNet geometry requires 32x32 spatial input (conv2+pool gives 16*5*5 = 400)
    x = jax.random.normal(k_x, (2, C0, H0, W0), dtype=jnp.float32)

    logits = jax.jit(forward)(packed, x)
    logits = jax.block_until_ready(logits)

    assert logits.shape == (2, NOUT), logits.shape
    assert logits.dtype == jnp.float32

    # Sanity check against a pure-JAX reference (loose tol: both paths use the MXU).
    ref = jax.jit(forward_reference)(params, x)
    err = float(jnp.max(jnp.abs(logits - ref)))
    assert err < 5e-2, f"kernel vs reference mismatch: max|diff|={err}"

    print("KERNEL_OK")
</pallas_src>

<mosaic_0001>
module attributes {stable_mosaic.version = 11 : i64} {
  func.func @_lenet_kernel(%arg0: i32, %arg1: memref<1x3x32x32xf32, #tpu.memory_space<vmem>>, %arg2: memref<5x3x32x168xf32, #tpu.memory_space<vmem>>, %arg3: memref<1x168xf32, #tpu.memory_space<vmem>>, %arg4: memref<5x84x160xf32, #tpu.memory_space<vmem>>, %arg5: memref<1x160xf32, #tpu.memory_space<vmem>>, %arg6: memref<5x80x128xf32, #tpu.memory_space<vmem>>, %arg7: memref<1x128xf32, #tpu.memory_space<vmem>>, %arg8: memref<128x128xf32, #tpu.memory_space<vmem>>, %arg9: memref<1x128xf32, #tpu.memory_space<vmem>>, %arg10: memref<128x10xf32, #tpu.memory_space<vmem>>, %arg11: memref<1x10xf32, #tpu.memory_space<vmem>>, %arg12: memref<1x1x10xf32, #tpu.memory_space<vmem>>, %arg13: memref<14x84xf32, #tpu.memory_space<vmem>>, %arg14: memref<5x80xf32, #tpu.memory_space<vmem>>) attributes {dimension_semantics = [#tpu.dimension_semantics<parallel>], iteration_bounds = array<i64: 2>, scalar_prefetch = 0 : i64, scratch_operands = 2 : i64, tpu.core_type = #tpu.core_type<tc>, window_params = [{transform_indices = @transform_0, window_bounds = array<i64: 1, 3, 32, 32>}, {pipeline_mode = #tpu.pipeline_mode<synchronous>, transform_indices = @transform_1, window_bounds = array<i64: 5, 3, 32, 168>}, {pipeline_mode = #tpu.pipeline_mode<synchronous>, transform_indices = @transform_2, window_bounds = array<i64: 1, 168>}, {pipeline_mode = #tpu.pipeline_mode<synchronous>, transform_indices = @transform_3, window_bounds = array<i64: 5, 84, 160>}, {pipeline_mode = #tpu.pipeline_mode<synchronous>, transform_indices = @transform_4, window_bounds = array<i64: 1, 160>}, {pipeline_mode = #tpu.pipeline_mode<synchronous>, transform_indices = @transform_5, window_bounds = array<i64: 5, 80, 128>}, {pipeline_mode = #tpu.pipeline_mode<synchronous>, transform_indices = @transform_6, window_bounds = array<i64: 1, 128>}, {pipeline_mode = #tpu.pipeline_mode<synchronous>, transform_indices = @transform_7, window_bounds = array<i64: 128, 128>}, {pipeline_mode = #tpu.pipeline_mode<synchronous>, transform_indices = @transform_8, window_bounds = array<i64: 1, 128>}, {pipeline_mode = #tpu.pipeline_mode<synchronous>, transform_indices = @transform_9, window_bounds = array<i64: 128, 10>}, {pipeline_mode = #tpu.pipeline_mode<synchronous>, transform_indices = @transform_10, window_bounds = array<i64: 1, 10>}, {transform_indices = @transform_11, window_bounds = array<i64: 1, 1, 10>}]} {
    %cst = arith.constant 0.000000e+00 : f32
    %0 = vector.broadcast %cst : f32 to vector<28x168xf32>
    %c0 = arith.constant 0 : index
    %c0_0 = arith.constant 0 : index
    %c0_1 = arith.constant 0 : index
    %c0_2 = arith.constant 0 : index
    %1 = vector.load %arg1[%c0, %c0_0, %c0_1, %c0_2] : memref<1x3x32x32xf32, #tpu.memory_space<vmem>>, vector<1x1x28x32xf32>
    %2 = vector.shape_cast %1 : vector<1x1x28x32xf32> to vector<28x32xf32>
    %c0_3 = arith.constant 0 : index
    %c0_4 = arith.constant 0 : index
    %c0_5 = arith.constant 0 : index
    %c0_6 = arith.constant 0 : index
    %3 = vector.load %arg2[%c0_3, %c0_4, %c0_5, %c0_6] : memref<5x3x32x168xf32, #tpu.memory_space<vmem>>, vector<1x1x32x168xf32>
    %4 = vector.shape_cast %3 : vector<1x1x32x168xf32> to vector<32x168xf32>
    %cst_7 = arith.constant dense<0.000000e+00> : vector<28x168xf32>
    %5 = tpu.matmul %2, %4, %cst_7 {dimension_numbers = #tpu.dot_dimension_numbers<[1], [0], [0], [1], [0, 0, 1, 1], [], []>} : vector<28x32xf32>, vector<32x168xf32>, vector<28x168xf32> -> vector<28x168xf32>
    %6 = arith.addf %0, %5 : vector<28x168xf32>
    %c0_8 = arith.constant 0 : index
    %c1 = arith.constant 1 : index
    %c0_9 = arith.constant 0 : index
    %c0_10 = arith.constant 0 : index
    %7 = vector.load %arg1[%c0_8, %c1, %c0_9, %c0_10] : memref<1x3x32x32xf32, #tpu.memory_space<vmem>>, vector<1x1x28x32xf32>
    %8 = vector.shape_cast %7 : vector<1x1x28x32xf32> to vector<28x32xf32>
    %c0_11 = arith.constant 0 : index
    %c1_12 = arith.constant 1 : index
    %c0_13 = arith.constant 0 : index
    %c0_14 = arith.constant 0 : index
    %9 = vector.load %arg2[%c0_11, %c1_12, %c0_13, %c0_14] : memref<5x3x32x168xf32, #tpu.memory_space<vmem>>, vector<1x1x32x168xf32>
    %10 = vector.shape_cast %9 : vector<1x1x32x168xf32> to vector<32x168xf32>
    %cst_15 = arith.constant dense<0.000000e+00> : vector<28x168xf32>
    %11 = tpu.matmul %8, %10, %cst_15 {dimension_numbers = #tpu.dot_dimension_numbers<[1], [0], [0], [1], [0, 0, 1, 1], [], []>} : vector<28x32xf32>, vector<32x168xf32>, vector<28x168xf32> -> vector<28x168xf32>
    %12 = arith.addf %6, %11 : vector<28x168xf32>
    %c0_16 = arith.constant 0 : index
    %c2 = arith.constant 2 : index
    %c0_17 = arith.constant 0 : index
    %c0_18 = arith.constant 0 : index
    %13 = vector.load %arg1[%c0_16, %c2, %c0_17, %c0_18] : memref<1x3x32x32xf32, #tpu.memory_space<vmem>>, vector<1x1x28x32xf32>
    %14 = vector.shape_cast %13 : vector<1x1x28x32xf32> to vector<28x32xf32>
    %c0_19 = arith.constant 0 : index
    %c2_20 = arith.constant 2 : index
    %c0_21 = arith.constant 0 : index
    %c0_22 = arith.constant 0 : index
    %15 = vector.load %arg2[%c0_19, %c2_20, %c0_21, %c0_22] : memref<5x3x32x168xf32, #tpu.memory_space<vmem>>, vector<1x1x32x168xf32>
    %16 = vector.shape_cast %15 : vector<1x1x32x168xf32> to vector<32x168xf32>
    %cst_23 = arith.constant dense<0.000000e+00> : vector<28x168xf32>
    %17 = tpu.matmul %14, %16, %cst_23 {dimension_numbers = #tpu.dot_dimension_numbers<[1], [0], [0], [1], [0, 0, 1, 1], [], []>} : vector<28x32xf32>, vector<32x168xf32>, vector<28x168xf32> -> vector<28x168xf32>
    %18 = arith.addf %12, %17 : vector<28x168xf32>
    %c0_24 = arith.constant 0 : index
    %c0_25 = arith.constant 0 : index
    %c1_26 = arith.constant 1 : index
    %c0_27 = arith.constant 0 : index
    %19 = vector.load %arg1[%c0_24, %c0_25, %c1_26, %c0_27] : memref<1x3x32x32xf32, #tpu.memory_space<vmem>>, vector<1x1x28x32xf32>
    %20 = vector.shape_cast %19 : vector<1x1x28x32xf32> to vector<28x32xf32>
    %c1_28 = arith.constant 1 : index
    %c0_29 = arith.constant 0 : index
    %c0_30 = arith.constant 0 : index
    %c0_31 = arith.constant 0 : index
    %21 = vector.load %arg2[%c1_28, %c0_29, %c0_30, %c0_31] : memref<5x3x32x168xf32, #tpu.memory_space<vmem>>, vector<1x1x32x168xf32>
    %22 = vector.shape_cast %21 : vector<1x1x32x168xf32> to vector<32x168xf32>
    %cst_32 = arith.constant dense<0.000000e+00> : vector<28x168xf32>
    %23 = tpu.matmul %20, %22, %cst_32 {dimension_numbers = #tpu.dot_dimension_numbers<[1], [0], [0], [1], [0, 0, 1, 1], [], []>} : vector<28x32xf32>, vector<32x168xf32>, vector<28x168xf32> -> vector<28x168xf32>
    %24 = arith.addf %18, %23 : vector<28x168xf32>
    %c0_33 = arith.constant 0 : index
    %c1_34 = arith.constant 1 : index
    %c1_35 = arith.constant 1 : index
    %c0_36 = arith.constant 0 : index
    %25 = vector.load %arg1[%c0_33, %c1_34, %c1_35, %c0_36] : memref<1x3x32x32xf32, #tpu.memory_space<vmem>>, vector<1x1x28x32xf32>
    %26 = vector.shape_cast %25 : vector<1x1x28x32xf32> to vector<28x32xf32>
    %c1_37 = arith.constant 1 : index
    %c1_38 = arith.constant 1 : index
    %c0_39 = arith.constant 0 : index
    %c0_40 = arith.constant 0 : index
    %27 = vector.load %arg2[%c1_37, %c1_38, %c0_39, %c0_40] : memref<5x3x32x168xf32, #tpu.memory_space<vmem>>, vector<1x1x32x168xf32>
    %28 = vector.shape_cast %27 : vector<1x1x32x168xf32> to vector<32x168xf32>
    %cst_41 = arith.constant dense<0.000000e+00> : vector<28x168xf32>
    %29 = tpu.matmul %26, %28, %cst_41 {dimension_numbers = #tpu.dot_dimension_numbers<[1], [0], [0], [1], [0, 0, 1, 1], [], []>} : vector<28x32xf32>, vector<32x168xf32>, vector<28x168xf32> -> vector<28x168xf32>
    %30 = arith.addf %24, %29 : vector<28x168xf32>
    %c0_42 = arith.constant 0 : index
    %c2_43 = arith.constant 2 : index
    %c1_44 = arith.constant 1 : index
    %c0_45 = arith.constant 0 : index
    %31 = vector.load %arg1[%c0_42, %c2_43, %c1_44, %c0_45] : memref<1x3x32x32xf32, #tpu.memory_space<vmem>>, vector<1x1x28x32xf32>
    %32 = vector.shape_cast %31 : vector<1x1x28x32xf32> to vector<28x32xf32>
    %c1_46 = arith.constant 1 : index
    %c2_47 = arith.constant 2 : index
    %c0_48 = arith.constant 0 : index
    %c0_49 = arith.constant 0 : index
    %33 = vector.load %arg2[%c1_46, %c2_47, %c0_48, %c0_49] : memref<5x3x32x168xf32, #tpu.memory_space<vmem>>, vector<1x1x32x168xf32>
    %34 = vector.shape_cast %33 : vector<1x1x32x168xf32> to vector<32x168xf32>
    %cst_50 = arith.constant dense<0.000000e+00> : vector<28x168xf32>
    %35 = tpu.matmul %32, %34, %cst_50 {dimension_numbers = #tpu.dot_dimension_numbers<[1], [0], [0], [1], [0, 0, 1, 1], [], []>} : vector<28x32xf32>, vector<32x168xf32>, vector<28x168xf32> -> vector<28x168xf32>
    %36 = arith.addf %30, %35 : vector<28x168xf32>
    %c0_51 = arith.constant 0 : index
    %c0_52 = arith.constant 0 : index
    %c2_53 = arith.constant 2 : index
    %c0_54 = arith.constant 0 : index
    %37 = vector.load %arg1[%c0_51, %c0_52, %c2_53, %c0_54] : memref<1x3x32x32xf32, #tpu.memory_space<vmem>>, vector<1x1x28x32xf32>
    %38 = vector.shape_cast %37 : vector<1x1x28x32xf32> to vector<28x32xf32>
    %c2_55 = arith.constant 2 : index
    %c0_56 = arith.constant 0 : index
    %c0_57 = arith.constant 0 : index
    %c0_58 = arith.constant 0 : index
    %39 = vector.load %arg2[%c2_55, %c0_56, %c0_57, %c0_58] : memref<5x3x32x168xf32, #tpu.memory_space<vmem>>, vector<1x1x32x168xf32>
    %40 = vector.shape_cast %39 : vector<1x1x32x168xf32> to vector<32x168xf32>
    %cst_59 = arith.constant dense<0.000000e+00> : vector<28x168xf32>
    %41 = tpu.matmul %38, %40, %cst_59 {dimension_numbers = #tpu.dot_dimension_numbers<[1], [0], [0], [1], [0, 0, 1, 1], [], []>} : vector<28x32xf32>, vector<32x168xf32>, vector<28x168xf32> -> vector<28x168xf32>
    %42 = arith.addf %36, %41 : vector<28x168xf32>
    %c0_60 = arith.constant 0 : index
    %c1_61 = arith.constant 1 : index
    %c2_62 = arith.constant 2 : index
    %c0_63 = arith.constant 0 : index
    %43 = vector.load %arg1[%c0_60, %c1_61, %c2_62, %c0_63] : memref<1x3x32x32xf32, #tpu.memory_space<vmem>>, vector<1x1x28x32xf32>
    %44 = vector.shape_cast %43 : vector<1x1x28x32xf32> to vector<28x32xf32>
    %c2_64 = arith.constant 2 : index
    %c1_65 = arith.constant 1 : index
    %c0_66 = arith.constant 0 : index
    %c0_67 = arith.constant 0 : index
    %45 = vector.load %arg2[%c2_64, %c1_65, %c0_66, %c0_67] : memref<5x3x32x168xf32, #tpu.memory_space<vmem>>, vector<1x1x32x168xf32>
    %46 = vector.shape_cast %45 : vector<1x1x32x168xf32> to vector<32x168xf32>
    %cst_68 = arith.constant dense<0.000000e+00> : vector<28x168xf32>
    %47 = tpu.matmul %44, %46, %cst_68 {dimension_numbers = #tpu.dot_dimension_numbers<[1], [0], [0], [1], [0, 0, 1, 1], [], []>} : vector<28x32xf32>, vector<32x168xf32>, vector<28x168xf32> -> vector<28x168xf32>
    %48 = arith.addf %42, %47 : vector<28x168xf32>
    %c0_69 = arith.constant 0 : index
    %c2_70 = arith.constant 2 : index
    %c2_71 = arith.constant 2 : index
    %c0_72 = arith.constant 0 : index
    %49 = vector.load %arg1[%c0_69, %c2_70, %c2_71, %c0_72] : memref<1x3x32x32xf32, #tpu.memory_space<vmem>>, vector<1x1x28x32xf32>
    %50 = vector.shape_cast %49 : vector<1x1x28x32xf32> to vector<28x32xf32>
    %c2_73 = arith.constant 2 : index
    %c2_74 = arith.constant 2 : index
    %c0_75 = arith.constant 0 : index
    %c0_76 = arith.constant 0 : index
    %51 = vector.load %arg2[%c2_73, %c2_74, %c0_75, %c0_76] : memref<5x3x32x168xf32, #tpu.memory_space<vmem>>, vector<1x1x32x168xf32>
    %52 = vector.shape_cast %51 : vector<1x1x32x168xf32> to vector<32x168xf32>
    %cst_77 = arith.constant dense<0.000000e+00> : vector<28x168xf32>
    %53 = tpu.matmul %50, %52, %cst_77 {dimension_numbers = #tpu.dot_dimension_numbers<[1], [0], [0], [1], [0, 0, 1, 1], [], []>} : vector<28x32xf32>, vector<32x168xf32>, vector<28x168xf32> -> vector<28x168xf32>
    %54 = arith.addf %48, %53 : vector<28x168xf32>
    %c0_78 = arith.constant 0 : index
    %c0_79 = arith.constant 0 : index
    %c3 = arith.constant 3 : index
    %c0_80 = arith.constant 0 : index
    %55 = vector.load %arg1[%c0_78, %c0_79, %c3, %c0_80] : memref<1x3x32x32xf32, #tpu.memory_space<vmem>>, vector<1x1x28x32xf32>
    %56 = vector.shape_cast %55 : vector<1x1x28x32xf32> to vector<28x32xf32>
    %c3_81 = arith.constant 3 : index
    %c0_82 = arith.constant 0 : index
    %c0_83 = arith.constant 0 : index
    %c0_84 = arith.constant 0 : index
    %57 = vector.load %arg2[%c3_81, %c0_82, %c0_83, %c0_84] : memref<5x3x32x168xf32, #tpu.memory_space<vmem>>, vector<1x1x32x168xf32>
    %58 = vector.shape_cast %57 : vector<1x1x32x168xf32> to vector<32x168xf32>
    %cst_85 = arith.constant dense<0.000000e+00> : vector<28x168xf32>
    %59 = tpu.matmul %56, %58, %cst_85 {dimension_numbers = #tpu.dot_dimension_numbers<[1], [0], [0], [1], [0, 0, 1, 1], [], []>} : vector<28x32xf32>, vector<32x168xf32>, vector<28x168xf32> -> vector<28x168xf32>
    %60 = arith.addf %54, %59 : vector<28x168xf32>
    %c0_86 = arith.constant 0 : index
    %c1_87 = arith.constant 1 : index
    %c3_88 = arith.constant 3 : index
    %c0_89 = arith.constant 0 : index
    %61 = vector.load %arg1[%c0_86, %c1_87, %c3_88, %c0_89] : memref<1x3x32x32xf32, #tpu.memory_space<vmem>>, vector<1x1x28x32xf32>
    %62 = vector.shape_cast %61 : vector<1x1x28x32xf32> to vector<28x32xf32>
    %c3_90 = arith.constant 3 : index
    %c1_91 = arith.constant 1 : index
    %c0_92 = arith.constant 0 : index
    %c0_93 = arith.constant 0 : index
    %63 = vector.load %arg2[%c3_90, %c1_91, %c0_92, %c0_93] : memref<5x3x32x168xf32, #tpu.memory_space<vmem>>, vector<1x1x32x168xf32>
    %64 = vector.shape_cast %63 : vector<1x1x32x168xf32> to vector<32x168xf32>
    %cst_94 = arith.constant dense<0.000000e+00> : vector<28x168xf32>
    %65 = tpu.matmul %62, %64, %cst_94 {dimension_numbers = #tpu.dot_dimension_numbers<[1], [0], [0], [1], [0, 0, 1, 1], [], []>} : vector<28x32xf32>, vector<32x168xf32>, vector<28x168xf32> -> vector<28x168xf32>
    %66 = arith.addf %60, %65 : vector<28x168xf32>
    %c0_95 = arith.constant 0 : index
    %c2_96 = arith.constant 2 : index
    %c3_97 = arith.constant 3 : index
    %c0_98 = arith.constant 0 : index
    %67 = vector.load %arg1[%c0_95, %c2_96, %c3_97, %c0_98] : memref<1x3x32x32xf32, #tpu.memory_space<vmem>>, vector<1x1x28x32xf32>
    %68 = vector.shape_cast %67 : vector<1x1x28x32xf32> to vector<28x32xf32>
    %c3_99 = arith.constant 3 : index
    %c2_100 = arith.constant 2 : index
    %c0_101 = arith.constant 0 : index
    %c0_102 = arith.constant 0 : index
    %69 = vector.load %arg2[%c3_99, %c2_100, %c0_101, %c0_102] : memref<5x3x32x168xf32, #tpu.memory_space<vmem>>, vector<1x1x32x168xf32>
    %70 = vector.shape_cast %69 : vector<1x1x32x168xf32> to vector<32x168xf32>
    %cst_103 = arith.constant dense<0.000000e+00> : vector<28x168xf32>
    %71 = tpu.matmul %68, %70, %cst_103 {dimension_numbers = #tpu.dot_dimension_numbers<[1], [0], [0], [1], [0, 0, 1, 1], [], []>} : vector<28x32xf32>, vector<32x168xf32>, vector<28x168xf32> -> vector<28x168xf32>
    %72 = arith.addf %66, %71 : vector<28x168xf32>
    %c0_104 = arith.constant 0 : index
    %c0_105 = arith.constant 0 : index
    %c4 = arith.constant 4 : index
    %c0_106 = arith.constant 0 : index
    %73 = vector.load %arg1[%c0_104, %c0_105, %c4, %c0_106] : memref<1x3x32x32xf32, #tpu.memory_space<vmem>>, vector<1x1x28x32xf32>
    %74 = vector.shape_cast %73 : vector<1x1x28x32xf32> to vector<28x32xf32>
    %c4_107 = arith.constant 4 : index
    %c0_108 = arith.constant 0 : index
    %c0_109 = arith.constant 0 : index
    %c0_110 = arith.constant 0 : index
    %75 = vector.load %arg2[%c4_107, %c0_108, %c0_109, %c0_110] : memref<5x3x32x168xf32, #tpu.memory_space<vmem>>, vector<1x1x32x168xf32>
    %76 = vector.shape_cast %75 : vector<1x1x32x168xf32> to vector<32x168xf32>
    %cst_111 = arith.constant dense<0.000000e+00> : vector<28x168xf32>
    %77 = tpu.matmul %74, %76, %cst_111 {dimension_numbers = #tpu.dot_dimension_numbers<[1], [0], [0], [1], [0, 0, 1, 1], [], []>} : vector<28x32xf32>, vector<32x168xf32>, vector<28x168xf32> -> vector<28x168xf32>
    %78 = arith.addf %72, %77 : vector<28x168xf32>
    %c0_112 = arith.constant 0 : index
    %c1_113 = arith.constant 1 : index
    %c4_114 = arith.constant 4 : index
    %c0_115 = arith.constant 0 : index
    %79 = vector.load %arg1[%c0_112, %c1_113, %c4_114, %c0_115] : memref<1x3x32x32xf32, #tpu.memory_space<vmem>>, vector<1x1x28x32xf32>
    %80 = vector.shape_cast %79 : vector<1x1x28x32xf32> to vector<28x32xf32>
    %c4_116 = arith.constant 4 : index
    %c1_117 = arith.constant 1 : index
    %c0_118 = arith.constant 0 : index
    %c0_119 = arith.constant 0 : index
    %81 = vector.load %arg2[%c4_116, %c1_117, %c0_118, %c0_119] : memref<5x3x32x168xf32, #tpu.memory_space<vmem>>, vector<1x1x32x168xf32>
    %82 = vector.shape_cast %81 : vector<1x1x32x168xf32> to vector<32x168xf32>
    %cst_120 = arith.constant dense<0.000000e+00> : vector<28x168xf32>
    %83 = tpu.matmul %80, %82, %cst_120 {dimension_numbers = #tpu.dot_dimension_numbers<[1], [0], [0], [1], [0, 0, 1, 1], [], []>} : vector<28x32xf32>, vector<32x168xf32>, vector<28x168xf32> -> vector<28x168xf32>
    %84 = arith.addf %78, %83 : vector<28x168xf32>
    %c0_121 = arith.constant 0 : index
    %c2_122 = arith.constant 2 : index
    %c4_123 = arith.constant 4 : index
    %c0_124 = arith.constant 0 : index
    %85 = vector.load %arg1[%c0_121, %c2_122, %c4_123, %c0_124] : memref<1x3x32x32xf32, #tpu.memory_space<vmem>>, vector<1x1x28x32xf32>
    %86 = vector.shape_cast %85 : vector<1x1x28x32xf32> to vector<28x32xf32>
    %c4_125 = arith.constant 4 : index
    %c2_126 = arith.constant 2 : index
    %c0_127 = arith.constant 0 : index
    %c0_128 = arith.constant 0 : index
    %87 = vector.load %arg2[%c4_125, %c2_126, %c0_127, %c0_128] : memref<5x3x32x168xf32, #tpu.memory_space<vmem>>, vector<1x1x32x168xf32>
    %88 = vector.shape_cast %87 : vector<1x1x32x168xf32> to vector<32x168xf32>
    %cst_129 = arith.constant dense<0.000000e+00> : vector<28x168xf32>
    %89 = tpu.matmul %86, %88, %cst_129 {dimension_numbers = #tpu.dot_dimension_numbers<[1], [0], [0], [1], [0, 0, 1, 1], [], []>} : vector<28x32xf32>, vector<32x168xf32>, vector<28x168xf32> -> vector<28x168xf32>
    %90 = arith.addf %84, %89 : vector<28x168xf32>
    %c0_130 = arith.constant 0 : index
    %c0_131 = arith.constant 0 : index
    %91 = vector.load %arg3[%c0_130, %c0_131] : memref<1x168xf32, #tpu.memory_space<vmem>>, vector<1x168xf32>
    %92 = vector.broadcast %91 : vector<1x168xf32> to vector<28x168xf32>
    %93 = arith.addf %90, %92 : vector<28x168xf32>
    %cst_132 = arith.constant 0.000000e+00 : f32
    %94 = vector.broadcast %cst_132 : f32 to vector<28x168xf32>
    %95 = arith.maximumf %93, %94 : vector<28x168xf32>
    %96 = tpu.iota {dimensions = array<i32: 1>} : vector<14x28xi32>
    %97 = tpu.iota {dimensions = array<i32: 0>} : vector<14x28xi32>
    %c2_i32 = arith.constant 2 : i32
    %98 = vector.broadcast %c2_i32 : i32 to vector<14x28xi32>
    %99 = arith.muli %98, %97 : vector<14x28xi32>
    %100 = arith.cmpi eq, %96, %99 : vector<14x28xi32>
    %101 = arith.extui %100 : vector<14x28xi1> to vector<14x28xi32>
    %102 = arith.sitofp %101 : vector<14x28xi32> to vector<14x28xf32>
    %cst_133 = arith.constant dense<0.000000e+00> : vector<14x168xf32>
    %103 = tpu.matmul %102, %95, %cst_133 {dimension_numbers = #tpu.dot_dimension_numbers<[1], [0], [0], [1], [0, 0, 1, 1], [], []>} : vector<14x28xf32>, vector<28x168xf32>, vector<14x168xf32> -> vector<14x168xf32>
    %c2_i32_134 = arith.constant 2 : i32
    %104 = vector.broadcast %c2_i32_134 : i32 to vector<14x28xi32>
    %105 = arith.muli %104, %97 : vector<14x28xi32>
    %c1_i32 = arith.constant 1 : i32
    %106 = vector.broadcast %c1_i32 : i32 to vector<14x28xi32>
    %107 = arith.addi %105, %106 : vector<14x28xi32>
    %108 = arith.cmpi eq, %96, %107 : vector<14x28xi32>
    %109 = arith.extui %108 : vector<14x28xi1> to vector<14x28xi32>
    %110 = arith.sitofp %109 : vector<14x28xi32> to vector<14x28xf32>
    %cst_135 = arith.constant dense<0.000000e+00> : vector<14x168xf32>
    %111 = tpu.matmul %110, %95, %cst_135 {dimension_numbers = #tpu.dot_dimension_numbers<[1], [0], [0], [1], [0, 0, 1, 1], [], []>} : vector<14x28xf32>, vector<28x168xf32>, vector<14x168xf32> -> vector<14x168xf32>
    %112 = arith.maximumf %103, %111 : vector<14x168xf32>
    %113 = tpu.iota {dimensions = array<i32: 0>} : vector<168x84xi32>
    %114 = tpu.iota {dimensions = array<i32: 1>} : vector<168x84xi32>
    %c2_i32_136 = arith.constant 2 : i32
    %115 = vector.broadcast %c2_i32_136 : i32 to vector<168x84xi32>
    %116 = arith.muli %115, %114 : vector<168x84xi32>
    %117 = arith.cmpi eq, %113, %116 : vector<168x84xi32>
    %118 = arith.extui %117 : vector<168x84xi1> to vector<168x84xi32>
    %119 = arith.sitofp %118 : vector<168x84xi32> to vector<168x84xf32>
    %cst_137 = arith.constant dense<0.000000e+00> : vector<14x84xf32>
    %120 = tpu.matmul %112, %119, %cst_137 {dimension_numbers = #tpu.dot_dimension_numbers<[1], [0], [0], [1], [0, 0, 1, 1], [], []>} : vector<14x168xf32>, vector<168x84xf32>, vector<14x84xf32> -> vector<14x84xf32>
    %c2_i32_138 = arith.constant 2 : i32
    %121 = vector.broadcast %c2_i32_138 : i32 to vector<168x84xi32>
    %122 = arith.muli %121, %114 : vector<168x84xi32>
    %c1_i32_139 = arith.constant 1 : i32
    %123 = vector.broadcast %c1_i32_139 : i32 to vector<168x84xi32>
    %124 = arith.addi %122, %123 : vector<168x84xi32>
    %125 = arith.cmpi eq, %113, %124 : vector<168x84xi32>
    %126 = arith.extui %125 : vector<168x84xi1> to vector<168x84xi32>
    %127 = arith.sitofp %126 : vector<168x84xi32> to vector<168x84xf32>
    %cst_140 = arith.constant dense<0.000000e+00> : vector<14x84xf32>
    %128 = tpu.matmul %112, %127, %cst_140 {dimension_numbers = #tpu.dot_dimension_numbers<[1], [0], [0], [1], [0, 0, 1, 1], [], []>} : vector<14x168xf32>, vector<168x84xf32>, vector<14x84xf32> -> vector<14x84xf32>
    %129 = arith.maximumf %120, %128 : vector<14x84xf32>
    %c0_141 = arith.constant 0 : index
    %c0_142 = arith.constant 0 : index
    %130 = vector.load %arg13[%c0_141, %c0_142] : memref<14x84xf32, #tpu.memory_space<vmem>>, vector<14x84xf32>
    tpu.vector_store %arg13[%c0_141, %c0_142], %129 {strides = array<i32>} : memref<14x84xf32, #tpu.memory_space<vmem>>, vector<14x84xf32>,
    %cst_143 = arith.constant 0.000000e+00 : f32
    %131 = vector.broadcast %cst_143 : f32 to vector<10x160xf32>
    %c0_144 = arith.constant 0 : index
    %c0_145 = arith.constant 0 : index
    %132 = vector.load %arg13[%c0_144, %c0_145] : memref<14x84xf32, #tpu.memory_space<vmem>>, vector<10x84xf32>
    %c0_146 = arith.constant 0 : index
    %c0_147 = arith.constant 0 : index
    %c0_148 = arith.constant 0 : index
    %133 = vector.load %arg4[%c0_146, %c0_147, %c0_148] : memref<5x84x160xf32, #tpu.memory_space<vmem>>, vector<1x84x160xf32>
    %134 = vector.shape_cast %133 : vector<1x84x160xf32> to vector<84x160xf32>
    %cst_149 = arith.constant dense<0.000000e+00> : vector<10x160xf32>
    %135 = tpu.matmul %132, %134, %cst_149 {dimension_numbers = #tpu.dot_dimension_numbers<[1], [0], [0], [1], [0, 0, 1, 1], [], []>} : vector<10x84xf32>, vector<84x160xf32>, vector<10x160xf32> -> vector<10x160xf32>
    %136 = arith.addf %131, %135 : vector<10x160xf32>
    %c1_150 = arith.constant 1 : index
    %c0_151 = arith.constant 0 : index
    %137 = vector.load %arg13[%c1_150, %c0_151] : memref<14x84xf32, #tpu.memory_space<vmem>>, vector<10x84xf32>
    %c1_152 = arith.constant 1 : index
    %c0_153 = arith.constant 0 : index
    %c0_154 = arith.constant 0 : index
    %138 = vector.load %arg4[%c1_152, %c0_153, %c0_154] : memref<5x84x160xf32, #tpu.memory_space<vmem>>, vector<1x84x160xf32>
    %139 = vector.shape_cast %138 : vector<1x84x160xf32> to vector<84x160xf32>
    %cst_155 = arith.constant dense<0.000000e+00> : vector<10x160xf32>
    %140 = tpu.matmul %137, %139, %cst_155 {dimension_numbers = #tpu.dot_dimension_numbers<[1], [0], [0], [1], [0, 0, 1, 1], [], []>} : vector<10x84xf32>, vector<84x160xf32>, vector<10x160xf32> -> vector<10x160xf32>
    %141 = arith.addf %136, %140 : vector<10x160xf32>
    %c2_156 = arith.constant 2 : index
    %c0_157 = arith.constant 0 : index
    %142 = vector.load %arg13[%c2_156, %c0_157] : memref<14x84xf32, #tpu.memory_space<vmem>>, vector<10x84xf32>
    %c2_158 = arith.constant 2 : index
    %c0_159 = arith.constant 0 : index
    %c0_160 = arith.constant 0 : index
    %143 = vector.load %arg4[%c2_158, %c0_159, %c0_160] : memref<5x84x160xf32, #tpu.memory_space<vmem>>, vector<1x84x160xf32>
    %144 = vector.shape_cast %143 : vector<1x84x160xf32> to vector<84x160xf32>
    %cst_161 = arith.constant dense<0.000000e+00> : vector<10x160xf32>
    %145 = tpu.matmul %142, %144, %cst_161 {dimension_numbers = #tpu.dot_dimension_numbers<[1], [0], [0], [1], [0, 0, 1, 1], [], []>} : vector<10x84xf32>, vector<84x160xf32>, vector<10x160xf32> -> vector<10x160xf32>
    %146 = arith.addf %141, %145 : vector<10x160xf32>
    %c3_162 = arith.constant 3 : index
    %c0_163 = arith.constant 0 : index
    %147 = vector.load %arg13[%c3_162, %c0_163] : memref<14x84xf32, #tpu.memory_space<vmem>>, vector<10x84xf32>
    %c3_164 = arith.constant 3 : index
    %c0_165 = arith.constant 0 : index
    %c0_166 = arith.constant 0 : index
    %148 = vector.load %arg4[%c3_164, %c0_165, %c0_166] : memref<5x84x160xf32, #tpu.memory_space<vmem>>, vector<1x84x160xf32>
    %149 = vector.shape_cast %148 : vector<1x84x160xf32> to vector<84x160xf32>
    %cst_167 = arith.constant dense<0.000000e+00> : vector<10x160xf32>
    %150 = tpu.matmul %147, %149, %cst_167 {dimension_numbers = #tpu.dot_dimension_numbers<[1], [0], [0], [1], [0, 0, 1, 1], [], []>} : vector<10x84xf32>, vector<84x160xf32>, vector<10x160xf32> -> vector<10x160xf32>
    %151 = arith.addf %146, %150 : vector<10x160xf32>
    %c4_168 = arith.constant 4 : index
    %c0_169 = arith.constant 0 : index
    %152 = vector.load %arg13[%c4_168, %c0_169] : memref<14x84xf32, #tpu.memory_space<vmem>>, vector<10x84xf32>
    %c4_170 = arith.constant 4 : index
    %c0_171 = arith.constant 0 : index
    %c0_172 = arith.constant 0 : index
    %153 = vector.load %arg4[%c4_170, %c0_171, %c0_172] : memref<5x84x160xf32, #tpu.memory_space<vmem>>, vector<1x84x160xf32>
    %154 = vector.shape_cast %153 : vector<1x84x160xf32> to vector<84x160xf32>
    %cst_173 = arith.constant dense<0.000000e+00> : vector<10x160xf32>
    %155 = tpu.matmul %152, %154, %cst_173 {dimension_numbers = #tpu.dot_dimension_numbers<[1], [0], [0], [1], [0, 0, 1, 1], [], []>} : vector<10x84xf32>, vector<84x160xf32>, vector<10x160xf32> -> vector<10x160xf32>
    %156 = arith.addf %151, %155 : vector<10x160xf32>
    %c0_174 = arith.constant 0 : index
    %c0_175 = arith.constant 0 : index
    %157 = vector.load %arg5[%c0_174, %c0_175] : memref<1x160xf32, #tpu.memory_space<vmem>>, vector<1x160xf32>
    %158 = vector.broadcast %157 : vector<1x160xf32> to vector<10x160xf32>
    %159 = arith.addf %156, %158 : vector<10x160xf32>
    %cst_176 = arith.constant 0.000000e+00 : f32
    %160 = vector.broadcast %cst_176 : f32 to vector<10x160xf32>
    %161 = arith.maximumf %159, %160 : vector<10x160xf32>
    %162 = tpu.iota {dimensions = array<i32: 1>} : vector<5x10xi32>
    %163 = tpu.iota {dimensions = array<i32: 0>} : vector<5x10xi32>
    %c2_i32_177 = arith.constant 2 : i32
    %164 = vector.broadcast %c2_i32_177 : i32 to vector<5x10xi32>
    %165 = arith.muli %164, %163 : vector<5x10xi32>
    %166 = arith.cmpi eq, %162, %165 : vector<5x10xi32>
    %167 = arith.extui %166 : vector<5x10xi1> to vector<5x10xi32>
    %168 = arith.sitofp %167 : vector<5x10xi32> to vector<5x10xf32>
    %cst_178 = arith.constant dense<0.000000e+00> : vector<5x160xf32>
    %169 = tpu.matmul %168, %161, %cst_178 {dimension_numbers = #tpu.dot_dimension_numbers<[1], [0], [0], [1], [0, 0, 1, 1], [], []>} : vector<5x10xf32>, vector<10x160xf32>, vector<5x160xf32> -> vector<5x160xf32>
    %c2_i32_179 = arith.constant 2 : i32
    %170 = vector.broadcast %c2_i32_179 : i32 to vector<5x10xi32>
    %171 = arith.muli %170, %163 : vector<5x10xi32>
    %c1_i32_180 = arith.constant 1 : i32
    %172 = vector.broadcast %c1_i32_180 : i32 to vector<5x10xi32>
    %173 = arith.addi %171, %172 : vector<5x10xi32>
    %174 = arith.cmpi eq, %162, %173 : vector<5x10xi32>
    %175 = arith.extui %174 : vector<5x10xi1> to vector<5x10xi32>
    %176 = arith.sitofp %175 : vector<5x10xi32> to vector<5x10xf32>
    %cst_181 = arith.constant dense<0.000000e+00> : vector<5x160xf32>
    %177 = tpu.matmul %176, %161, %cst_181 {dimension_numbers = #tpu.dot_dimension_numbers<[1], [0], [0], [1], [0, 0, 1, 1], [], []>} : vector<5x10xf32>, vector<10x160xf32>, vector<5x160xf32> -> vector<5x160xf32>
    %178 = arith.maximumf %169, %177 : vector<5x160xf32>
    %179 = tpu.iota {dimensions = array<i32: 0>} : vector<160x80xi32>
    %180 = tpu.iota {dimensions = array<i32: 1>} : vector<160x80xi32>
    %c2_i32_182 = arith.constant 2 : i32
    %181 = vector.broadcast %c2_i32_182 : i32 to vector<160x80xi32>
    %182 = arith.muli %181, %180 : vector<160x80xi32>
    %183 = arith.cmpi eq, %179, %182 : vector<160x80xi32>
    %184 = arith.extui %183 : vector<160x80xi1> to vector<160x80xi32>
    %185 = arith.sitofp %184 : vector<160x80xi32> to vector<160x80xf32>
    %cst_183 = arith.constant dense<0.000000e+00> : vector<5x80xf32>
    %186 = tpu.matmul %178, %185, %cst_183 {dimension_numbers = #tpu.dot_dimension_numbers<[1], [0], [0], [1], [0, 0, 1, 1], [], []>} : vector<5x160xf32>, vector<160x80xf32>, vector<5x80xf32> -> vector<5x80xf32>
    %c2_i32_184 = arith.constant 2 : i32
    %187 = vector.broadcast %c2_i32_184 : i32 to vector<160x80xi32>
    %188 = arith.muli %187, %180 : vector<160x80xi32>
    %c1_i32_185 = arith.constant 1 : i32
    %189 = vector.broadcast %c1_i32_185 : i32 to vector<160x80xi32>
    %190 = arith.addi %188, %189 : vector<160x80xi32>
    %191 = arith.cmpi eq, %179, %190 : vector<160x80xi32>
    %192 = arith.extui %191 : vector<160x80xi1> to vector<160x80xi32>
    %193 = arith.sitofp %192 : vector<160x80xi32> to vector<160x80xf32>
    %cst_186 = arith.constant dense<0.000000e+00> : vector<5x80xf32>
    %194 = tpu.matmul %178, %193, %cst_186 {dimension_numbers = #tpu.dot_dimension_numbers<[1], [0], [0], [1], [0, 0, 1, 1], [], []>} : vector<5x160xf32>, vector<160x80xf32>, vector<5x80xf32> -> vector<5x80xf32>
    %195 = arith.maximumf %186, %194 : vector<5x80xf32>
    %c0_187 = arith.constant 0 : index
    %c0_188 = arith.constant 0 : index
    %196 = vector.load %arg14[%c0_187, %c0_188] : memref<5x80xf32, #tpu.memory_space<vmem>>, vector<5x80xf32>
    tpu.vector_store %arg14[%c0_187, %c0_188], %195 {strides = array<i32>} : memref<5x80xf32, #tpu.memory_space<vmem>>, vector<5x80xf32>,
    %c0_189 = arith.constant 0 : index
    %c0_190 = arith.constant 0 : index
    %197 = vector.load %arg7[%c0_189, %c0_190] : memref<1x128xf32, #tpu.memory_space<vmem>>, vector<1x128xf32>
    %c0_191 = arith.constant 0 : index
    %c0_192 = arith.constant 0 : index
    %198 = vector.load %arg14[%c0_191, %c0_192] : memref<5x80xf32, #tpu.memory_space<vmem>>, vector<1x80xf32>
    %c0_193 = arith.constant 0 : index
    %c0_194 = arith.constant 0 : index
    %c0_195 = arith.constant 0 : index
    %199 = vector.load %arg6[%c0_193, %c0_194, %c0_195] : memref<5x80x128xf32, #tpu.memory_space<vmem>>, vector<1x80x128xf32>
    %200 = vector.shape_cast %199 : vector<1x80x128xf32> to vector<80x128xf32>
    %cst_196 = arith.constant dense<0.000000e+00> : vector<1x128xf32>
    %201 = tpu.matmul %198, %200, %cst_196 {dimension_numbers = #tpu.dot_dimension_numbers<[1], [0], [0], [1], [0, 0, 1, 1], [], []>} : vector<1x80xf32>, vector<80x128xf32>, vector<1x128xf32> -> vector<1x128xf32>
    %202 = arith.addf %197, %201 : vector<1x128xf32>
    %c1_197 = arith.constant 1 : index
    %c0_198 = arith.constant 0 : index
    %203 = vector.load %arg14[%c1_197, %c0_198] : memref<5x80xf32, #tpu.memory_space<vmem>>, vector<1x80xf32>
    %c1_199 = arith.constant 1 : index
    %c0_200 = arith.constant 0 : index
    %c0_201 = arith.constant 0 : index
    %204 = vector.load %arg6[%c1_199, %c0_200, %c0_201] : memref<5x80x128xf32, #tpu.memory_space<vmem>>, vector<1x80x128xf32>
    %205 = vector.shape_cast %204 : vector<1x80x128xf32> to vector<80x128xf32>
    %cst_202 = arith.constant dense<0.000000e+00> : vector<1x128xf32>
    %206 = tpu.matmul %203, %205, %cst_202 {dimension_numbers = #tpu.dot_dimension_numbers<[1], [0], [0], [1], [0, 0, 1, 1], [], []>} : vector<1x80xf32>, vector<80x128xf32>, vector<1x128xf32> -> vector<1x128xf32>
    %207 = arith.addf %202, %206 : vector<1x128xf32>
    %c2_203 = arith.constant 2 : index
    %c0_204 = arith.constant 0 : index
    %208 = vector.load %arg14[%c2_203, %c0_204] : memref<5x80xf32, #tpu.memory_space<vmem>>, vector<1x80xf32>
    %c2_205 = arith.constant 2 : index
    %c0_206 = arith.constant 0 : index
    %c0_207 = arith.constant 0 : index
    %209 = vector.load %arg6[%c2_205, %c0_206, %c0_207] : memref<5x80x128xf32, #tpu.memory_space<vmem>>, vector<1x80x128xf32>
    %210 = vector.shape_cast %209 : vector<1x80x128xf32> to vector<80x128xf32>
    %cst_208 = arith.constant dense<0.000000e+00> : vector<1x128xf32>
    %211 = tpu.matmul %208, %210, %cst_208 {dimension_numbers = #tpu.dot_dimension_numbers<[1], [0], [0], [1], [0, 0, 1, 1], [], []>} : vector<1x80xf32>, vector<80x128xf32>, vector<1x128xf32> -> vector<1x128xf32>
    %212 = arith.addf %207, %211 : vector<1x128xf32>
    %c3_209 = arith.constant 3 : index
    %c0_210 = arith.constant 0 : index
    %213 = vector.load %arg14[%c3_209, %c0_210] : memref<5x80xf32, #tpu.memory_space<vmem>>, vector<1x80xf32>
    %c3_211 = arith.constant 3 : index
    %c0_212 = arith.constant 0 : index
    %c0_213 = arith.constant 0 : index
    %214 = vector.load %arg6[%c3_211, %c0_212, %c0_213] : memref<5x80x128xf32, #tpu.memory_space<vmem>>, vector<1x80x128xf32>
    %215 = vector.shape_cast %214 : vector<1x80x128xf32> to vector<80x128xf32>
    %cst_214 = arith.constant dense<0.000000e+00> : vector<1x128xf32>
    %216 = tpu.matmul %213, %215, %cst_214 {dimension_numbers = #tpu.dot_dimension_numbers<[1], [0], [0], [1], [0, 0, 1, 1], [], []>} : vector<1x80xf32>, vector<80x128xf32>, vector<1x128xf32> -> vector<1x128xf32>
    %217 = arith.addf %212, %216 : vector<1x128xf32>
    %c4_215 = arith.constant 4 : index
    %c0_216 = arith.constant 0 : index
    %218 = vector.load %arg14[%c4_215, %c0_216] : memref<5x80xf32, #tpu.memory_space<vmem>>, vector<1x80xf32>
    %c4_217 = arith.constant 4 : index
    %c0_218 = arith.constant 0 : index
    %c0_219 = arith.constant 0 : index
    %219 = vector.load %arg6[%c4_217, %c0_218, %c0_219] : memref<5x80x128xf32, #tpu.memory_space<vmem>>, vector<1x80x128xf32>
    %220 = vector.shape_cast %219 : vector<1x80x128xf32> to vector<80x128xf32>
    %cst_220 = arith.constant dense<0.000000e+00> : vector<1x128xf32>
    %221 = tpu.matmul %218, %220, %cst_220 {dimension_numbers = #tpu.dot_dimension_numbers<[1], [0], [0], [1], [0, 0, 1, 1], [], []>} : vector<1x80xf32>, vector<80x128xf32>, vector<1x128xf32> -> vector<1x128xf32>
    %222 = arith.addf %217, %221 : vector<1x128xf32>
    %cst_221 = arith.constant 0.000000e+00 : f32
    %223 = vector.broadcast %cst_221 : f32 to vector<1x128xf32>
    %224 = arith.maximumf %222, %223 : vector<1x128xf32>
    %c0_222 = arith.constant 0 : index
    %c0_223 = arith.constant 0 : index
    %225 = vector.load %arg8[%c0_222, %c0_223] : memref<128x128xf32, #tpu.memory_space<vmem>>, vector<128x128xf32>
    %cst_224 = arith.constant dense<0.000000e+00> : vector<1x128xf32>
    %226 = tpu.matmul %224, %225, %cst_224 {dimension_numbers = #tpu.dot_dimension_numbers<[1], [0], [0], [1], [0, 0, 1, 1], [], []>} : vector<1x128xf32>, vector<128x128xf32>, vector<1x128xf32> -> vector<1x128xf32>
    %c0_225 = arith.constant 0 : index
    %c0_226 = arith.constant 0 : index
    %227 = vector.load %arg9[%c0_225, %c0_226] : memref<1x128xf32, #tpu.memory_space<vmem>>, vector<1x128xf32>
    %228 = arith.addf %226, %227 : vector<1x128xf32>
    %cst_227 = arith.constant 0.000000e+00 : f32
    %229 = vector.broadcast %cst_227 : f32 to vector<1x128xf32>
    %230 = arith.maximumf %228, %229 : vector<1x128xf32>
    %c0_228 = arith.constant 0 : index
    %c0_229 = arith.constant 0 : index
    %231 = vector.load %arg10[%c0_228, %c0_229] : memref<128x10xf32, #tpu.memory_space<vmem>>, vector<128x10xf32>
    %cst_230 = arith.constant dense<0.000000e+00> : vector<1x10xf32>
    %232 = tpu.matmul %230, %231, %cst_230 {dimension_numbers = #tpu.dot_dimension_numbers<[1], [0], [0], [1], [0, 0, 1, 1], [], []>} : vector<1x128xf32>, vector<128x10xf32>, vector<1x10xf32> -> vector<1x10xf32>
    %c0_231 = arith.constant 0 : index
    %c0_232 = arith.constant 0 : index
    %233 = vector.load %arg11[%c0_231, %c0_232] : memref<1x10xf32, #tpu.memory_space<vmem>>, vector<1x10xf32>
    %234 = arith.addf %232, %233 : vector<1x10xf32>
    %c0_233 = arith.constant 0 : index
    %c0_234 = arith.constant 0 : index
    %c0_235 = arith.constant 0 : index
    %235 = vector.load %arg12[%c0_233, %c0_234, %c0_235] : memref<1x1x10xf32, #tpu.memory_space<vmem>>, vector<1x1x10xf32>
    %236 = vector.shape_cast %235 : vector<1x1x10xf32> to vector<1x10xf32>
    %237 = vector.shape_cast %234 : vector<1x10xf32> to vector<1x1x10xf32>
    tpu.vector_store %arg12[%c0_233, %c0_234, %c0_235], %237 {strides = array<i32>} : memref<1x1x10xf32, #tpu.memory_space<vmem>>, vector<1x1x10xf32>,
    return
  }
  func.func @transform_0(%arg0: i32) -> (i32, i32, i32, i32) {
    %c0_i32 = arith.constant 0 : i32
    %c0_i32_0 = arith.constant 0 : i32
    %c0_i32_1 = arith.constant 0 : i32
    %c0_i32_2 = arith.constant 0 : i32
    return %arg0, %c0_i32, %c0_i32_0, %c0_i32_1 : i32, i32, i32, i32
  }
  func.func @transform_1(%arg0: i32) -> (i32, i32, i32, i32) {
    %c0_i32 = arith.constant 0 : i32
    %c0_i32_0 = arith.constant 0 : i32
    %c0_i32_1 = arith.constant 0 : i32
    %c0_i32_2 = arith.constant 0 : i32
    %c0_i32_3 = arith.constant 0 : i32
    return %c0_i32, %c0_i32_0, %c0_i32_1, %c0_i32_2 : i32, i32, i32, i32
  }
  func.func @transform_2(%arg0: i32) -> (i32, i32) {
    %c0_i32 = arith.constant 0 : i32
    %c0_i32_0 = arith.constant 0 : i32
    %c0_i32_1 = arith.constant 0 : i32
    return %c0_i32, %c0_i32_0 : i32, i32
  }
  func.func @transform_3(%arg0: i32) -> (i32, i32, i32) {
    %c0_i32 = arith.constant 0 : i32
    %c0_i32_0 = arith.constant 0 : i32
    %c0_i32_1 = arith.constant 0 : i32
    %c0_i32_2 = arith.constant 0 : i32
    return %c0_i32, %c0_i32_0, %c0_i32_1 : i32, i32, i32
  }
  func.func @transform_4(%arg0: i32) -> (i32, i32) {
    %c0_i32 = arith.constant 0 : i32
    %c0_i32_0 = arith.constant 0 : i32
    %c0_i32_1 = arith.constant 0 : i32
    return %c0_i32, %c0_i32_0 : i32, i32
  }
  func.func @transform_5(%arg0: i32) -> (i32, i32, i32) {
    %c0_i32 = arith.constant 0 : i32
    %c0_i32_0 = arith.constant 0 : i32
    %c0_i32_1 = arith.constant 0 : i32
    %c0_i32_2 = arith.constant 0 : i32
    return %c0_i32, %c0_i32_0, %c0_i32_1 : i32, i32, i32
  }
  func.func @transform_6(%arg0: i32) -> (i32, i32) {
    %c0_i32 = arith.constant 0 : i32
    %c0_i32_0 = arith.constant 0 : i32
    %c0_i32_1 = arith.constant 0 : i32
    return %c0_i32, %c0_i32_0 : i32, i32
  }
  func.func @transform_7(%arg0: i32) -> (i32, i32) {
    %c0_i32 = arith.constant 0 : i32
    %c0_i32_0 = arith.constant 0 : i32
    %c0_i32_1 = arith.constant 0 : i32
    return %c0_i32, %c0_i32_0 : i32, i32
  }
  func.func @transform_8(%arg0: i32) -> (i32, i32) {
    %c0_i32 = arith.constant 0 : i32
    %c0_i32_0 = arith.constant 0 : i32
    %c0_i32_1 = arith.constant 0 : i32
    return %c0_i32, %c0_i32_0 : i32, i32
  }
  func.func @transform_9(%arg0: i32) -> (i32, i32) {
    %c0_i32 = arith.constant 0 : i32
    %c0_i32_0 = arith.constant 0 : i32
    %c0_i32_1 = arith.constant 0 : i32
    return %c0_i32, %c0_i32_0 : i32, i32
  }
  func.func @transform_10(%arg0: i32) -> (i32, i32) {
    %c0_i32 = arith.constant 0 : i32
    %c0_i32_0 = arith.constant 0 : i32
    %c0_i32_1 = arith.constant 0 : i32
    return %c0_i32, %c0_i32_0 : i32, i32
  }
  func.func @transform_11(%arg0: i32) -> (i32, i32, i32) {
    %c0_i32 = arith.constant 0 : i32
    %c0_i32_0 = arith.constant 0 : i32
    %c0_i32_1 = arith.constant 0 : i32
    return %arg0, %c0_i32, %c0_i32_0 : i32, i32, i32
  }
}

</mosaic_0001>

<bundles_post_ra>
// kernel: forward.1
= control target key start
LH: loop header
LB: loop body
LE: loop exit
PB: predicated region body
PF: predicated region fallthrough
CT: control target
= control target key end

     0   :  { %16 = vsyncpa [#allocation5], 0  ;;  %s7420_s0 = inlined_call_operand.vmem [shape: f32[2,3,32,32], index: 0, kind: input, shape index: {}]   ;;  %s7421_s1 = inlined_call_operand.vmem [shape: f32[5,3,32,168], index: 1, kind: input, shape index: {}]   ;;  %s7422_s2 = inlined_call_operand.vmem [shape: f32[1,168], index: 2, kind: input, shape index: {}]   ;;  %s7423_s3 = inlined_call_operand.vmem [shape: f32[5,84,160], index: 3, kind: input, shape index: {}]   ;;  %s7424_s4 = inlined_call_operand.vmem [shape: f32[1,160], index: 4, kind: input, shape index: {}]   ;;  %s7425_s5 = inlined_call_operand.vmem [shape: f32[5,80,128], index: 5, kind: input, shape index: {}]   ;;  %s7426_s6 = inlined_call_operand.vmem [shape: f32[1,128], index: 6, kind: input, shape index: {}]   ;;  %s7427_s7 = inlined_call_operand.vmem [shape: f32[128,128], index: 7, kind: input, shape index: {}]   ;;  %s7428_s8 = inlined_call_operand.vmem [shape: f32[1,128], index: 8, kind: input, shape index: {}]   ;;  %s7429_s9 = inlined_call_operand.vmem [shape: f32[128,10], index: 9, kind: input, shape index: {}]   ;;  %s7430_s10 = inlined_call_operand.vmem [shape: f32[1,10], index: 10, kind: input, shape index: {}]   ;;  %s7431_s11 = inlined_call_operand.hbm [shape: f32[2,1,10], index: 11, kind: output, shape index: {}]  }
   0x1   :  { %18 = vsyncpa [#allocation5 + $0x1], 0  ;;  %s5289_s17 = smov 0   ;;  %s5291_s18 = smov 0  }
   0x2   :  { %s5293_s19 = smov 0   ;;  %s5295_s20 = smov 0  }
   0x3 LB: > { %7499 = sst [smem:[#allocation7_spill]] %s5219_s19  ;;  %s5310_s21 = sadd.s32 4294967295, %s5223_s20   ;;  %s5223_s20 = sphi %s5295_s20, %s7596_s20   ;;  %s5219_s19 = sphi %s5293_s19, %s7593_s19   ;;  %s5215_s18 = sphi %s5291_s18, %s7595_s18   ;;  %s5211_s17 = sphi %s5289_s17, %s7594_s17  }
   0x4   : > { %s4317_s22 = sadd.s32 4294967294, %s5223_s20   ;;  %s5314_s23 = sadd.s32 1, %s5223_s20  }
   0x5   : > { %s267_s24 = sadd.s32 1, %s5219_s19  ;;  %s264_s25 = ssub.s32 %s5223_s20, %s5314_s23 }
   0x6   : > { %p277_p0 = scmp.ne.s32.totalorder %s5219_s19, %s5215_s18  ;;  %p265_p1 = scmp.eq.s32.totalorder %s264_s25, 0 }
   0x7   : > { %p278_p2 = scmp.eq.s32.totalorder %s5310_s21, 1  ;;  %p283_p3 = scmp.ne.s32.totalorder %s5215_s18, %s5211_s17 }
   0x8   : > { %p284_p4 = scmp.eq.s32.totalorder %s4317_s22, 1  ;;  %p4320_p7 = scmp.ge.s32.totalorder %s5223_s20, 1 }
   0x9   : > { %s5325_s26 = scalar_select %p265_p1, %s5219_s19, %s267_s24  }
   0xa   : > { %p5327_p5 = por %p278_p2, %p277_p0  ;;  %p5331_p6 = por %p284_p4, %p283_p3 }
   0xb   : > { %7500 = sst [smem:[#allocation8_spill]] %s5325_s26  ;;  %p340_p8 = scmp.lt.s32.totalorder %s5223_s20, 3 }
   0xd   : > { %p341_p9 = pnand %p4320_p7, %p340_p8 }
   0xf   : > { %344 = sbr.rel (%p341_p9) target bundleno = 2088 (0x828), region = 64 }
  0x14   : > { %v4333_v0 = vld [vmem:[%s7421_s1 + $0x78] sm:$0xff]  ;;  %v4332_v1 = vld [vmem:[%s7421_s1 + $0x70] sm:$0xff]  ;;  %v4331_v2 = vld [vmem:[%s7421_s1 + $0x68] sm:$0xff]  ;;  %p379_p10 = scmp.lt.s32.totalorder %s5310_s21, 1  ;;  %v7435_v4 = vmov 0.0   ;;  %vm7471_vm0 = vcmask 261120  }
  0x15   : > { %447 = vmatprep.subr.mxu0 %v4333_v0  ;;  %v4330_v3 = vld [vmem:[%s7421_s1 + $0x60] sm:$0xff]  ;;  %487 = vmatprep.mubr.f32.mxu0 %v7435_v4  ;;  %v4329_v5 = vld [vmem:[%s7421_s1 + $0x58] sm:$0xff]  ;;  %v4328_v6 = vld [vmem:[%s7421_s1 + $0x50] sm:$0xff]  ;;  %vm2248_vm15 = vcmask 1043456   ;;  %s377_s29 = sand.u32 1, %s5215_s18   ;;  %s4835_s30 = sshll.u32 %s5310_s21, 4 }
  0x16   : > { %448 = vmatpush1.msra.mxu0 %v4332_v1  ;;  %s380_s12 = scalar_select %p379_p10, %s5310_s21, 1  ;;  %v395_v7 = vld [vmem:[%s7421_s1 + $0x38] sm:$0xff]  ;;  %600 = vmatprep.mubr.f32.mxu1 %v7435_v4  ;;  %v394_v8 = vld [vmem:[%s7421_s1 + $0x30] sm:$0xff]  ;;  %v393_v9 = vld [vmem:[%s7421_s1 + $0x28] sm:$0xff] }
  0x17   : > { %449 = vmatprep.subr.mxu0 %v4331_v2  ;;  %5112 = vmatprep.subr.mxu1 %v395_v7  ;;  %v392_v10 = vld [vmem:[%s7421_s1 + $0x20] sm:$0xff]  ;;  %v4327_v11 = vld [vmem:[%s7421_s1 + $0x48] sm:$0xff]  ;;  %v391_v12 = vld [vmem:[%s7421_s1 + $0x18] sm:$0xff]  ;;  %s7385_s16 = scalar_lea.hbm %s7431_s11, %s4835_s30  ;;  %s4250_s22 = scalar_lea.sflag [#allocation5], %s377_s29 }
  0x18   : > { %450 = vmatpush1.msra.mxu0 %v4330_v3  ;;  %s5120_s14 = smul.u32 96, %s380_s12  ;;  %5116 = vmatpush1.msra.mxu1 %v394_v8  ;;  %v4326_v13 = vld [vmem:[%s7421_s1 + $0x40] sm:$0xff]  ;;  %v390_v14 = vld [vmem:[%s7421_s1 + $0x10] sm:$0xff]  ;;  %v389_v15 = vld [vmem:[%s7421_s1 + $0x8] sm:$0xff]  ;;  %s5228_s21 = smov [#allocation4]  }
  0x19   : > { %451 = vmatprep.subr.mxu0 %v4329_v5  ;;  %5113 = vmatprep.subr.mxu1 %v393_v9  ;;  %v388_v17 = vld [vmem:[%s7421_s1] sm:$0xff]  ;;  %v4365_v21 = vld [vmem:[%s7421_s1 + $0xf8] sm:$0xff]  ;;  %v4364_v24 = vld [vmem:[%s7421_s1 + $0xf0] sm:$0xff]  ;;  %s5167_s25 = sshll.u32 %s5228_s21, 4  ;;  %s5168_s25 = int_to_ptr.vmem [resolvable:$false] %s5167_s25 }
  0x1a   : > { %452 = vmatpush1.msra.mxu0 %v4328_v6  ;;  %s5386_s12 = scalar_lea.vmem %s7420_s0, %s5120_s14  ;;  %5117 = vmatpush1.msra.mxu1 %v392_v10  ;;  %v4353_v23 = vld [vmem:[%s7421_s1 + $0xb8] sm:$0xff]  ;;  %v4363_v25 = vld [vmem:[%s7421_s1 + $0xe8] sm:$0xff]  ;;  %v4362_v27 = vld [vmem:[%s7421_s1 + $0xe0] sm:$0xff]  ;;  %s5169_s19 = scalar_lea.vmem %s5168_s25, 32 }
  0x1b   : > { %453 = vmatprep.subr.mxu0 %v4327_v11  ;;  %v4322_v16 = vld [vmem:[%s5386_s12 + $0x20] sm:$0xff]  ;;  %5114 = vmatprep.subr.mxu1 %v391_v12  ;;  %v386_v18 = vld [vmem:[%s5386_s12 + $0x10] sm:$0xff]  ;;  %v4323_v19 = vld [vmem:[%s5386_s12 + $0x28] sm:$0xff] }
  0x1c   : > { %454 = vmatpush1.msra.mxu0 %v4326_v13  ;;  %5118 = vmatpush1.msra.mxu1 %v390_v14  ;;  %v387_v20 = vld [vmem:[%s5386_s12 + $0x18] sm:$0xf]  ;;  %v4324_v22 = vld [vmem:[%s5386_s12 + $0x30] sm:$0xff]  ;;  %v4359_v30 = vld [vmem:[%s7421_s1 + $0xc8] sm:$0xff] }
  0x1d   : > { %4334 = vmatmul.mubr.msk.f32.vlgmr.msra.gmra.mxu0 %vm7471_vm0, %v4322_v16  ;;  %5115 = vmatprep.subr.mxu1 %v389_v15  ;;  %v4325_v26 = vld [vmem:[%s5386_s12 + $0x38] sm:$0xf]  ;;  %v4360_v29 = vld [vmem:[%s7421_s1 + $0xd0] sm:$0xff]  ;;  %v384_v31 = vld [vmem:[%s5386_s12] sm:$0xff] }
  0x1e   : > { %493 = vmatprep.mubr.f32.mxu0 %v7435_v4  ;;  %5119 = vmatpush1.msra.mxu1 %v388_v17  ;;  %v4361_v28 = vld [vmem:[%s7421_s1 + $0xd8] sm:$0xff]  ;;  %v4358_v32 = vld [vmem:[%s7421_s1 + $0xc0] sm:$0xff]  ;;  %v4352_v33 = vld [vmem:[%s7421_s1 + $0xb0] sm:$0xff] }
  0x1f   : > { %548 = vmatprep.subr.mxu0 %v395_v7  ;;  %4340 = vmatmul.mubr.msk.f32.vlgmr.msra.gmra.mxu1 %vm7471_vm0, %v386_v18  ;;  %v4351_v34 = vld [vmem:[%s7421_s1 + $0xa8] sm:$0xff]  ;;  %v4350_v36 = vld [vmem:[%s7421_s1 + $0xa0] sm:$0xff]  ;;  %v4349_v38 = vld [vmem:[%s7421_s1 + $0x98] sm:$0xff] }
  0x20   : > { %549 = vmatpush1.msra.mxu0 %v394_v8  ;;  %606 = vmatprep.mubr.f32.mxu1 %v7435_v4  ;;  %v736_v35 = vld [vmem:[%s5386_s12 + $0x1] sm:$0xff]  ;;  %v4348_v39 = vld [vmem:[%s7421_s1 + $0x90] sm:$0xff]  ;;  %v4381_v44 = vld [vmem:[%s7421_s1 + $0x138] sm:$0xff] }
  0x21   : > { %4335 = vmatmul.mubr.msk.f32.gmra.mxu0 %vm7471_vm0, %v4323_v19  ;;  %550 = vmatprep.subr.mxu0 %v393_v9  ;;  %v385_v37 = vld [vmem:[%s5386_s12 + $0x8] sm:$0xff]  ;;  %v4346_v42 = vld [vmem:[%s7421_s1 + $0x80] sm:$0xff]  ;;  %v4380_v45 = vld [vmem:[%s7421_s1 + $0x130] sm:$0xff] }
  0x22   : > { %499 = vmatprep.mubr.f32.mxu0 %v7435_v4  ;;  %551 = vmatpush1.msra.mxu0 %v392_v10  ;;  %v4347_v40 = vld [vmem:[%s7421_s1 + $0x88] sm:$0xff]  ;;  %v4342_v43 = vld [vmem:[%s5386_s12 + $0x40] sm:$0xff]  ;;  %v738_v46 = vld [vmem:[%s5386_s12 + $0x11] sm:$0xff] }
  0x23   : > { %552 = vmatprep.subr.mxu0 %v391_v12  ;;  %4341 = vmatmul.mubr.msk.f32.gmra.mxu1 %vm7471_vm0, %v387_v20  ;;  %v737_v41 = vld [vmem:[%s5386_s12 + $0x9] sm:$0xff]  ;;  %v4397_v48 = vld [vmem:[%s7421_s1 + $0x178] sm:$0xff]  ;;  %v4378_v49 = vld [vmem:[%s7421_s1 + $0x120] sm:$0xff] }
  0x24   : > { %553 = vmatpush1.msra.mxu0 %v390_v14  ;;  %785 = vmatprep.subr.mxu1 %v4365_v21  ;;  %v4379_v47 = vld [vmem:[%s7421_s1 + $0x128] sm:$0xff]  ;;  %v4396_v51 = vld [vmem:[%s7421_s1 + $0x170] sm:$0xff]  ;;  %v4377_v52 = vld [vmem:[%s7421_s1 + $0x118] sm:$0xff] }
  0x25   : > { %4336 = vmatmul.mubr.msk.f32.gmra.mxu0 %vm7471_vm0, %v4324_v22  ;;  %554 = vmatprep.subr.mxu0 %v389_v15  ;;  %v4343_v50 = vld [vmem:[%s5386_s12 + $0x48] sm:$0xff]  ;;  %v4376_v54 = vld [vmem:[%s7421_s1 + $0x110] sm:$0xff]  ;;  %v4394_v55 = vld [vmem:[%s7421_s1 + $0x160] sm:$0xff] }
  0x26   : > { %505 = vmatprep.mubr.f32.mxu0 %v7435_v4  ;;  %555 = vmatpush1.msra.mxu0 %v388_v17  ;;  %v4395_v53 = vld [vmem:[%s7421_s1 + $0x168] sm:$0xff]  ;;  %v4344_v56 = vld [vmem:[%s5386_s12 + $0x50] sm:$0xff]  ;;  %v739_v57 = vld [vmem:[%s5386_s12 + $0x19] sm:$0xf] }
  0x27   : > { %663 = vmatprep.subr.mxu0 %v4353_v23  ;;  %786 = vmatpush1.msra.mxu1 %v4364_v24  ;;  %v4375_v58 = vld [vmem:[%s7421_s1 + $0x108] sm:$0xff]  ;;  %v4393_v59 = vld [vmem:[%s7421_s1 + $0x158] sm:$0xff]  ;;  %v4374_v60 = vld [vmem:[%s7421_s1 + $0x100] sm:$0xff] }
  0x28   : > { %787 = vmatprep.subr.mxu1 %v4363_v25  ;;  %825 = vmatprep.mubr.f32.mxu1 %v7435_v4  ;;  %v4392_v61 = vld [vmem:[%s7421_s1 + $0x150] sm:$0xff]  ;;  %v4345_v62 = vld [vmem:[%s5386_s12 + $0x58] sm:$0xf]  ;;  %v4391_v63 = vld [vmem:[%s7421_s1 + $0x148] sm:$0xff] }
  0x29   : > { %4337 = vmatmul.mubr.msk.f32.gmra.mxu0 %vm7471_vm0, %v4325_v26  ;;  %788 = vmatpush1.msra.mxu1 %v4362_v27  ;;  %v4390_v0 = vld [vmem:[%s7421_s1 + $0x140] sm:$0xff]  ;;  %v4409_v2 = vld [vmem:[%s7421_s1 + $0x1b8] sm:$0xff]  ;;  %v4424_v6 = vld [vmem:[%s7421_s1 + $0x1f0] sm:$0xff] }
  0x2a   : > { %588 = vmatprep.mubr.f32.mxu0 %v7435_v4  ;;  %789 = vmatprep.subr.mxu1 %v4361_v28  ;;  %v4386_v1 = vld [vmem:[%s5386_s12 + $0x41] sm:$0xff]  ;;  %v4425_v3 = vld [vmem:[%s7421_s1 + $0x1f8] sm:$0xff]  ;;  %v4408_v7 = vld [vmem:[%s7421_s1 + $0x1b0] sm:$0xff] }
  0x2b   : > { %790 = vmatpush1.msra.mxu1 %v4360_v29  ;;  %v4370_v5 = vld [vmem:[%s5386_s12 + $0x21] sm:$0xff]  ;;  %v4387_v8 = vld [vmem:[%s5386_s12 + $0x49] sm:$0xff]  ;;  %v4405_v12 = vld [vmem:[%s7421_s1 + $0x198] sm:$0xff] }
  0x2c   : > { %791 = vmatprep.subr.mxu1 %v4359_v30  ;;  %v4407_v9 = vld [vmem:[%s7421_s1 + $0x1a8] sm:$0xff]  ;;  %v4406_v10 = vld [vmem:[%s7421_s1 + $0x1a0] sm:$0xff]  ;;  %v4388_v14 = vld [vmem:[%s5386_s12 + $0x51] sm:$0xff] }
  0x2d   : > { %4338 = vmatmul.mubr.msk.f32.vlgmr.msra.gmra.mxu0 %vm7471_vm0, %v384_v31  ;;  %792 = vmatpush1.msra.mxu1 %v4358_v32  ;;  %v4371_v11 = vld [vmem:[%s5386_s12 + $0x29] sm:$0xff]  ;;  %v4422_v16 = vld [vmem:[%s7421_s1 + $0x1e0] sm:$0xff]  ;;  %v4372_v17 = vld [vmem:[%s5386_s12 + $0x31] sm:$0xff] }
  0x2e   : > { %664 = vmatpush1.msra.mxu0 %v4352_v33  ;;  %594 = vmatprep.mubr.f32.mxu0 %v7435_v4  ;;  %v4423_v13 = vld [vmem:[%s7421_s1 + $0x1e8] sm:$0xff]  ;;  %v4404_v15 = vld [vmem:[%s7421_s1 + $0x190] sm:$0xff]  ;;  %v4421_v19 = vld [vmem:[%s7421_s1 + $0x1d8] sm:$0xff] }
  0x2f   : > { %665 = vmatprep.subr.mxu0 %v4351_v34  ;;  %4366 = vmatmul.mubr.msk.f32.vlgmr.msra.gmra.mxu1 %vm7471_vm0, %v736_v35  ;;  %v4403_v18 = vld [vmem:[%s7421_s1 + $0x188] sm:$0xff]  ;;  %v4389_v20 = vld [vmem:[%s5386_s12 + $0x59] sm:$0xf]  ;;  %v4402_v21 = vld [vmem:[%s7421_s1 + $0x180] sm:$0xff] }
  0x30   : > { %666 = vmatpush1.msra.mxu0 %v4350_v36  ;;  %831 = vmatprep.mubr.f32.mxu1 %v7435_v4  ;;  %v4420_v22 = vld [vmem:[%s7421_s1 + $0x1d0] sm:$0xff]  ;;  %v4373_v23 = vld [vmem:[%s5386_s12 + $0x39] sm:$0xf]  ;;  %v4419_v24 = vld [vmem:[%s7421_s1 + $0x1c8] sm:$0xff] }
  0x31   : > { %4339 = vmatmul.mubr.msk.f32.gmra.mxu0 %vm7471_vm0, %v385_v37  ;;  %667 = vmatprep.subr.mxu0 %v4349_v38  ;;  %v4418_v25 = vld [vmem:[%s7421_s1 + $0x1c0] sm:$0xff]  ;;  %v4441_v27 = vld [vmem:[%s7421_s1 + $0x238] sm:$0xff]  ;;  %v4452_v30 = vld [vmem:[%s7421_s1 + $0x270] sm:$0xff] }
  0x32   : > { %668 = vmatpush1.msra.mxu0 %v4348_v39  ;;  %703 = vmatprep.mubr.f32.mxu0 %v7435_v4  ;;  %v4414_v26 = vld [vmem:[%s5386_s12 + $0x22] sm:$0xff]  ;;  %v4453_v28 = vld [vmem:[%s7421_s1 + $0x278] sm:$0xff]  ;;  %v4440_v31 = vld [vmem:[%s7421_s1 + $0x230] sm:$0xff] }
  0x33   : > { %669 = vmatprep.subr.mxu0 %v4347_v40  ;;  %4367 = vmatmul.mubr.msk.f32.gmra.mxu1 %vm7471_vm0, %v737_v41  ;;  %v1102_v29 = vld [vmem:[%s5386_s12 + $0x2] sm:$0xff]  ;;  %v4415_v32 = vld [vmem:[%s5386_s12 + $0x2a] sm:$0xff]  ;;  %v4437_v36 = vld [vmem:[%s7421_s1 + $0x218] sm:$0xff] }
  0x34   : > { %670 = vmatpush1.msra.mxu0 %v4346_v42  ;;  %837 = vmatprep.mubr.f32.mxu1 %v7435_v4  ;;  %v4439_v33 = vld [vmem:[%s7421_s1 + $0x228] sm:$0xff]  ;;  %v4438_v34 = vld [vmem:[%s7421_s1 + $0x220] sm:$0xff]  ;;  %v4416_v38 = vld [vmem:[%s5386_s12 + $0x32] sm:$0xff] }
  0x35   : > { %4354 = vmatmul.mubr.msk.f32.vlgmr.msra.gmra.mxu0 %vm7471_vm0, %v4342_v43  ;;  %907 = vmatprep.subr.mxu0 %v4381_v44  ;;  %v1103_v35 = vld [vmem:[%s5386_s12 + $0xa] sm:$0xff]  ;;  %v4450_v40 = vld [vmem:[%s7421_s1 + $0x260] sm:$0xff]  ;;  %v1104_v41 = vld [vmem:[%s5386_s12 + $0x12] sm:$0xff] }
  0x36   : > { %709 = vmatprep.mubr.f32.mxu0 %v7435_v4  ;;  %908 = vmatpush1.msra.mxu0 %v4380_v45  ;;  %v4451_v37 = vld [vmem:[%s7421_s1 + $0x268] sm:$0xff]  ;;  %v4436_v39 = vld [vmem:[%s7421_s1 + $0x210] sm:$0xff]  ;;  %v4449_v43 = vld [vmem:[%s7421_s1 + $0x258] sm:$0xff] }
  0x37   : > { %4368 = vmatmul.mubr.msk.f32.gmra.mxu1 %vm7471_vm0, %v738_v46  ;;  %909 = vmatprep.subr.mxu0 %v4379_v47  ;;  %v4435_v42 = vld [vmem:[%s7421_s1 + $0x208] sm:$0xff]  ;;  %v4417_v44 = vld [vmem:[%s5386_s12 + $0x3a] sm:$0xf]  ;;  %v4434_v45 = vld [vmem:[%s7421_s1 + $0x200] sm:$0xff] }
  0x38   : > { %1029 = vmatprep.subr.mxu1 %v4397_v48  ;;  %910 = vmatpush1.msra.mxu0 %v4378_v49  ;;  %v4448_v46 = vld [vmem:[%s7421_s1 + $0x250] sm:$0xff]  ;;  %v1105_v47 = vld [vmem:[%s5386_s12 + $0x1a] sm:$0xf]  ;;  %v4447_v48 = vld [vmem:[%s7421_s1 + $0x248] sm:$0xff] }
  0x39   : > { %4355 = vmatmul.mubr.msk.f32.gmra.mxu0 %vm7471_vm0, %v4343_v50  ;;  %1030 = vmatpush1.msra.mxu1 %v4396_v51  ;;  %v4446_v49 = vld [vmem:[%s7421_s1 + $0x240] sm:$0xff]  ;;  %v4469_v51 = vld [vmem:[%s7421_s1 + $0x2b8] sm:$0xff] }
  0x3a   : > { %715 = vmatprep.mubr.f32.mxu0 %v7435_v4  ;;  %911 = vmatprep.subr.mxu0 %v4377_v52  ;;  %v1468_v50 = vld [vmem:[%s5386_s12 + $0x3] sm:$0xff]  ;;  %v4485_v52 = vld [vmem:[%s7421_s1 + $0x2f8] sm:$0xff] }
  0x3b   : > { %1031 = vmatprep.subr.mxu1 %v4395_v53  ;;  %843 = vmatprep.mubr.f32.mxu1 %v7435_v4  ;;  %v4430_v53 = vld [vmem:[%s5386_s12 + $0x42] sm:$0xff] }
  0x3c   : > { %912 = vmatpush1.msra.mxu0 %v4376_v54  ;;  %1032 = vmatpush1.msra.mxu1 %v4394_v55  ;;  %v4484_v54 = vld [vmem:[%s7421_s1 + $0x2f0] sm:$0xff] }
  0x3d   : > { %4356 = vmatmul.mubr.msk.f32.gmra.mxu0 %vm7471_vm0, %v4344_v56  ;;  %4369 = vmatmul.mubr.msk.f32.gmra.mxu1 %vm7471_vm0, %v739_v57  ;;  %v4468_v55 = vld [vmem:[%s7421_s1 + $0x2b0] sm:$0xff]  ;;  %v4467_v57 = vld [vmem:[%s7421_s1 + $0x2a8] sm:$0xff] }
  0x3e   : > { %721 = vmatprep.mubr.f32.mxu0 %v7435_v4  ;;  %913 = vmatprep.subr.mxu0 %v4375_v58  ;;  %v1469_v56 = vld [vmem:[%s5386_s12 + $0xb] sm:$0xff]  ;;  %v4466_v58 = vld [vmem:[%s7421_s1 + $0x2a0] sm:$0xff] }
  0x3f   : > { %1033 = vmatprep.subr.mxu1 %v4393_v59  ;;  %914 = vmatpush1.msra.mxu0 %v4374_v60  ;;  %v4431_v59 = vld [vmem:[%s5386_s12 + $0x4a] sm:$0xff]  ;;  %v4465_v60 = vld [vmem:[%s7421_s1 + $0x298] sm:$0xff] }
  0x40   : > { %1034 = vmatpush1.msra.mxu1 %v4392_v61  ;;  %1069 = vmatprep.mubr.f32.mxu1 %v7435_v4  ;;  %v4483_v61 = vld [vmem:[%s7421_s1 + $0x2e8] sm:$0xff] }
  0x41   : > { %4357 = vmatmul.mubr.msk.f32.gmra.mxu0 %vm7471_vm0, %v4345_v62  ;;  %1035 = vmatprep.subr.mxu1 %v4391_v63  ;;  %v1470_v62 = vld [vmem:[%s5386_s12 + $0x13] sm:$0xff] }
  0x42   : > { %947 = vmatprep.mubr.f32.mxu0 %v7435_v4  ;;  %1036 = vmatpush1.msra.mxu1 %v4390_v0  ;;  %v4464_v63 = vld [vmem:[%s7421_s1 + $0x290] sm:$0xff]  ;;  %v4482_v0 = vld [vmem:[%s7421_s1 + $0x2e0] sm:$0xff] }
  0x43   : > { %4398 = vmatmul.mubr.msk.f32.vlgmr.msra.gmra.mxu1 %vm7471_vm0, %v4386_v1  ;;  %1151 = vmatprep.subr.mxu0 %v4409_v2  ;;  %v4432_v1 = vld [vmem:[%s5386_s12 + $0x52] sm:$0xff]  ;;  %v4463_v2 = vld [vmem:[%s7421_s1 + $0x288] sm:$0xff] }
  0x44   : > { %1075 = vmatprep.mubr.f32.mxu1 %v7435_v4  ;;  %1273 = vmatprep.subr.mxu1 %v4425_v3  ;;  %v4481_v3 = vld [vmem:[%s7421_s1 + $0x2d8] sm:$0xff] }
  0x45   : > { %4382 = vmatmul.mubr.msk.f32.vlgmr.msra.gmra.mxu0 %vm7471_vm0, %v4370_v5  ;;  %1274 = vmatpush1.msra.mxu1 %v4424_v6  ;;  %v1471_v5 = vld [vmem:[%s5386_s12 + $0x1b] sm:$0xf]  ;;  %v4462_v6 = vld [vmem:[%s7421_s1 + $0x280] sm:$0xff] }
  0x46   : > { %953 = vmatprep.mubr.f32.mxu0 %v7435_v4  ;;  %1152 = vmatpush1.msra.mxu0 %v4408_v7  ;;  %v4480_v7 = vld [vmem:[%s7421_s1 + $0x2d0] sm:$0xff] }
  0x47   : > { %4399 = vmatmul.mubr.msk.f32.gmra.mxu1 %vm7471_vm0, %v4387_v8  ;;  %1153 = vmatprep.subr.mxu0 %v4407_v9  ;;  %v4433_v8 = vld [vmem:[%s5386_s12 + $0x5a] sm:$0xf]  ;;  %v4479_v9 = vld [vmem:[%s7421_s1 + $0x2c8] sm:$0xff] }
  0x48   : > { %1081 = vmatprep.mubr.f32.mxu1 %v7435_v4  ;;  %1154 = vmatpush1.msra.mxu0 %v4406_v10  ;;  %v4478_v10 = vld [vmem:[%s7421_s1 + $0x2c0] sm:$0xff] }
  0x49   : > { %4383 = vmatmul.mubr.msk.f32.gmra.mxu0 %vm7471_vm0, %v4371_v11  ;;  %1155 = vmatprep.subr.mxu0 %v4405_v12  ;;  %v4474_v11 = vld [vmem:[%s5386_s12 + $0x43] sm:$0xff]  ;;  %v4497_v12 = vld [vmem:[%s7421_s1 + $0x338] sm:$0xff] }
  0x4a   : > { %959 = vmatprep.mubr.f32.mxu0 %v7435_v4  ;;  %1275 = vmatprep.subr.mxu1 %v4423_v13  ;;  %v4513_v13 = vld [vmem:[%s7421_s1 + $0x378] sm:$0xff] }
  0x4b   : > { %4400 = vmatmul.mubr.msk.f32.gmra.mxu1 %vm7471_vm0, %v4388_v14  ;;  %1156 = vmatpush1.msra.mxu0 %v4404_v15  ;;  %v4458_v14 = vld [vmem:[%s5386_s12 + $0x23] sm:$0xff]  ;;  %v4512_v15 = vld [vmem:[%s7421_s1 + $0x370] sm:$0xff] }
  0x4c   : > { %1087 = vmatprep.mubr.f32.mxu1 %v7435_v4  ;;  %1276 = vmatpush1.msra.mxu1 %v4422_v16  ;;  %v4496_v16 = vld [vmem:[%s7421_s1 + $0x330] sm:$0xff] }
  0x4d   : > { %4384 = vmatmul.mubr.msk.f32.gmra.mxu0 %vm7471_vm0, %v4372_v17  ;;  %1157 = vmatprep.subr.mxu0 %v4403_v18  ;;  %v4475_v17 = vld [vmem:[%s5386_s12 + $0x4b] sm:$0xff] }
  0x4e   : > { %965 = vmatprep.mubr.f32.mxu0 %v7435_v4  ;;  %1277 = vmatprep.subr.mxu1 %v4421_v19  ;;  %v4495_v18 = vld [vmem:[%s7421_s1 + $0x328] sm:$0xff]  ;;  %v4494_v19 = vld [vmem:[%s7421_s1 + $0x320] sm:$0xff] }
  0x4f   : > { %4401 = vmatmul.mubr.msk.f32.gmra.mxu1 %vm7471_vm0, %v4389_v20  ;;  %1158 = vmatpush1.msra.mxu0 %v4402_v21  ;;  %v4459_v20 = vld [vmem:[%s5386_s12 + $0x2b] sm:$0xff]  ;;  %v4493_v21 = vld [vmem:[%s7421_s1 + $0x318] sm:$0xff] }
  0x50   : > { %1278 = vmatpush1.msra.mxu1 %v4420_v22  ;;  %1313 = vmatprep.mubr.f32.mxu1 %v7435_v4  ;;  %v4511_v22 = vld [vmem:[%s7421_s1 + $0x368] sm:$0xff] }
  0x51   : > { %4385 = vmatmul.mubr.msk.f32.gmra.mxu0 %vm7471_vm0, %v4373_v23  ;;  %1279 = vmatprep.subr.mxu1 %v4419_v24  ;;  %v4476_v23 = vld [vmem:[%s5386_s12 + $0x53] sm:$0xff] }
  0x52   : > { %1191 = vmatprep.mubr.f32.mxu0 %v7435_v4  ;;  %1280 = vmatpush1.msra.mxu1 %v4418_v25  ;;  %v4492_v24 = vld [vmem:[%s7421_s1 + $0x310] sm:$0xff]  ;;  %v4510_v25 = vld [vmem:[%s7421_s1 + $0x360] sm:$0xff] }
  0x53   : > { %4426 = vmatmul.mubr.msk.f32.vlgmr.msra.gmra.mxu1 %vm7471_vm0, %v4414_v26  ;;  %1395 = vmatprep.subr.mxu0 %v4441_v27  ;;  %v4460_v26 = vld [vmem:[%s5386_s12 + $0x33] sm:$0xff]  ;;  %v4491_v27 = vld [vmem:[%s7421_s1 + $0x308] sm:$0xff] }
  0x54   : > { %1319 = vmatprep.mubr.f32.mxu1 %v7435_v4  ;;  %1517 = vmatprep.subr.mxu1 %v4453_v28  ;;  %v4509_v28 = vld [vmem:[%s7421_s1 + $0x358] sm:$0xff] }
  0x55   : > { %4410 = vmatmul.mubr.msk.f32.vlgmr.msra.gmra.mxu0 %vm7471_vm0, %v1102_v29  ;;  %1518 = vmatpush1.msra.mxu1 %v4452_v30  ;;  %v4477_v29 = vld [vmem:[%s5386_s12 + $0x5b] sm:$0xf]  ;;  %v4490_v30 = vld [vmem:[%s7421_s1 + $0x300] sm:$0xff] }
  0x56   : > { %1197 = vmatprep.mubr.f32.mxu0 %v7435_v4  ;;  %1396 = vmatpush1.msra.mxu0 %v4440_v31  ;;  %v4508_v31 = vld [vmem:[%s7421_s1 + $0x350] sm:$0xff] }
  0x57   : > { %4427 = vmatmul.mubr.msk.f32.gmra.mxu1 %vm7471_vm0, %v4415_v32  ;;  %1397 = vmatprep.subr.mxu0 %v4439_v33  ;;  %v4461_v32 = vld [vmem:[%s5386_s12 + $0x3b] sm:$0xf]  ;;  %v4507_v33 = vld [vmem:[%s7421_s1 + $0x348] sm:$0xff] }
  0x58   : > { %1325 = vmatprep.mubr.f32.mxu1 %v7435_v4  ;;  %1398 = vmatpush1.msra.mxu0 %v4438_v34  ;;  %v4506_v34 = vld [vmem:[%s7421_s1 + $0x340] sm:$0xff] }
  0x59   : > { %4411 = vmatmul.mubr.msk.f32.gmra.mxu0 %vm7471_vm0, %v1103_v35  ;;  %1399 = vmatprep.subr.mxu0 %v4437_v36  ;;  %v4502_v35 = vld [vmem:[%s5386_s12 + $0x24] sm:$0xff]  ;;  %v4529_v36 = vld [vmem:[%s7421_s1 + $0x3b8] sm:$0xff] }
  0x5a   : > { %1203 = vmatprep.mubr.f32.mxu0 %v7435_v4  ;;  %1519 = vmatprep.subr.mxu1 %v4451_v37  ;;  %v1834_v37 = vld [vmem:[%s5386_s12 + $0x4] sm:$0xff] }
  0x5b   : > { %4428 = vmatmul.mubr.msk.f32.gmra.mxu1 %vm7471_vm0, %v4416_v38  ;;  %1400 = vmatpush1.msra.mxu0 %v4436_v39  ;;  %v4528_v38 = vld [vmem:[%s7421_s1 + $0x3b0] sm:$0xff] }
  0x5c   : > { %1331 = vmatprep.mubr.f32.mxu1 %v7435_v4  ;;  %1520 = vmatpush1.msra.mxu1 %v4450_v40  ;;  %v4503_v39 = vld [vmem:[%s5386_s12 + $0x2c] sm:$0xff] }
  0x5d   : > { %4412 = vmatmul.mubr.msk.f32.gmra.mxu0 %vm7471_vm0, %v1104_v41  ;;  %1401 = vmatprep.subr.mxu0 %v4435_v42  ;;  %v4527_v40 = vld [vmem:[%s7421_s1 + $0x3a8] sm:$0xff]  ;;  %v4526_v41 = vld [vmem:[%s7421_s1 + $0x3a0] sm:$0xff] }
  0x5e   : > { %1209 = vmatprep.mubr.f32.mxu0 %v7435_v4  ;;  %1521 = vmatprep.subr.mxu1 %v4449_v43  ;;  %v1835_v42 = vld [vmem:[%s5386_s12 + $0xc] sm:$0xff]  ;;  %v4525_v43 = vld [vmem:[%s7421_s1 + $0x398] sm:$0xff] }
  0x5f   : > { %4429 = vmatmul.mubr.msk.f32.gmra.mxu1 %vm7471_vm0, %v4417_v44  ;;  %1402 = vmatpush1.msra.mxu0 %v4434_v45  ;;  %v4524_v44 = vld [vmem:[%s7421_s1 + $0x390] sm:$0xff] }
  0x60   : > { %1522 = vmatpush1.msra.mxu1 %v4448_v46  ;;  %1557 = vmatprep.mubr.f32.mxu1 %v7435_v4  ;;  %v4504_v45 = vld [vmem:[%s5386_s12 + $0x34] sm:$0xff]  ;;  %v4523_v46 = vld [vmem:[%s7421_s1 + $0x388] sm:$0xff] }
  0x61   : > { %4413 = vmatmul.mubr.msk.f32.gmra.mxu0 %vm7471_vm0, %v1105_v47  ;;  %1523 = vmatprep.subr.mxu1 %v4447_v48  ;;  %v4522_v47 = vld [vmem:[%s7421_s1 + $0x380] sm:$0xff]  ;;  %v1836_v48 = vld [vmem:[%s5386_s12 + $0x14] sm:$0xff] }
  0x62   : > { %1435 = vmatprep.mubr.f32.mxu0 %v7435_v4  ;;  %1524 = vmatpush1.msra.mxu1 %v4446_v49  ;;  %v4505_v49 = vld [vmem:[%s5386_s12 + $0x3c] sm:$0xf] }
  0x63   : > { %4454 = vmatmul.mubr.msk.f32.vlgmr.msra.gmra.mxu1 %vm7471_vm0, %v1468_v50  ;;  %1639 = vmatprep.subr.mxu0 %v4469_v51  ;;  %v1837_v50 = vld [vmem:[%s5386_s12 + $0x1c] sm:$0xf]  ;;  %v4518_v51 = vld [vmem:[%s5386_s12 + $0x44] sm:$0xff] }
  0x64   : > { %1563 = vmatprep.mubr.f32.mxu1 %v7435_v4  ;;  %1761 = vmatprep.subr.mxu1 %v4485_v52  ;;  %v4519_v52 = vld [vmem:[%s5386_s12 + $0x4c] sm:$0xff] }
  0x65   : > { %4442 = vmatmul.mubr.msk.f32.vlgmr.msra.gmra.mxu0 %vm7471_vm0, %v4430_v53  ;;  %1762 = vmatpush1.msra.mxu1 %v4484_v54  ;;  %v4520_v53 = vld [vmem:[%s5386_s12 + $0x54] sm:$0xff]  ;;  %v4521_v54 = vld [vmem:[%s5386_s12 + $0x5c] sm:$0xf]  ;;  %s378_s12 = scalar_lea.vmem [#allocation4], %s377_s29 }
  0x66   : > { %1441 = vmatprep.mubr.f32.mxu0 %v7435_v4  ;;  %1640 = vmatpush1.msra.mxu0 %v4468_v55  ;;  %s4262_s13 = sshll.u32 %s378_s12, 4  ;;  %s4263_s13 = int_to_ptr.vmem [resolvable:$true] %s4262_s13 }
  0x67   : > { %4455 = vmatmul.mubr.msk.f32.gmra.mxu1 %vm7471_vm0, %v1469_v56  ;;  %1641 = vmatprep.subr.mxu0 %v4467_v57  ;;  %s5163_s24 = scalar_lea.vmem %s4263_s13, 16  ;;  %p5170_p0 = scmp.lt.s32.totalorder %s4263_s13, %s5168_s25 }
  0x68   : > { %1569 = vmatprep.mubr.f32.mxu1 %v7435_v4  ;;  %1642 = vmatpush1.msra.mxu0 %v4466_v58  ;;  %p5164_p11 = scmp.ne.s32.totalorder %s4263_s13, %s5163_s24  ;;  %p5171_p1 = scmp.lt.s32.totalorder %s5169_s19, %s5163_s24 }
  0x69   : > { %4443 = vmatmul.mubr.msk.f32.gmra.mxu0 %vm7471_vm0, %v4431_v59  ;;  %1643 = vmatprep.subr.mxu0 %v4465_v60 }
  0x6a   : > { %1447 = vmatprep.mubr.f32.mxu0 %v7435_v4  ;;  %1763 = vmatprep.subr.mxu1 %v4483_v61  ;;  %p5165_p12 = pnand %p5164_p11, %p5327_p5  ;;  %p5172_p2 = por %p5171_p1, %p5170_p0 }
  0x6b   : > { %4456 = vmatmul.mubr.msk.f32.gmra.mxu1 %vm7471_vm0, %v1470_v62  ;;  %1644 = vmatpush1.msra.mxu0 %v4464_v63 }
  0x6c   : > { %1575 = vmatprep.mubr.f32.mxu1 %v7435_v4  ;;  %1764 = vmatpush1.msra.mxu1 %v4482_v0  ;;  %p5166_p13 = pneg %p5165_p12 }
  0x6d   : > { %4444 = vmatmul.mubr.msk.f32.gmra.mxu0 %vm7471_vm0, %v4432_v1  ;;  %1645 = vmatprep.subr.mxu0 %v4463_v2 }
  0x6e   : > { %1453 = vmatprep.mubr.f32.mxu0 %v7435_v4  ;;  %1765 = vmatprep.subr.mxu1 %v4481_v3  ;;  %p5173_p3 = pnand %p5172_p2, %p5166_p13 }
  0x6f   : > { %4457 = vmatmul.mubr.msk.f32.gmra.mxu1 %vm7471_vm0, %v1471_v5  ;;  %1646 = vmatpush1.msra.mxu0 %v4462_v6 }
  0x70   : > { %1766 = vmatpush1.msra.mxu1 %v4480_v7  ;;  %1801 = vmatprep.mubr.f32.mxu1 %v7435_v4 }
  0x71   : > { %4445 = vmatmul.mubr.msk.f32.gmra.mxu0 %vm7471_vm0, %v4433_v8  ;;  %1767 = vmatprep.subr.mxu1 %v4479_v9 }
  0x72   : > { %1679 = vmatprep.mubr.f32.mxu0 %v7435_v4  ;;  %1768 = vmatpush1.msra.mxu1 %v4478_v10 }
  0x73   : > { %4486 = vmatmul.mubr.msk.f32.vlgmr.msra.gmra.mxu1 %vm7471_vm0, %v4474_v11  ;;  %1883 = vmatprep.subr.mxu0 %v4497_v12 }
  0x74   : > { %1807 = vmatprep.mubr.f32.mxu1 %v7435_v4  ;;  %2005 = vmatprep.subr.mxu1 %v4513_v13 }
  0x75   : > { %4470 = vmatmul.mubr.msk.f32.vlgmr.msra.gmra.mxu0 %vm7471_vm0, %v4458_v14  ;;  %2006 = vmatpush1.msra.mxu1 %v4512_v15 }
  0x76   : > { %1685 = vmatprep.mubr.f32.mxu0 %v7435_v4  ;;  %1884 = vmatpush1.msra.mxu0 %v4496_v16 }
  0x77   : > { %4487 = vmatmul.mubr.msk.f32.gmra.mxu1 %vm7471_vm0, %v4475_v17  ;;  %1885 = vmatprep.subr.mxu0 %v4495_v18 }
  0x78   : > { %1813 = vmatprep.mubr.f32.mxu1 %v7435_v4  ;;  %1886 = vmatpush1.msra.mxu0 %v4494_v19 }
  0x79   : > { %4471 = vmatmul.mubr.msk.f32.gmra.mxu0 %vm7471_vm0, %v4459_v20  ;;  %1887 = vmatprep.subr.mxu0 %v4493_v21 }
  0x7a   : > { %1691 = vmatprep.mubr.f32.mxu0 %v7435_v4  ;;  %2007 = vmatprep.subr.mxu1 %v4511_v22 }
  0x7b   : > { %4488 = vmatmul.mubr.msk.f32.gmra.mxu1 %vm7471_vm0, %v4476_v23  ;;  %1888 = vmatpush1.msra.mxu0 %v4492_v24 }
  0x7c   : > { %1819 = vmatprep.mubr.f32.mxu1 %v7435_v4  ;;  %2008 = vmatpush1.msra.mxu1 %v4510_v25 }
  0x7d   : > { %4472 = vmatmul.mubr.msk.f32.gmra.mxu0 %vm7471_vm0, %v4460_v26  ;;  %1889 = vmatprep.subr.mxu0 %v4491_v27  ;;  %v2202_v26 = vlaneseq }
  0x7e   : > { %1697 = vmatprep.mubr.f32.mxu0 %v7435_v4  ;;  %2009 = vmatprep.subr.mxu1 %v4509_v28 }
  0x7f   : > { %4489 = vmatmul.mubr.msk.f32.gmra.mxu1 %vm7471_vm0, %v4477_v29  ;;  %1890 = vmatpush1.msra.mxu0 %v4490_v30 }
  0x80   : > { %2010 = vmatpush1.msra.mxu1 %v4508_v31  ;;  %2045 = vmatprep.mubr.f32.mxu1 %v7435_v4 }
  0x81   : > { %4473 = vmatmul.mubr.msk.f32.gmra.mxu0 %vm7471_vm0, %v4461_v32  ;;  %2011 = vmatprep.subr.mxu1 %v4507_v33  ;;  %v5886_v32 = vand.u32 127, %v2202_v26 }
  0x82   : > { %1923 = vmatprep.mubr.f32.mxu0 %v7435_v4  ;;  %2012 = vmatpush1.msra.mxu1 %v4506_v34 }
  0x83   : > { %4514 = vmatmul.mubr.msk.f32.vlgmr.msra.gmra.mxu1 %vm7471_vm0, %v4502_v35  ;;  %2127 = vmatprep.subr.mxu0 %v4529_v36  ;;  %7503 = vst [vmem:[#allocation9_spill] sm:$0xff] %v5886_v32  ;;  %v5888_v35 = vshrl.u32 %v2202_v26, 7 }
  0x84   : > { %2051 = vmatprep.mubr.f32.mxu1 %v7435_v4 }
  0x85   : > { %4498 = vmatmul.mubr.msk.f32.vlgmr.msra.gmra.mxu0 %vm7471_vm0, %v1834_v37  ;;  %7504 = vst [vmem:[#allocation10_spill] sm:$0xff] %v5888_v35  ;;  %v6041_v26 = vadd.s32 16, %v5888_v35 }
  0x86   : > { %1929 = vmatprep.mubr.f32.mxu0 %v7435_v4  ;;  %2128 = vmatpush1.msra.mxu0 %v4528_v38  ;;  %v5893_v38 = vmul.u32 2, %v5886_v32 }
  0x87   : > { %4515 = vmatmul.mubr.msk.f32.gmra.mxu1 %vm7471_vm0, %v4503_v39  ;;  %2129 = vmatprep.subr.mxu0 %v4527_v40  ;;  %7519 = vst [vmem:[#allocation25_spill] sm:$0xff] %v6041_v26 }
  0x88   : > { %2057 = vmatprep.mubr.f32.mxu1 %v7435_v4  ;;  %2130 = vmatpush1.msra.mxu0 %v4526_v41  ;;  %7505 = vst [vmem:[#allocation11_spill] sm:$0xff] %v5893_v38  ;;  %v5896_v41 = vadd.s32 120, %v5888_v35  ;;  %vm7472_vm14 = vcmp.eq.s32.totalorder %v6041_v26, %v5893_v38 }
  0x89   : > { %4499 = vmatmul.mubr.msk.f32.gmra.mxu0 %vm7471_vm0, %v1835_v42  ;;  %2131 = vmatprep.subr.mxu0 %v4525_v43 }
  0x8a   : > { %1935 = vmatprep.mubr.f32.mxu0 %v7435_v4  ;;  %2132 = vmatpush1.msra.mxu0 %v4524_v44  ;;  %7506 = vst [vmem:[#allocation12_spill] sm:$0xff] %v5896_v41  ;;  %v5901_v44 = vadd.s32 112, %v5888_v35  ;;  %vm7485_vm1 = vcmp.eq.s32.totalorder %v5896_v41, %v5893_v38 }
  0x8b   : > { %4516 = vmatmul.mubr.msk.f32.gmra.mxu1 %vm7471_vm0, %v4504_v45  ;;  %2133 = vmatprep.subr.mxu0 %v4523_v46  ;;  %v5904_v45 = vadd.s32 104, %v5888_v35 }
  0x8c   : > { %2063 = vmatprep.mubr.f32.mxu1 %v7435_v4  ;;  %2134 = vmatpush1.msra.mxu0 %v4522_v47  ;;  %7507 = vst [vmem:[#allocation13_spill] sm:$0xff] %v5901_v44  ;;  %vm7484_vm2 = vcmp.eq.s32.totalorder %v5901_v44, %v5893_v38 }
  0x8d   : > { %4500 = vmatmul.mubr.msk.f32.gmra.mxu0 %vm7471_vm0, %v1836_v48  ;;  %2517 = vmatprep.subr.mxu0 %v7435_v4  ;;  %7508 = vst [vmem:[#allocation14_spill] sm:$0xff] %v5904_v45  ;;  %v5909_v48 = vadd.s32 96, %v5888_v35  ;;  %vm7483_vm3 = vcmp.eq.s32.totalorder %v5904_v45, %v5893_v38 }
  0x8e   : > { %1941 = vmatprep.mubr.f32.mxu0 %v7435_v4 }
  0x8f   : > { %4517 = vmatmul.mubr.msk.f32.gmra.mxu1 %vm7471_vm0, %v4505_v49  ;;  %7509 = vst [vmem:[#allocation15_spill] sm:$0xff] %v5909_v48  ;;  %vm7482_vm4 = vcmp.eq.s32.totalorder %v5909_v48, %v5893_v38 }
  0x90   : > { %2319 = vmatprep.mubr.f32.mxu1 %v7435_v4 }
  0x91   : > { %4501 = vmatmul.mubr.msk.f32.gmra.mxu0 %vm7471_vm0, %v1837_v50  ;;  %v7433_v50 = vmov 1.0  }
  0x92   : > { %2167 = vmatprep.mubr.f32.mxu0 %v7435_v4 }
  0x95   : > { %4530 = vmatmul.mubr.msk.f32.vlgmr.msra.gmra.mxu0 %vm7471_vm0, %v4518_v51 }
  0x96   : > { %2173 = vmatprep.mubr.f32.mxu0 %v7435_v4  ;;  %4567 = vmatpush1.msk.msra.mxu0 %vm7485_vm1, %v7433_v50 }
  0x97   : > { %2519 = vmatprep.subr.mxu0 %v7435_v4 }
  0x98   : > { %4568 = vmatpush1.msk.msra.mxu0 %vm7484_vm2, %v7433_v50 }
  0x99   : > { %4531 = vmatmul.mubr.msk.f32.gmra.mxu0 %vm7471_vm0, %v4519_v52  ;;  %2521 = vmatprep.subr.mxu0 %v7435_v4 }
  0x9a   : > { %2179 = vmatprep.mubr.f32.mxu0 %v7435_v4  ;;  %4569 = vmatpush1.msk.msra.mxu0 %vm7483_vm3, %v7433_v50 }
  0x9b   : > { %2523 = vmatprep.subr.mxu0 %v7435_v4 }
  0x9c   : > { %4570 = vmatpush1.msk.msra.mxu0 %vm7482_vm4, %v7433_v50 }
  0x9d   : > { %4532 = vmatmul.mubr.msk.f32.gmra.mxu0 %vm7471_vm0, %v4520_v53  ;;  %2525 = vmatprep.subr.mxu0 %v7435_v4 }
  0x9e   : > { %2185 = vmatprep.mubr.f32.mxu0 %v7435_v4 }
  0xa1   : > { %4533 = vmatmul.mubr.msk.f32.gmra.mxu0 %vm7471_vm0, %v4521_v54 }
  0xdd   : > { %v489_v55 = vpop.f32.mrf.mxu0 }
  0xdf   : > { %v491_v56 = vpop.f32.mrf.mxu0  ;;  %v602_v57 = vpop.f32.mrf.mxu1 }
  0xe1   : > { %v495_v58 = vpop.f32.mrf.mxu0  ;;  %v604_v59 = vpop.f32.mrf.mxu1 }
  0xe3   : > { %v497_v60 = vpop.f32.mrf.mxu0  ;;  %v608_v62 = vpop.f32.mrf.mxu1 }
  0xe5   : > { %v501_v61 = vpop.f32.mrf.mxu0  ;;  %v610_v3 = vpop.f32.mrf.mxu1 }
  0xe6   : > { %v603_v63 = vadd.f32 %v602_v57, %v501_v61  ;;  %v5935_v57 = vadd.s32 80, %v5888_v35 }
  0xe7   : > { %v503_v0 = vpop.f32.mrf.mxu0 }
  0xe8   : > { %v605_v1 = vadd.f32 %v604_v59, %v503_v0  ;;  %7511 = vst [vmem:[#allocation17_spill] sm:$0xff] %v5935_v57  ;;  %vm7480_vm6 = vcmp.eq.s32.totalorder %v5935_v57, %v5893_v38 }
  0xe9   : > { %v507_v2 = vpop.f32.mrf.mxu0 }
  0xea   : > { %v609_v5 = vadd.f32 %v608_v62, %v507_v2  ;;  %v5957_v2 = vadd.s32 64, %v5888_v35 }
  0xeb   : > { %v509_v6 = vpop.f32.mrf.mxu0 }
  0xec   : > { %v611_v7 = vadd.f32 %v610_v3, %v509_v6  ;;  %7513 = vst [vmem:[#allocation19_spill] sm:$0xff] %v5957_v2  ;;  %vm7478_vm8 = vcmp.eq.s32.totalorder %v5957_v2, %v5893_v38 }
  0xed   : > { %v590_v8 = vpop.f32.mrf.mxu0 }
  0xee   : > { %v591_v9 = vadd.f32 %v590_v8, %v489_v55  ;;  %v5927_v55 = vadd.s32 88, %v5888_v35 }
  0xef   : > { %v592_v10 = vpop.f32.mrf.mxu0  ;;  %v827_v11 = vpop.f32.mrf.mxu1 }
  0xf0   : > { %v593_v12 = vadd.f32 %v592_v10, %v491_v56  ;;  %7510 = vst [vmem:[#allocation16_spill] sm:$0xff] %v5927_v55  ;;  %vm7481_vm5 = vcmp.eq.s32.totalorder %v5927_v55, %v5893_v38  ;;  %v5977_v10 = vadd.s32 56, %v5888_v35 }
  0xf1   : > { %v596_v13 = vpop.f32.mrf.mxu0  ;;  %v829_v14 = vpop.f32.mrf.mxu1  ;;  %4571 = vmatpush1.msk.msra.mxu0 %vm7481_vm5, %v7433_v50 }
  0xf2   : > { %v597_v15 = vadd.f32 %v596_v13, %v495_v58  ;;  %2527 = vmatprep.subr.mxu0 %v7435_v4  ;;  %7514 = vst [vmem:[#allocation20_spill] sm:$0xff] %v5977_v10  ;;  %vm7477_vm9 = vcmp.eq.s32.totalorder %v5977_v10, %v5893_v38 }
  0xf3   : > { %v598_v16 = vpop.f32.mrf.mxu0  ;;  %v833_v17 = vpop.f32.mrf.mxu1  ;;  %4572 = vmatpush1.msk.msra.mxu0 %vm7480_vm6, %v7433_v50 }
  0xf4   : > { %v599_v18 = vadd.f32 %v598_v16, %v497_v60  ;;  %2529 = vmatprep.subr.mxu0 %v7435_v4 }
  0xf5   : > { %v705_v19 = vpop.f32.mrf.mxu0  ;;  %v835_v20 = vpop.f32.mrf.mxu1 }
  0xf6   : > { %v728_v21 = vadd.f32 %v705_v19, %v591_v9 }
  0xf7   : > { %v707_v22 = vpop.f32.mrf.mxu0  ;;  %v839_v23 = vpop.f32.mrf.mxu1 }
  0xf8   : > { %v729_v24 = vadd.f32 %v707_v22, %v593_v12  ;;  %v850_v25 = vadd.f32 %v827_v11, %v728_v21  ;;  %v5985_v12 = vadd.s32 48, %v5888_v35 }
  0xf9   : > { %v711_v27 = vpop.f32.mrf.mxu0  ;;  %v841_v28 = vpop.f32.mrf.mxu1 }
  0xfa   : > { %v730_v29 = vadd.f32 %v711_v27, %v597_v15  ;;  %v851_v30 = vadd.f32 %v829_v14, %v729_v24  ;;  %7515 = vst [vmem:[#allocation21_spill] sm:$0xff] %v5985_v12  ;;  %vm7476_vm10 = vcmp.eq.s32.totalorder %v5985_v12, %v5893_v38 }
  0xfb   : > { %v713_v31 = vpop.f32.mrf.mxu0 }
  0xfc   : > { %v731_v33 = vadd.f32 %v713_v31, %v599_v18  ;;  %v852_v34 = vadd.f32 %v833_v17, %v730_v29  ;;  %v6005_v18 = vadd.s32 40, %v5888_v35 }
  0xfd   : > { %v717_v36 = vpop.f32.mrf.mxu0  ;;  %v5890_v37 = vpop.f32.mrf.mxu1 }
  0xfe   : > { %v732_v39 = vadd.f32 %v717_v36, %v603_v63  ;;  %v853_v40 = vadd.f32 %v835_v20, %v731_v33  ;;  %v5951_v63 = vadd.s32 72, %v5888_v35  ;;  %7516 = vst [vmem:[#allocation22_spill] sm:$0xff] %v6005_v18  ;;  %v6013_v20 = vadd.s32 32, %v5888_v35 }
  0xff   : > { %v719_v42 = vpop.f32.mrf.mxu0  ;;  %v5898_v43 = vpop.f32.mrf.mxu1  ;;  %vm7475_vm11 = vcmp.eq.s32.totalorder %v6005_v18, %v5893_v38 }
 0x100   : > { %v733_v46 = vadd.f32 %v719_v42, %v605_v1  ;;  %v854_v47 = vadd.f32 %v839_v23, %v732_v39  ;;  %7512 = vst [vmem:[#allocation18_spill] sm:$0xff] %v5951_v63  ;;  %vm7479_vm7 = vcmp.eq.s32.totalorder %v5951_v63, %v5893_v38  ;;  %7517 = vst [vmem:[#allocation23_spill] sm:$0xff] %v6013_v20 }
 0x101   : > { %v723_v49 = vpop.f32.mrf.mxu0  ;;  %4573 = vmatpush1.msk.msra.mxu0 %vm7479_vm7, %v7433_v50  ;;  %vm7474_vm12 = vcmp.eq.s32.totalorder %v6013_v20, %v5893_v38 }
 0x102   : > { %v5917_v51 = vadd.f32 %v723_v49, %v609_v5  ;;  %v855_v52 = vadd.f32 %v841_v28, %v733_v46  ;;  %2531 = vmatprep.subr.mxu0 %v7435_v4 }
 0x103   : > { %v725_v53 = vpop.f32.mrf.mxu0  ;;  %v1071_v54 = vpop.f32.mrf.mxu1  ;;  %4574 = vmatpush1.msk.msra.mxu0 %vm7478_vm8, %v7433_v50 }
 0x104   : > { %v5929_v56 = vadd.f32 %v725_v53, %v611_v7  ;;  %2533 = vmatprep.subr.mxu0 %v7435_v4 }
 0x105   : > { %v949_v58 = vpop.f32.mrf.mxu0  ;;  %v1073_v59 = vpop.f32.mrf.mxu1  ;;  %4575 = vmatpush1.msk.msra.mxu0 %vm7477_vm9, %v7433_v50 }
 0x106   : > { %v972_v60 = vadd.f32 %v949_v58, %v850_v25  ;;  %2535 = vmatprep.subr.mxu0 %v7435_v4  ;;  %v6035_v25 = vadd.s32 24, %v5888_v35  ;;  %v856_v35 = vadd.f32 %v5890_v37, %v5917_v51 }
 0x107   : > { %v951_v61 = vpop.f32.mrf.mxu0  ;;  %v5944_v62 = vpop.f32.mrf.mxu1  ;;  %4576 = vmatpush1.msk.msra.mxu0 %vm7476_vm10, %v7433_v50 }
 0x108   : > { %v973_v0 = vadd.f32 %v951_v61, %v851_v30  ;;  %v1094_v1 = vadd.f32 %v1071_v54, %v972_v60  ;;  %7518 = vst [vmem:[#allocation24_spill] sm:$0xff] %v6035_v25  ;;  %2537 = vmatprep.subr.mxu0 %v7435_v4  ;;  %vm7473_vm13 = vcmp.eq.s32.totalorder %v6035_v25, %v5893_v38 }
 0x109   : > { %v955_v3 = vpop.f32.mrf.mxu0  ;;  %v5959_v5 = vpop.f32.mrf.mxu1  ;;  %4577 = vmatpush1.msk.msra.mxu0 %vm7475_vm11, %v7433_v50 }
 0x10a   : > { %v5965_v6 = vadd.f32 %v955_v3, %v852_v34  ;;  %v1095_v7 = vadd.f32 %v1073_v59, %v973_v0  ;;  %2539 = vmatprep.subr.mxu0 %v7435_v4 }
 0x10b   : > { %v957_v8 = vpop.f32.mrf.mxu0  ;;  %v5970_v9 = vpop.f32.mrf.mxu1  ;;  %4578 = vmatpush1.msk.msra.mxu0 %vm7474_vm12, %v7433_v50 }
 0x10c   : > { %v5979_v11 = vadd.f32 %v957_v8, %v853_v40  ;;  %2541 = vmatprep.subr.mxu0 %v7435_v4 }
 0x10d   : > { %v961_v13 = vpop.f32.mrf.mxu0  ;;  %v5987_v14 = vpop.f32.mrf.mxu1  ;;  %4579 = vmatpush1.msk.msra.mxu0 %vm7473_vm13, %v7433_v50 }
 0x10e   : > { %v5993_v15 = vadd.f32 %v961_v13, %v854_v47  ;;  %2543 = vmatprep.subr.mxu0 %v7435_v4 }
 0x10f   : > { %v963_v16 = vpop.f32.mrf.mxu0  ;;  %v5998_v17 = vpop.f32.mrf.mxu1  ;;  %4580 = vmatpush1.msk.msra.mxu0 %vm7472_vm14, %v7433_v50  ;;  %vm2241_vm14 = vcmask 228352  }
 0x110   : > { %v6007_v19 = vadd.f32 %v963_v16, %v855_v52  ;;  %2545 = vmatprep.subr.mxu0 %v7435_v4  ;;  %v1098_v51 = vadd.f32 %v5970_v9, %v5993_v15 }
 0x111   : > { %v6015_v21 = vpop.f32.mrf.mxu0  ;;  %v6017_v22 = vpop.f32.mrf.mxu1 }
 0x113   : > { %v6026_v23 = vpop.f32.mrf.mxu0  ;;  %v6028_v24 = vpop.f32.mrf.mxu1 }
 0x115   : > { %v1193_v27 = vpop.f32.mrf.mxu0  ;;  %v6043_v28 = vpop.f32.mrf.mxu1 }
 0x116   : > { %v6049_v29 = vadd.f32 %v1193_v27, %v1094_v1 }
 0x117   : > { %v1195_v30 = vpop.f32.mrf.mxu0  ;;  %v6054_v31 = vpop.f32.mrf.mxu1 }
 0x118   : > { %v6060_v33 = vadd.f32 %v1195_v30, %v1095_v7 }
 0x119   : > { %v6065_v34 = vpop.f32.mrf.mxu0  ;;  %v6067_v36 = vpop.f32.mrf.mxu1 }
 0x11b   : > { %v6074_v39 = vpop.f32.mrf.mxu0  ;;  %v6076_v40 = vpop.f32.mrf.mxu1 }
 0x11d   : > { %v1205_v42 = vpop.f32.mrf.mxu0  ;;  %v1329_v46 = vpop.f32.mrf.mxu1 }
 0x11f   : > { %v1207_v47 = vpop.f32.mrf.mxu0  ;;  %v1333_v49 = vpop.f32.mrf.mxu1 }
 0x121   : > { %v1211_v52 = vpop.f32.mrf.mxu0  ;;  %v6083_v53 = vpop.f32.mrf.mxu1 }
 0x123   : > { %v1213_v54 = vpop.f32.mrf.mxu0  ;;  %v6085_v58 = vpop.f32.mrf.mxu1 }
 0x125   : > { %v6087_v59 = vpop.f32.mrf.mxu0  ;;  %v6089_v60 = vpop.f32.mrf.mxu1 }
 0x127   : > { %v6091_v61 = vpop.f32.mrf.mxu0  ;;  %v6093_v0 = vpop.f32.mrf.mxu1 }
 0x129   : > { %v6095_v1 = vpop.f32.mrf.mxu0  ;;  %v6097_v3 = vpop.f32.mrf.mxu1 }
 0x12b   : > { %v1445_v7 = vpop.f32.mrf.mxu0  ;;  %v6099_v8 = vpop.f32.mrf.mxu1 }
 0x12d   : > { %v1449_v13 = vpop.f32.mrf.mxu0  ;;  %v6101_v16 = vpop.f32.mrf.mxu1 }
 0x12f   : > { %v1451_v27 = vpop.f32.mrf.mxu0  ;;  %v6103_v30 = vpop.f32.mrf.mxu1 }
 0x131   : > { %v1455_v50 = vpop.f32.mrf.mxu0  ;;  %v6105_v4 = vpop.f32.mrf.mxu1 }
 0x133   : > { %v1457_v26 = vpop.f32.mrf.mxu0  ;;  %v6107_v25 = vpop.f32.mrf.mxu1 }
 0x134   : > { %7520 = vst [vmem:[#allocation26_spill] sm:$0xff] %v6107_v25 }
 0x135   : > { %v6109_v20 = vpop.f32.mrf.mxu0  ;;  %v6111_v18 = vpop.f32.mrf.mxu1 }
 0x136   : > { %7521 = vst [vmem:[#allocation27_spill] sm:$0xff] %v6109_v20  ;;  %7522 = vst [vmem:[#allocation28_spill] sm:$0xff] %v6111_v18 }
 0x137   : > { %v6113_v12 = vpop.f32.mrf.mxu0  ;;  %v6115_v10 = vpop.f32.mrf.mxu1 }
 0x138   : > { %7523 = vst [vmem:[#allocation29_spill] sm:$0xff] %v6115_v10  ;;  %v857_v10 = vadd.f32 %v5898_v43, %v5929_v56 }
 0x139   : > { %v6117_v2 = vpop.f32.mrf.mxu0  ;;  %v6119_v63 = vpop.f32.mrf.mxu1 }
 0x13a   : > { %7524 = vst [vmem:[#allocation30_spill] sm:$0xff] %v6119_v63  ;;  %v978_v63 = vadd.f32 %v6015_v21, %v856_v35  ;;  %v979_v20 = vadd.f32 %v6026_v23, %v857_v10  ;;  %v1097_v35 = vadd.f32 %v5959_v5, %v5979_v11  ;;  %v1096_v21 = vadd.f32 %v5944_v62, %v5965_v6 }
 0x13b   : > { %v6121_v57 = vpop.f32.mrf.mxu0  ;;  %v6123_v55 = vpop.f32.mrf.mxu1  ;;  %v1220_v23 = vadd.f32 %v1205_v42, %v1098_v51 }
 0x13c   : > { %7525 = vst [vmem:[#allocation31_spill] sm:$0xff] %v6123_v55  ;;  %v1100_v37 = vadd.f32 %v5998_v17, %v978_v63  ;;  %v1101_v43 = vadd.f32 %v6017_v22, %v979_v20  ;;  %v1219_v63 = vadd.f32 %v6074_v39, %v1097_v35  ;;  %v1218_v9 = vadd.f32 %v6065_v34, %v1096_v21 }
 0x13d   : > { %v1693_v48 = vpop.f32.mrf.mxu0  ;;  %v6125_v45 = vpop.f32.mrf.mxu1  ;;  %v1342_v5 = vadd.f32 %v6076_v40, %v1220_v23  ;;  %v1339_v34 = vadd.f32 %v6043_v28, %v6060_v33  ;;  %v1338_v40 = vadd.f32 %v6028_v24, %v6049_v29 }
 0x13e   : > { %7526 = vst [vmem:[#allocation32_spill] sm:$0xff] %v6125_v45  ;;  %v1222_v10 = vadd.f32 %v1211_v52, %v1100_v37  ;;  %v1223_v17 = vadd.f32 %v1213_v54, %v1101_v43  ;;  %v1341_v20 = vadd.f32 %v6067_v36, %v1219_v63  ;;  %v1340_v42 = vadd.f32 %v6054_v31, %v1218_v9 }
 0x13f   : > { %v1695_v44 = vpop.f32.mrf.mxu0  ;;  %v6127_v41 = vpop.f32.mrf.mxu1  ;;  %v1464_v39 = vadd.f32 %v1449_v13, %v1342_v5  ;;  %v1460_v31 = vadd.f32 %v6087_v59, %v1338_v40 }
 0x140   : > { %7527 = vst [vmem:[#allocation33_spill] sm:$0xff] %v6127_v41  ;;  %v1345_v62 = vadd.f32 %v6083_v53, %v1223_v17  ;;  %v1462_v52 = vadd.f32 %v6095_v1, %v1340_v42  ;;  %v1461_v53 = vadd.f32 %v6091_v61, %v1339_v34  ;;  %v7541_v34 = vld [vmem:[#allocation10_spill] sm:$0xff] }
 0x141   : > { %v1699_v38 = vpop.f32.mrf.mxu0  ;;  %v6129_v32 = vpop.f32.mrf.mxu1  ;;  %v1586_v13 = vadd.f32 %v6099_v8, %v1464_v39  ;;  %v1582_v8 = vadd.f32 %v6085_v58, %v1460_v31  ;;  %v7536_v21 = vld [vmem:[#allocation30_spill] sm:$0xff] }
 0x142   : > { %7528 = vst [vmem:[#allocation34_spill] sm:$0xff] %v6129_v32  ;;  %v1099_v32 = vadd.f32 %v5987_v14, %v6007_v19  ;;  %v1584_v1 = vadd.f32 %v6093_v0, %v1462_v52  ;;  %v7534_v0 = vld [vmem:[#allocation27_spill] sm:$0xff]  ;;  %v2208_v52 = vsub.s32 1, %v7541_v34 }
 0x143   : > { %v1701_v25 = vpop.f32.mrf.mxu0  ;;  %v6133_v18 = vpop.f32.mrf.mxu1  ;;  %v7535_v43 = vld [vmem:[#allocation31_spill] sm:$0xff] }
 0x144   : > { %7529 = vst [vmem:[#allocation35_spill] sm:$0xff] %v6133_v18  ;;  %v1221_v56 = vadd.f32 %v1207_v47, %v1099_v32  ;;  %v1706_v37 = vadd.f32 %v6117_v2, %v1584_v1  ;;  %v7538_v2 = vld [vmem:[#allocation29_spill] sm:$0xff] }
 0x145   : > { %v6138_v55 = vpop.f32.mrf.mxu0  ;;  %v6143_v41 = vpop.f32.mrf.mxu1 }
 0x146   : > { %7530 = vst [vmem:[#allocation36_spill] sm:$0xff] %v6138_v55  ;;  %7531 = vst [vmem:[#allocation37_spill] sm:$0xff] %v6143_v41  ;;  %v1343_v19 = vadd.f32 %v1329_v46, %v1221_v56  ;;  %v1344_v55 = vadd.f32 %v1333_v49, %v1222_v10  ;;  %v1463_v46 = vadd.f32 %v1445_v7, %v1341_v20 }
 0x147   : > { %v6141_v45 = vpop.f32.mrf.mxu0  ;;  %v6157_v14 = vpop.f32.mrf.mxu1  ;;  %v1467_v49 = vadd.f32 %v1457_v26, %v1345_v62  ;;  %v1708_v7 = vadd.f32 %v1693_v48, %v1586_v13  ;;  %v1704_v48 = vadd.f32 %v7534_v0, %v1582_v8  ;;  %v1828_v17 = vadd.f32 %v7538_v2, %v1706_v37 }
 0x148   : > { %v1465_v6 = vadd.f32 %v1451_v27, %v1343_v19  ;;  %v1466_v22 = vadd.f32 %v1455_v50, %v1344_v55  ;;  %v1585_v26 = vadd.f32 %v6097_v3, %v1463_v46  ;;  %v7539_v19 = vld [vmem:[#allocation28_spill] sm:$0xff]  ;;  %v2204_v46 = vsub.s32 0, %v7541_v34 }
 0x149   : > { %v6150_v18 = vpop.f32.mrf.mxu0  ;;  %v6162_v11 = vpop.f32.mrf.mxu1  ;;  %v1589_v24 = vadd.f32 %v6105_v4, %v1467_v49  ;;  %v7532_v4 = vld [vmem:[#allocation32_spill] sm:$0xff]  ;;  %v1830_v56 = vadd.f32 %v7535_v43, %v1708_v7  ;;  %v6215_v0 = vadd.s32 8, %v7541_v34 }
 0x14a   : > { %v1587_v50 = vadd.f32 %v6101_v16, %v1465_v6  ;;  %v1588_v55 = vadd.f32 %v6103_v30, %v1466_v22  ;;  %v1583_v16 = vadd.f32 %v6089_v60, %v1461_v53  ;;  %v1707_v30 = vadd.f32 %v6121_v57, %v1585_v26  ;;  %v7540_v6 = vld [vmem:[#allocation26_spill] sm:$0xff] }
 0x14b   : > { %v1933_v41 = vpop.f32.mrf.mxu0  ;;  %v2059_v54 = vpop.f32.mrf.mxu1  ;;  %v1711_v59 = vadd.f32 %v1701_v25, %v1589_v24  ;;  %v7537_v25 = vld [vmem:[#allocation34_spill] sm:$0xff]  ;;  %v1826_v22 = vadd.f32 %v7540_v6, %v1704_v48  ;;  %v1950_v42 = vadd.f32 %v6150_v18, %v1828_v17 }
 0x14c   : > { %v1709_v29 = vadd.f32 %v1695_v44, %v1587_v50  ;;  %v1710_v33 = vadd.f32 %v1699_v38, %v1588_v55  ;;  %v1705_v3 = vadd.f32 %v6113_v12, %v1583_v16  ;;  %v7533_v38 = vld [vmem:[#allocation33_spill] sm:$0xff]  ;;  %v1829_v57 = vadd.f32 %v7536_v21, %v1707_v30  ;;  %v7544_v16 = vld [vmem:[#allocation35_spill] sm:$0xff] }
 0x14d   : > { %v1937_v15 = vpop.f32.mrf.mxu0  ;;  %v2061_v61 = vpop.f32.mrf.mxu1  ;;  %v1833_v23 = vadd.f32 %v7537_v25, %v1711_v59  ;;  %v2072_v26 = vadd.f32 %v6157_v14, %v1950_v42  ;;  %v2234_v21 = vmul.u32 2, %v6215_v0  ;;  %v7551_v42 = vld [vmem:[#allocation14_spill] sm:$0xff] }
 0x14e   : > { %v1831_v44 = vadd.f32 %v7532_v4, %v1709_v29  ;;  %v1832_v35 = vadd.f32 %v7533_v38, %v1710_v33  ;;  %v1952_v9 = vadd.f32 %v1937_v15, %v1830_v56  ;;  %v1827_v5 = vadd.f32 %v7539_v19, %v1705_v3  ;;  %v2200_v15 = vld [vmem:[%s7422_s2] sm:$0x3] }
 0x14f   : > { %v1939_v32 = vpop.f32.mrf.mxu0  ;;  %v2065_v10 = vpop.f32.mrf.mxu1  ;;  %v1951_v20 = vadd.f32 %v1933_v41, %v1829_v57  ;;  %v7542_v41 = vld [vmem:[#allocation36_spill] sm:$0xff]  ;;  %v7543_v33 = vld [vmem:[#allocation37_spill] sm:$0xff]  ;;  %v2209_v7 = vrot.slane %v2200_v15, %v2208_v52 }
 0x150   : > { %v1953_v58 = vadd.f32 %v1939_v32, %v1831_v44  ;;  %v1949_v40 = vadd.f32 %v6141_v45, %v1827_v5  ;;  %v2074_v53 = vadd.f32 %v2059_v54, %v1952_v9  ;;  %v2205_v45 = vrot.slane %v2200_v15, %v2204_v46  ;;  %v7557_v15 = vld [vmem:[#allocation20_spill] sm:$0xff] }
 0x151   : > { %v1943_v47 = vpop.f32.mrf.mxu0  ;;  %v2067_v39 = vpop.f32.mrf.mxu1  ;;  %v2073_v18 = vadd.f32 %v6162_v11, %v1951_v20  ;;  %v2333_v9 = vadd.s32 1, %v2234_v21  ;;  %v7548_v20 = vld [vmem:[#allocation12_spill] sm:$0xff] }
 0x152   : > { %v1954_v63 = vadd.f32 %v1943_v47, %v1832_v35  ;;  %v2075_v32 = vadd.f32 %v2061_v61, %v1953_v58  ;;  %v2071_v1 = vadd.f32 %v7543_v33, %v1949_v40  ;;  %v2233_v35 = vmul.u32 2, %v7541_v34  ;;  %v7554_v40 = vld [vmem:[#allocation17_spill] sm:$0xff] }
 0x153   : > { %v1945_v36 = vpop.f32.mrf.mxu0  ;;  %v7546_v58 = vmov 0.0  }
 0x154   : > { %v1955_v62 = vadd.f32 %v1945_v36, %v1833_v23  ;;  %v2076_v47 = vadd.f32 %v2065_v10, %v1954_v63  ;;  %v1948_v36 = vadd.f32 %v7542_v41, %v1826_v22  ;;  %v2332_v2 = vadd.s32 1, %v2233_v35  ;;  %v7558_v41 = vld [vmem:[#allocation21_spill] sm:$0xff] }
 0x155   : > { %v6177_v28 = vpop.f32.mrf.mxu0  ;;  %v7550_v22 = vmov 1.0  }
 0x156   : > { %v2077_v55 = vadd.f32 %v2067_v39, %v1955_v62  ;;  %v2070_v30 = vadd.f32 %v7544_v16, %v1948_v36  ;;  %v7549_v62 = vld [vmem:[#allocation13_spill] sm:$0xff]  ;;  %v7552_v39 = vld [vmem:[#allocation15_spill] sm:$0xff]  ;;  %v7559_v36 = vld [vmem:[#allocation22_spill] sm:$0xff] }
 0x157   : > { %v2171_v27 = vpop.f32.mrf.mxu0 }
 0x158   : > { %v2193_v8 = vadd.f32 %v2171_v27, %v2071_v1  ;;  %v2192_v14 = vadd.f32 %v6177_v28, %v2070_v30 }
 0x159   : > { %v2175_v51 = vpop.f32.mrf.mxu0 }
 0x15a   : > { %v2194_v11 = vadd.f32 %v2175_v51, %v2072_v26  ;;  %v2213_v56 = vadd.f32 %v2209_v7, %v2193_v8  ;;  %v2212_v27 = vadd.f32 %v2205_v45, %v2192_v14  ;;  %v6405_v26 = vadd.s32 136, %v7541_v34  ;;  %v2759_v8 = vld [vmem:[%s7423_s3 + $0xa0] sm:$0xf]  ;;  %v4653_v14 = vld [vmem:[%s7423_s3 + $0x148] sm:$0xff] }
 0x15b   : > { %v2177_v60 = vpop.f32.mrf.mxu0 }
 0x15c   : > { %v2195_v61 = vadd.f32 %v2177_v60, %v2073_v18  ;;  %v2214_v48 = vadd.f32 %v2205_v45, %v2194_v11  ;;  %v7545_v60 = vld [vmem:[#allocation9_spill] sm:$0xff]  ;;  %v2221_v25 = vmax.f32 %v2213_v56, 0.0  ;;  %v2220_v23 = vmax.f32 %v2212_v27, 0.0  ;;  %v4650_v27 = vld [vmem:[%s7423_s3 + $0x130] sm:$0xff] }
 0x15d   : > { %v2181_v12 = vpop.f32.mrf.mxu0  ;;  %vm2235_vm0 = vcmp.eq.s32.totalorder %v7545_v60, %v2233_v35  ;;  %vm2236_vm13 = vcmp.eq.s32.totalorder %v7545_v60, %v2234_v21  ;;  %v7562_v18 = vld [vmem:[#allocation25_spill] sm:$0xff]  ;;  %v2757_v35 = vld [vmem:[%s7423_s3 + $0x90] sm:$0xff] }
 0x15e   : > { %v2196_v24 = vadd.f32 %v2181_v12, %v2074_v53  ;;  %v2215_v44 = vadd.f32 %v2209_v7, %v2195_v61  ;;  %v2222_v57 = vmax.f32 %v2214_v48, 0.0  ;;  %v6222_v63 = vsel %vm2235_vm0, 1.0, %v7546_v58  ;;  %v7547_v12 = vld [vmem:[#allocation11_spill] sm:$0xff]  ;;  %v4652_v48 = vld [vmem:[%s7423_s3 + $0x140] sm:$0xff]  ;;  %v4651_v56 = vld [vmem:[%s7423_s3 + $0x138] sm:$0xff] }
 0x15f   : > { %v2183_v49 = vpop.f32.mrf.mxu0  ;;  %v4535_v17 = vsel %vm2236_vm13, 1.0, %v7546_v58  ;;  %vm2334_vm0 = vcmp.eq.s32.totalorder %v7545_v60, %v2332_v2  ;;  %v6233_v19 = vadd.s32 1, %v7547_v12  ;;  %vm2335_vm13 = vcmp.eq.s32.totalorder %v7545_v60, %v2333_v9  ;;  %v7560_v53 = vld [vmem:[#allocation23_spill] sm:$0xff]  ;;  %v4648_v21 = vld [vmem:[%s7423_s3 + $0x120] sm:$0xff] }
 0x160   : > { %v2197_v31 = vadd.f32 %v2183_v49, %v2075_v32  ;;  %v2216_v4 = vadd.f32 %v2205_v45, %v2196_v24  ;;  %v2223_v28 = vmax.f32 %v2215_v44, 0.0  ;;  %v6238_v5 = vsel %vm2334_vm0, 1.0, %v7546_v58  ;;  %v7553_v49 = vld [vmem:[#allocation16_spill] sm:$0xff]  ;;  %v7555_v32 = vld [vmem:[#allocation18_spill] sm:$0xff] }
 0x161   : > { %v2187_v50 = vpop.f32.mrf.mxu0  ;;  %vm2608_vm12 = vcmp.eq.s32.totalorder %v7548_v20, %v6233_v19  ;;  %vm2607_vm11 = vcmp.eq.s32.totalorder %v7549_v62, %v6233_v19  ;;  %v4541_v6 = vsel %vm2335_vm13, 1.0, %v7546_v58  ;;  %vm2606_vm0 = vcmp.eq.s32.totalorder %v7551_v42, %v6233_v19  ;;  %v2760_v24 = vld [vmem:[%s7423_s3 + $0xa8] sm:$0xf]  ;;  %v2753_v60 = vld [vmem:[%s7423_s3 + $0x70] sm:$0xff] }
 0x162   : > { %v2198_v13 = vadd.f32 %v2187_v50, %v2076_v47  ;;  %v2217_v37 = vadd.f32 %v2209_v7, %v2197_v31  ;;  %v2224_v51 = vmax.f32 %v2216_v4, 0.0  ;;  %vm2605_vm13 = vcmp.eq.s32.totalorder %v7552_v39, %v6233_v19  ;;  %v7556_v47 = vld [vmem:[#allocation19_spill] sm:$0xff]  ;;  %v7561_v50 = vld [vmem:[#allocation24_spill] sm:$0xff] }
 0x163   : > { %v2189_v29 = vpop.f32.mrf.mxu0  ;;  %vm2604_vm10 = vcmp.eq.s32.totalorder %v7553_v49, %v6233_v19  ;;  %vm2602_vm9 = vcmp.eq.s32.totalorder %v7555_v32, %v6233_v19  ;;  %vm2601_vm8 = vcmp.eq.s32.totalorder %v7556_v47, %v6233_v19  ;;  %vm2600_vm7 = vcmp.eq.s32.totalorder %v7557_v15, %v6233_v19  ;;  %v2749_v2 = vld [vmem:[%s7423_s3 + $0x50] sm:$0xff]  ;;  %v2748_v9 = vld [vmem:[%s7423_s3 + $0x48] sm:$0xff] }
 0x164   : > { %v2199_v54 = vadd.f32 %v2189_v29, %v2077_v55  ;;  %v2218_v59 = vadd.f32 %v2205_v45, %v2198_v13  ;;  %v2225_v10 = vmax.f32 %v2217_v37, 0.0  ;;  %vm2599_vm6 = vcmp.eq.s32.totalorder %v7558_v41, %v6233_v19  ;;  %v4655_v29 = vld [vmem:[%s7423_s3 + $0x158] sm:$0xf]  ;;  %v4654_v37 = vld [vmem:[%s7423_s3 + $0x150] sm:$0xf] }
 0x165   : > { %vm2598_vm5 = vcmp.eq.s32.totalorder %v7559_v36, %v6233_v19  ;;  %vm7486_vm4 = vcmp.eq.s32.totalorder %v7560_v53, %v6233_v19  ;;  %vm7488_vm3 = vcmp.eq.s32.totalorder %v7561_v50, %v6233_v19  ;;  %vm7487_vm2 = vcmp.eq.s32.totalorder %v7562_v18, %v6233_v19 }
 0x166   : > { %v2219_v3 = vadd.f32 %v2209_v7, %v2199_v54  ;;  %v2226_v43 = vmax.f32 %v2218_v59, 0.0  ;;  %vm7489_vm1 = vcmp.eq.s32.totalorder %v6215_v0, %v7547_v12  ;;  %v2445_v55 = vadd.s32 160, %v7541_v34 }
 0x167   : > { %4581 = vmatpush1.msk.msra.mxu0 %vm7489_vm1, %v7550_v22  ;;  %v6377_v31 = vadd.s32 152, %v7541_v34  ;;  %v6388_v13 = vadd.s32 144, %v7541_v34  ;;  %v6422_v45 = vadd.s32 128, %v7541_v34 }
 0x168   : > { %v2227_v38 = vmax.f32 %v2219_v3, 0.0  ;;  %2547 = vmatprep.subr.mxu0 %v7546_v58  ;;  %vm2467_vm1 = vcmp.eq.s32.totalorder %v2445_v55, %v7547_v12  ;;  %v2758_v3 = vld [vmem:[%s7423_s3 + $0x98] sm:$0xff] }
 0x16a   : > { %4536 = vmatprep.subr.msk.mxu1 %vm2248_vm15, %v2227_v38 }
 0x16b   : > { %4537 = vmatpush1.msk.msra.mxu1 %vm2248_vm15, %v2226_v43 }
 0x16c   : > { %2281 = vmatprep.subr.mxu1 %v2225_v10 }
 0x16d   : > { %2282 = vmatpush1.msra.mxu1 %v2224_v51 }
 0x16e   : > { %2283 = vmatprep.subr.mxu1 %v2223_v28 }
 0x16f   : > { %2284 = vmatpush1.msra.mxu1 %v2222_v57 }
 0x170   : > { %2285 = vmatprep.subr.mxu1 %v2221_v25 }
 0x171   : > { %2286 = vmatpush1.msra.mxu1 %v2220_v23 }
 0x172   : > { %4538 = vmatmul.mubr.msk.f32.vlgmr.msra.gmra.mxu1 %vm2241_vm14, %v6222_v63  ;;  %4542 = vmatprep.subr.msk.mxu1 %vm2248_vm15, %v2227_v38 }
 0x173   : > { %4543 = vmatpush1.msk.msra.mxu1 %vm2248_vm15, %v2226_v43  ;;  %2325 = vmatprep.mubr.f32.mxu1 %v7546_v58  ;;  %v2756_v43 = vld [vmem:[%s7423_s3 + $0x88] sm:$0xff] }
 0x174   : > { %2372 = vmatprep.subr.mxu1 %v2225_v10  ;;  %v2755_v10 = vld [vmem:[%s7423_s3 + $0x80] sm:$0xff] }
 0x175   : > { %2373 = vmatpush1.msra.mxu1 %v2224_v51  ;;  %v2754_v51 = vld [vmem:[%s7423_s3 + $0x78] sm:$0xff] }
 0x176   : > { %4539 = vmatmul.mubr.msk.f32.gmra.mxu1 %vm2241_vm14, %v4535_v17  ;;  %2374 = vmatprep.subr.mxu1 %v2223_v28  ;;  %v4649_v28 = vld [vmem:[%s7423_s3 + $0x128] sm:$0xff]  ;;  %v4647_v17 = vld [vmem:[%s7423_s3 + $0x118] sm:$0xff] }
 0x177   : > { %2375 = vmatpush1.msra.mxu1 %v2222_v57  ;;  %2410 = vmatprep.mubr.f32.mxu1 %v7546_v58  ;;  %v2752_v57 = vld [vmem:[%s7423_s3 + $0x68] sm:$0xff] }
 0x178   : > { %2376 = vmatprep.subr.mxu1 %v2221_v25  ;;  %v2751_v25 = vld [vmem:[%s7423_s3 + $0x60] sm:$0xff] }
 0x179   : > { %2377 = vmatpush1.msra.mxu1 %v2220_v23  ;;  %v2750_v23 = vld [vmem:[%s7423_s3 + $0x58] sm:$0xff] }
 0x17a   : > { %4544 = vmatmul.mubr.msk.f32.vlgmr.msra.gmra.mxu1 %vm2241_vm14, %v6238_v5  ;;  %2656 = vmatprep.subr.mxu1 %v7546_v58 }
 0x17b   : > { %2416 = vmatprep.mubr.f32.mxu1 %v7546_v58  ;;  %4611 = vmatpush1.msk.msra.mxu1 %vm2608_vm12, %v7550_v22 }
 0x17c   : > { %2658 = vmatprep.subr.mxu1 %v7546_v58 }
 0x17d   : > { %4612 = vmatpush1.msk.msra.mxu1 %vm2607_vm11, %v7550_v22 }
 0x17e   : > { %4545 = vmatmul.mubr.msk.f32.gmra.mxu1 %vm2241_vm14, %v4541_v6  ;;  %2660 = vmatprep.subr.mxu1 %v7546_v58  ;;  %vm2603_vm14 = vcmp.eq.s32.totalorder %v7554_v40, %v6233_v19  ;;  %v4646_v6 = vld [vmem:[%s7423_s3 + $0x110] sm:$0xff] }
 0x17f   : > { %4613 = vmatpush1.msk.msra.mxu1 %vm2606_vm0, %v7550_v22 }
 0x180   : > { %2662 = vmatprep.subr.mxu1 %v7546_v58 }
 0x181   : > { %4614 = vmatpush1.msk.msra.mxu1 %vm2605_vm13, %v7550_v22 }
 0x182   : > { %2664 = vmatprep.subr.mxu1 %v7546_v58 }
 0x183   : > { %4615 = vmatpush1.msk.msra.mxu1 %vm2604_vm10, %v7550_v22 }
 0x184   : > { %2666 = vmatprep.subr.mxu1 %v7546_v58 }
 0x185   : > { %4616 = vmatpush1.msk.msra.mxu1 %vm2603_vm14, %v7550_v22 }
 0x186   : > { %2668 = vmatprep.subr.mxu1 %v7546_v58 }
 0x187   : > { %4617 = vmatpush1.msk.msra.mxu1 %vm2602_vm9, %v7550_v22 }
 0x188   : > { %2670 = vmatprep.subr.mxu1 %v7546_v58 }
 0x189   : > { %4618 = vmatpush1.msk.msra.mxu1 %vm2601_vm8, %v7550_v22 }
 0x18a   : > { %2672 = vmatprep.subr.mxu1 %v7546_v58 }
 0x18b   : > { %4619 = vmatpush1.msk.msra.mxu1 %vm2600_vm7, %v7550_v22 }
 0x18c   : > { %2674 = vmatprep.subr.mxu1 %v7546_v58 }
 0x18d   : > { %4620 = vmatpush1.msk.msra.mxu1 %vm2599_vm6, %v7550_v22 }
 0x18e   : > { %2676 = vmatprep.subr.mxu1 %v7546_v58 }
 0x18f   : > { %4621 = vmatpush1.msk.msra.mxu1 %vm2598_vm5, %v7550_v22 }
 0x190   : > { %2678 = vmatprep.subr.mxu1 %v7546_v58 }
 0x191   : > { %4622 = vmatpush1.msk.msra.mxu1 %vm7486_vm4, %v7550_v22  ;;  %vm7490_vm4 = vcmp.eq.s32.totalorder %v6215_v0, %v6233_v19 }
 0x192   : > { %2680 = vmatprep.subr.mxu1 %v7546_v58 }
 0x193   : > { %4623 = vmatpush1.msk.msra.mxu1 %vm7488_vm3, %v7550_v22  ;;  %vm7492_vm3 = vcmp.eq.s32.totalorder %v7541_v34, %v6233_v19 }
 0x194   : > { %2682 = vmatprep.subr.mxu1 %v7546_v58 }
 0x195   : > { %4624 = vmatpush1.msk.msra.mxu1 %vm7487_vm2, %v7550_v22  ;;  %vm7491_vm2 = vcmp.eq.s32.totalorder %v7541_v34, %v7547_v12 }
 0x196   : > { %2684 = vmatprep.subr.mxu1 %v7546_v58  ;;  %4582 = vmatpush1.msk.msra.mxu0 %vm7491_vm2, %v7550_v22  ;;  %vm7493_vm2 = vcmp.eq.s32.totalorder %v6377_v31, %v7547_v12 }
 0x197   : > { %4625 = vmatpush1.msk.msra.mxu1 %vm7490_vm4, %v7550_v22  ;;  %2571 = vmatprep.subr.mxu0 %v7546_v58  ;;  %vm2613_vm4 = vcmp.eq.s32.totalorder %v2445_v55, %v6233_v19  ;;  %v2747_v55 = vld [vmem:[%s7423_s3 + $0x40] sm:$0xff] }
 0x198   : > { %2686 = vmatprep.subr.mxu1 %v7546_v58  ;;  %4583 = vmatpush2.msk.msra.mxu0 %vm2467_vm1, %v7550_v22  ;;  %vm7495_vm1 = vcmp.eq.s32.totalorder %v6388_v13, %v7547_v12 }
 0x199   : > { %4626 = vmatpush1.msk.msra.mxu1 %vm7492_vm3, %v7550_v22  ;;  %2573 = vmatprep.subr.mxu0 %v7546_v58  ;;  %vm7494_vm3 = vcmp.eq.s32.totalorder %v6377_v31, %v6233_v19 }
 0x19a   : > { %2710 = vmatprep.subr.mxu1 %v7546_v58  ;;  %4584 = vmatpush2.msk.msra.mxu0 %vm7493_vm2, %v7550_v22  ;;  %vm7498_vm2 = vcmp.eq.s32.totalorder %v6405_v26, %v7547_v12 }
 0x19b   : > { %4627 = vmatpush2.msk.msra.mxu1 %vm2613_vm4, %v7550_v22  ;;  %2575 = vmatprep.subr.mxu0 %v7546_v58  ;;  %vm7496_vm4 = vcmp.eq.s32.totalorder %v6388_v13, %v6233_v19 }
 0x19c   : > { %2712 = vmatprep.subr.mxu1 %v7546_v58  ;;  %4585 = vmatpush2.msk.msra.mxu0 %vm7495_vm1, %v7550_v22  ;;  %vm7497_vm1 = vcmp.eq.s32.totalorder %v6422_v45, %v7547_v12 }
 0x19d   : > { %4628 = vmatpush2.msk.msra.mxu1 %vm7494_vm3, %v7550_v22  ;;  %2577 = vmatprep.subr.mxu0 %v7546_v58  ;;  %vm2610_vm3 = vcmp.eq.s32.totalorder %v6405_v26, %v6233_v19 }
 0x19e   : > { %2714 = vmatprep.subr.mxu1 %v7546_v58  ;;  %4586 = vmatpush2.msk.msra.mxu0 %vm7498_vm2, %v7550_v22  ;;  %vm2735_vm2 = vcmask 685056  }
 0x19f   : > { %4629 = vmatpush2.msk.msra.mxu1 %vm7496_vm4, %v7550_v22  ;;  %2579 = vmatprep.subr.mxu0 %v7546_v58  ;;  %vm2609_vm4 = vcmp.eq.s32.totalorder %v6422_v45, %v6233_v19 }
 0x1a0   : > { %2716 = vmatprep.subr.mxu1 %v7546_v58  ;;  %4587 = vmatpush2.msk.msra.mxu0 %vm7497_vm1, %v7550_v22  ;;  %vm2510_vm1 = vcmask 326656  }
 0x1a1   : > { %4630 = vmatpush2.msk.msra.mxu1 %vm2610_vm3, %v7550_v22  ;;  %4656 = vmatprep.subr.msk.mxu0 %vm2248_vm15, %v4655_v29  ;;  %v2746_v29 = vld [vmem:[%s7423_s3 + $0x38] sm:$0xff] }
 0x1a2   : > { %2718 = vmatprep.subr.mxu1 %v7546_v58 }
 0x1a3   : > { %4631 = vmatpush2.msk.msra.mxu1 %vm2609_vm4, %v7550_v22 }
 0x1a4   : > { %4660 = vmatprep.subr.msk.mxu1 %vm2248_vm15, %v2760_v24  ;;  %v4645_v24 = vld [vmem:[%s7423_s3 + $0x108] sm:$0xff] }
 0x232   : > { %v2321_v33 = vpop.f32.mrf.mxu1 }
 0x234   : > { %v2323_v1 = vpop.f32.mrf.mxu1 }
 0x236   : > { %v2327_v7 = vpop.f32.mrf.mxu1 }
 0x238   : > { %v2329_v61 = vpop.f32.mrf.mxu1 }
 0x23a   : > { %v2412_v54 = vpop.f32.mrf.mxu1 }
 0x23b   : > { %v2423_v11 = vmax.f32 %v2321_v33, %v2412_v54  ;;  %v4644_v33 = vld [vmem:[%s7423_s3 + $0x100] sm:$0xff]  ;;  %v4642_v54 = vld [vmem:[%s7423_s3 + $0xf0] sm:$0xff] }
 0x23c   : > { %v2414_v16 = vpop.f32.mrf.mxu1 }
 0x23d   : > { %v2424_v30 = vmax.f32 %v2323_v1, %v2414_v16  ;;  %v2745_v1 = vld [vmem:[%s7423_s3 + $0x30] sm:$0xff]  ;;  %v2743_v16 = vld [vmem:[%s7423_s3 + $0x20] sm:$0xff] }
 0x23e   : > { %v2418_v59 = vpop.f32.mrf.mxu1 }
 0x23f   : > { %4588 = vmatprep.mubr.msk.f32.mxu0 %vm2510_vm1, %v2424_v30  ;;  %4632 = vmatprep.mubr.msk.f32.mxu1 %vm2510_vm1, %v2424_v30  ;;  %v2425_v38 = vmax.f32 %v2327_v7, %v2418_v59  ;;  %v4643_v7 = vld [vmem:[%s7423_s3 + $0xf8] sm:$0xff]  ;;  %v4641_v30 = vld [vmem:[%s7423_s3 + $0xe8] sm:$0xff]  ;;  %v4640_v59 = vld [vmem:[%s7423_s3 + $0xe0] sm:$0xff] }
 0x240   : > { %v2420_v4 = vpop.f32.mrf.mxu1  ;;  %2582 = vmatmul.mubr.f32.vlgmr.msra.gmra.mxu0 %v2423_v11  ;;  %2721 = vmatmul.mubr.f32.vlgmr.msra.gmra.mxu1 %v2423_v11  ;;  %v2742_v11 = vld [vmem:[%s7423_s3 + $0x18] sm:$0xff] }
 0x241   : > { %v2426_v44 = vmax.f32 %v2329_v61, %v2420_v4  ;;  %4661 = vmatpush1.msk.msra.mxu1 %vm2248_vm15, %v2759_v8  ;;  %4657 = vmatpush1.msk.msra.mxu0 %vm2248_vm15, %v4654_v37  ;;  %v2744_v61 = vld [vmem:[%s7423_s3 + $0x28] sm:$0xff]  ;;  %v2741_v8 = vld [vmem:[%s7423_s3 + $0x10] sm:$0xff]  ;;  %v4639_v37 = vld [vmem:[%s7423_s3 + $0xd8] sm:$0xff] }
 0x242   : > { %2899 = vmatprep.subr.mxu1 %v2758_v3  ;;  %2810 = vmatprep.subr.mxu0 %v4653_v14  ;;  %v2740_v3 = vld [vmem:[%s7423_s3 + $0x8] sm:$0xff]  ;;  %v4638_v14 = vld [vmem:[%s7423_s3 + $0xd0] sm:$0xff]  ;;  %v2739_v4 = vld [vmem:[%s7423_s3] sm:$0xff] }
 0x243   : > { %4589 = vmatprep.mubr.msk.f32.mxu0 %vm2510_vm1, %v2426_v44  ;;  %4633 = vmatprep.mubr.msk.f32.mxu1 %vm2510_vm1, %v2426_v44  ;;  %v4637_v44 = vld [vmem:[%s7423_s3 + $0xc8] sm:$0xff]  ;;  %vm2733_vm1 = vcmask 687104  }
 0x244   : > { %2587 = vmatmul.mubr.f32.gmra.mxu0 %v2425_v38  ;;  %2726 = vmatmul.mubr.f32.gmra.mxu1 %v2425_v38  ;;  %v4711_v38 = vld [vmem:[%s7423_s3 + $0x2b8] sm:$0xf] }
 0x245   : > { %2900 = vmatpush1.msra.mxu1 %v2757_v35  ;;  %2811 = vmatpush1.msra.mxu0 %v4652_v48  ;;  %v4636_v35 = vld [vmem:[%s7423_s3 + $0xc0] sm:$0xff]  ;;  %v4635_v48 = vld [vmem:[%s7423_s3 + $0xb8] sm:$0xff] }
 0x246   : > { %2901 = vmatprep.subr.mxu1 %v2756_v43  ;;  %2812 = vmatprep.subr.mxu0 %v4651_v56  ;;  %v4634_v43 = vld [vmem:[%s7423_s3 + $0xb0] sm:$0xff]  ;;  %v4685_v56 = vld [vmem:[%s7423_s3 + $0x208] sm:$0xf] }
 0x247   : > { %2902 = vmatpush1.msra.mxu1 %v2755_v10  ;;  %2813 = vmatpush1.msra.mxu0 %v4650_v27 }
 0x248   : > { %2903 = vmatprep.subr.mxu1 %v2754_v51  ;;  %2814 = vmatprep.subr.mxu0 %v4649_v28 }
 0x249   : > { %2904 = vmatpush1.msra.mxu1 %v2753_v60  ;;  %2815 = vmatpush1.msra.mxu0 %v4648_v21 }
 0x24a   : > { %2905 = vmatprep.subr.mxu1 %v2752_v57  ;;  %2951 = vmatprep.mubr.f32.mxu1 %v7546_v58 }
 0x24b   : > { %2906 = vmatpush1.msra.mxu1 %v2751_v25  ;;  %2862 = vmatprep.mubr.f32.mxu0 %v7546_v58 }
 0x24c   : > { %2907 = vmatprep.subr.mxu1 %v2750_v23  ;;  %2816 = vmatprep.subr.mxu0 %v4647_v17  ;;  %v4710_v17 = vld [vmem:[%s7423_s3 + $0x2b0] sm:$0xf] }
 0x24d   : > { %2908 = vmatpush1.msra.mxu1 %v2749_v2  ;;  %2817 = vmatpush1.msra.mxu0 %v4646_v6  ;;  %v4709_v6 = vld [vmem:[%s7423_s3 + $0x2a8] sm:$0xff] }
 0x24e   : > { %2909 = vmatprep.subr.mxu1 %v2748_v9  ;;  %2818 = vmatprep.subr.mxu0 %v4645_v24  ;;  %v4707_v24 = vld [vmem:[%s7423_s3 + $0x298] sm:$0xff] }
 0x24f   : > { %2910 = vmatpush1.msra.mxu1 %v2747_v55  ;;  %2819 = vmatpush1.msra.mxu0 %v4644_v33  ;;  %v4708_v55 = vld [vmem:[%s7423_s3 + $0x2a0] sm:$0xff]  ;;  %v4706_v33 = vld [vmem:[%s7423_s3 + $0x290] sm:$0xff] }
 0x250   : > { %2911 = vmatprep.subr.mxu1 %v2746_v29  ;;  %2820 = vmatprep.subr.mxu0 %v4643_v7  ;;  %v4684_v29 = vld [vmem:[%s7423_s3 + $0x200] sm:$0xf] }
 0x251   : > { %2912 = vmatpush1.msra.mxu1 %v2745_v1  ;;  %2821 = vmatpush1.msra.mxu0 %v4642_v54  ;;  %v4705_v54 = vld [vmem:[%s7423_s3 + $0x288] sm:$0xff] }
 0x252   : > { %2913 = vmatprep.subr.mxu1 %v2744_v61  ;;  %2822 = vmatprep.subr.mxu0 %v4641_v30  ;;  %v4683_v61 = vld [vmem:[%s7423_s3 + $0x1f8] sm:$0xff]  ;;  %v4704_v30 = vld [vmem:[%s7423_s3 + $0x280] sm:$0xff] }
 0x253   : > { %2914 = vmatpush1.msra.mxu1 %v2743_v16  ;;  %2823 = vmatpush1.msra.mxu0 %v4640_v59  ;;  %v4682_v16 = vld [vmem:[%s7423_s3 + $0x1f0] sm:$0xff]  ;;  %v4703_v59 = vld [vmem:[%s7423_s3 + $0x278] sm:$0xff] }
 0x254   : > { %2915 = vmatprep.subr.mxu1 %v2742_v11  ;;  %2824 = vmatprep.subr.mxu0 %v4639_v37  ;;  %v4681_v11 = vld [vmem:[%s7423_s3 + $0x1e8] sm:$0xff]  ;;  %v4680_v37 = vld [vmem:[%s7423_s3 + $0x1e0] sm:$0xff] }
 0x255   : > { %2916 = vmatpush1.msra.mxu1 %v2741_v8  ;;  %2825 = vmatpush1.msra.mxu0 %v4638_v14  ;;  %v4702_v8 = vld [vmem:[%s7423_s3 + $0x270] sm:$0xff] }
 0x256   : > { %2917 = vmatprep.subr.mxu1 %v2740_v3  ;;  %2826 = vmatprep.subr.mxu0 %v4637_v44  ;;  %v4701_v3 = vld [vmem:[%s7423_s3 + $0x268] sm:$0xff]  ;;  %v4700_v44 = vld [vmem:[%s7423_s3 + $0x260] sm:$0xff] }
 0x257   : > { %2918 = vmatpush1.msra.mxu1 %v2739_v4  ;;  %2827 = vmatpush1.msra.mxu0 %v4636_v35  ;;  %v4679_v4 = vld [vmem:[%s7423_s3 + $0x1d8] sm:$0xff] }
 0x258   : > { %4712 = vmatprep.subr.msk.mxu1 %vm2248_vm15, %v4711_v38  ;;  %2828 = vmatprep.subr.mxu0 %v4635_v48  ;;  %v4678_v38 = vld [vmem:[%s7423_s3 + $0x1d0] sm:$0xff]  ;;  %v4699_v35 = vld [vmem:[%s7423_s3 + $0x258] sm:$0xff]  ;;  %v4677_v48 = vld [vmem:[%s7423_s3 + $0x1c8] sm:$0xff] }
 0x259   : > { %2829 = vmatpush1.msra.mxu0 %v4634_v43  ;;  %v4698_v43 = vld [vmem:[%s7423_s3 + $0x250] sm:$0xff] }
 0x25a   : > { %4686 = vmatprep.subr.msk.mxu0 %vm2248_vm15, %v4685_v56  ;;  %v4676_v56 = vld [vmem:[%s7423_s3 + $0x1c0] sm:$0xff] }
 0x300   : > { %v2583_v10 = vpop.f32.mrf.mxu0  ;;  %v2722_v27 = vpop.f32.mrf.mxu1 }
 0x301   : > { %v2731_v51 = vmax.f32 %v2583_v10, %v2722_v27  ;;  %v4697_v10 = vld [vmem:[%s7423_s3 + $0x248] sm:$0xff]  ;;  %v4675_v27 = vld [vmem:[%s7423_s3 + $0x1b8] sm:$0xff] }
 0x302   : > { %v2585_v28 = vpop.f32.mrf.mxu0  ;;  %v2724_v60 = vpop.f32.mrf.mxu1 }
 0x303   : > { %2734 = vst.msk [vmem:[#allocation2] sm:$0xff] %vm2733_vm1, %v2731_v51  ;;  %v4696_v51 = vld [vmem:[%s7423_s3 + $0x240] sm:$0xff]  ;;  %v4674_v28 = vld [vmem:[%s7423_s3 + $0x1b0] sm:$0xff]  ;;  %v4695_v60 = vld [vmem:[%s7423_s3 + $0x238] sm:$0xff] }
 0x304   : > { %v2588_v21 = vpop.f32.mrf.mxu0  ;;  %v2727_v57 = vpop.f32.mrf.mxu1 }
 0x305   : > { %v2732_v25 = vmax.f32 %v2588_v21, %v2727_v57  ;;  %v4673_v21 = vld [vmem:[%s7423_s3 + $0x1a8] sm:$0xff]  ;;  %v4694_v57 = vld [vmem:[%s7423_s3 + $0x230] sm:$0xff] }
 0x306   : > { %v2590_v23 = vpop.f32.mrf.mxu0  ;;  %v2729_v2 = vpop.f32.mrf.mxu1 }
 0x307   : > { %2736 = vst.msk [vmem:[#allocation2 + $0x8] sm:$0x3f] %vm2735_vm2, %v2732_v25  ;;  %v4672_v25 = vld [vmem:[%s7423_s3 + $0x1a0] sm:$0xff]  ;;  %v4693_v23 = vld [vmem:[%s7423_s3 + $0x228] sm:$0xff]  ;;  %v4671_v2 = vld [vmem:[%s7423_s3 + $0x198] sm:$0xff]  ;;  %vm7563_vm2 = vcmp.eq.s32.totalorder %v7560_v53, %v6233_v19 }
 0x30a   : > { %v2737_v9 = vld [vmem:[#allocation2] sm:$0xff] }
 0x30b   : > { %4662 = vmatmul.mubr.msk.f32.vlgmr.msra.gmra.mxu1 %vm2733_vm1, %v2737_v9  ;;  %v4670_v9 = vld [vmem:[%s7423_s3 + $0x190] sm:$0xff] }
 0x30c   : > { %4713 = vmatpush1.msk.msra.mxu1 %vm2248_vm15, %v4710_v17  ;;  %2957 = vmatprep.mubr.f32.mxu1 %v7546_v58  ;;  %v4692_v17 = vld [vmem:[%s7423_s3 + $0x220] sm:$0xff] }
 0x30d   : > { %3131 = vmatprep.subr.mxu1 %v4709_v6  ;;  %v4691_v6 = vld [vmem:[%s7423_s3 + $0x218] sm:$0xff] }
 0x30e   : > { %3132 = vmatpush1.msra.mxu1 %v4708_v55  ;;  %v2761_v1 = vld [vmem:[#allocation2 + $0x1] sm:$0xff]  ;;  %v2762_v14 = vld [vmem:[#allocation2 + $0x9] sm:$0x3] }
 0x30f   : > { %v2738_v7 = vld [vmem:[#allocation2 + $0x8] sm:$0x3]  ;;  %3133 = vmatprep.subr.mxu1 %v4707_v24  ;;  %4658 = vmatmul.mubr.msk.f32.vlgmr.msra.gmra.mxu0 %vm2733_vm1, %v2761_v1  ;;  %v4690_v24 = vld [vmem:[%s7423_s3 + $0x210] sm:$0xff] }
 0x310   : > { %4663 = vmatmul.mubr.msk.f32.gmra.mxu1 %vm2733_vm1, %v2738_v7  ;;  %4687 = vmatpush1.msk.msra.mxu0 %vm2248_vm15, %v4684_v29  ;;  %v4669_v55 = vld [vmem:[%s7423_s3 + $0x188] sm:$0xff]  ;;  %v4668_v29 = vld [vmem:[%s7423_s3 + $0x180] sm:$0xff]  ;;  %v4666_v1 = vld [vmem:[%s7423_s3 + $0x170] sm:$0xff] }
 0x311   : > { %3134 = vmatpush1.msra.mxu1 %v4706_v33  ;;  %3013 = vmatprep.subr.mxu0 %v4683_v61  ;;  %v4667_v33 = vld [vmem:[%s7423_s3 + $0x178] sm:$0xff]  ;;  %v3082_v7 = vld [vmem:[#allocation2 + $0x3] sm:$0xff] }
 0x312   : > { %3135 = vmatprep.subr.mxu1 %v4705_v54  ;;  %3014 = vmatpush1.msra.mxu0 %v4682_v16  ;;  %v4665_v61 = vld [vmem:[%s7423_s3 + $0x168] sm:$0xff]  ;;  %v4664_v54 = vld [vmem:[%s7423_s3 + $0x160] sm:$0xff] }
 0x313   : > { %3136 = vmatpush1.msra.mxu1 %v4704_v30  ;;  %2868 = vmatprep.mubr.f32.mxu0 %v7546_v58  ;;  %v4737_v16 = vld [vmem:[%s7423_s3 + $0x368] sm:$0xf] }
 0x314   : > { %3015 = vmatprep.subr.mxu0 %v4681_v11  ;;  %3137 = vmatprep.subr.mxu1 %v4703_v59  ;;  %v2964_v30 = vld [vmem:[#allocation2 + $0x2] sm:$0xff]  ;;  %v3083_v11 = vld [vmem:[#allocation2 + $0xb] sm:$0x3] }
 0x315   : > { %4659 = vmatmul.mubr.msk.f32.gmra.mxu0 %vm2733_vm1, %v2762_v14  ;;  %3138 = vmatpush1.msra.mxu1 %v4702_v8  ;;  %v4736_v59 = vld [vmem:[%s7423_s3 + $0x360] sm:$0xf]  ;;  %v4735_v8 = vld [vmem:[%s7423_s3 + $0x358] sm:$0xff] }
 0x316   : > { %3016 = vmatpush1.msra.mxu0 %v4680_v37  ;;  %3139 = vmatprep.subr.mxu1 %v4701_v3  ;;  %v4734_v37 = vld [vmem:[%s7423_s3 + $0x350] sm:$0xff]  ;;  %v4733_v3 = vld [vmem:[%s7423_s3 + $0x348] sm:$0xff]  ;;  %v4732_v14 = vld [vmem:[%s7423_s3 + $0x340] sm:$0xff] }
 0x317   : > { %3017 = vmatprep.subr.mxu0 %v4679_v4  ;;  %3140 = vmatpush1.msra.mxu1 %v4700_v44  ;;  %v2965_v4 = vld [vmem:[#allocation2 + $0xa] sm:$0x3]  ;;  %v4731_v44 = vld [vmem:[%s7423_s3 + $0x338] sm:$0xff] }
 0x318   : > { %3018 = vmatpush1.msra.mxu0 %v4678_v38  ;;  %3141 = vmatprep.subr.mxu1 %v4699_v35  ;;  %v4730_v38 = vld [vmem:[%s7423_s3 + $0x330] sm:$0xff]  ;;  %v4729_v35 = vld [vmem:[%s7423_s3 + $0x328] sm:$0xff] }
 0x319   : > { %3019 = vmatprep.subr.mxu0 %v4677_v48  ;;  %3142 = vmatpush1.msra.mxu1 %v4698_v43  ;;  %v4728_v48 = vld [vmem:[%s7423_s3 + $0x320] sm:$0xff]  ;;  %v4727_v43 = vld [vmem:[%s7423_s3 + $0x318] sm:$0xff] }
 0x31a   : > { %3020 = vmatpush1.msra.mxu0 %v4676_v56  ;;  %3143 = vmatprep.subr.mxu1 %v4697_v10  ;;  %v4726_v56 = vld [vmem:[%s7423_s3 + $0x310] sm:$0xff]  ;;  %v4725_v10 = vld [vmem:[%s7423_s3 + $0x308] sm:$0xff] }
 0x31b   : > { %3021 = vmatprep.subr.mxu0 %v4675_v27  ;;  %3144 = vmatpush1.msra.mxu1 %v4696_v51  ;;  %v4724_v27 = vld [vmem:[%s7423_s3 + $0x300] sm:$0xff]  ;;  %v4723_v51 = vld [vmem:[%s7423_s3 + $0x2f8] sm:$0xff] }
 0x31c   : > { %3022 = vmatpush1.msra.mxu0 %v4674_v28  ;;  %3145 = vmatprep.subr.mxu1 %v4695_v60  ;;  %v4722_v28 = vld [vmem:[%s7423_s3 + $0x2f0] sm:$0xff]  ;;  %v4721_v60 = vld [vmem:[%s7423_s3 + $0x2e8] sm:$0xff] }
 0x31d   : > { %3023 = vmatprep.subr.mxu0 %v4673_v21  ;;  %3146 = vmatpush1.msra.mxu1 %v4694_v57  ;;  %v4720_v21 = vld [vmem:[%s7423_s3 + $0x2e0] sm:$0xff]  ;;  %v4719_v57 = vld [vmem:[%s7423_s3 + $0x2d8] sm:$0xff] }
 0x31e   : > { %3024 = vmatpush1.msra.mxu0 %v4672_v25  ;;  %3147 = vmatprep.subr.mxu1 %v4693_v23  ;;  %v4718_v25 = vld [vmem:[%s7423_s3 + $0x2d0] sm:$0xff]  ;;  %v4717_v23 = vld [vmem:[%s7423_s3 + $0x2c8] sm:$0xff] }
 0x31f   : > { %3025 = vmatprep.subr.mxu0 %v4671_v2  ;;  %3148 = vmatpush1.msra.mxu1 %v4692_v17  ;;  %v4716_v2 = vld [vmem:[%s7423_s3 + $0x2c0] sm:$0xff] }
 0x320   : > { %3026 = vmatpush1.msra.mxu0 %v4670_v9  ;;  %3149 = vmatprep.subr.mxu1 %v4691_v6  ;;  %v3200_v17 = vld [vmem:[#allocation2 + $0x4] sm:$0xff]  ;;  %v3201_v9 = vld [vmem:[#allocation2 + $0xc] sm:$0x3] }
 0x321   : > { %3027 = vmatprep.subr.mxu0 %v4669_v55  ;;  %3150 = vmatpush1.msra.mxu1 %v4690_v24 }
 0x322   : > { %3028 = vmatpush1.msra.mxu0 %v4668_v29  ;;  %3183 = vmatprep.mubr.f32.mxu1 %v7546_v58 }
 0x323   : > { %3029 = vmatprep.subr.mxu0 %v4667_v33  ;;  %4714 = vmatmul.mubr.msk.f32.vlgmr.msra.gmra.mxu1 %vm2733_vm1, %v3082_v7 }
 0x324   : > { %3030 = vmatpush1.msra.mxu0 %v4666_v1  ;;  %3065 = vmatprep.mubr.f32.mxu0 %v7546_v58 }
 0x325   : > { %3031 = vmatprep.subr.mxu0 %v4665_v61  ;;  %3189 = vmatprep.mubr.f32.mxu1 %v7546_v58 }
 0x326   : > { %3032 = vmatpush1.msra.mxu0 %v4664_v54 }
 0x327   : > { %4688 = vmatmul.mubr.msk.f32.vlgmr.msra.gmra.mxu0 %vm2733_vm1, %v2964_v30  ;;  %4715 = vmatmul.mubr.msk.f32.gmra.mxu1 %vm2733_vm1, %v3083_v11 }
 0x328   : > { %4738 = vmatprep.subr.msk.mxu0 %vm2248_vm15, %v4737_v16  ;;  %3071 = vmatprep.mubr.f32.mxu0 %v7546_v58 }
 0x329   : > { %4739 = vmatpush1.msk.msra.mxu0 %vm2248_vm15, %v4736_v59  ;;  %3412 = vmatprep.mubr.f32.mxu1 %v7546_v58  ;;  %vm7571_vm15 = vcmp.eq.s32.totalorder %v7549_v62, %v7547_v12  ;;  %v4800_v62 = vld [vmem:[%s7425_s5 + $0x98] sm:$0xff] }
 0x32a   : > { %3249 = vmatprep.subr.mxu0 %v4735_v8 }
 0x32b   : > { %3250 = vmatpush1.msra.mxu0 %v4734_v37 }
 0x32c   : > { %4689 = vmatmul.mubr.msk.f32.gmra.mxu0 %vm2733_vm1, %v2965_v4  ;;  %3251 = vmatprep.subr.mxu0 %v4733_v3 }
 0x32d   : > { %3252 = vmatpush1.msra.mxu0 %v4732_v14  ;;  %3301 = vmatprep.mubr.f32.mxu0 %v7546_v58 }
 0x32e   : > { %3253 = vmatprep.subr.mxu0 %v4731_v44 }
 0x32f   : > { %3254 = vmatpush1.msra.mxu0 %v4730_v38 }
 0x330   : > { %3255 = vmatprep.subr.mxu0 %v4729_v35 }
 0x331   : > { %3256 = vmatpush1.msra.mxu0 %v4728_v48 }
 0x332   : > { %3257 = vmatprep.subr.mxu0 %v4727_v43 }
 0x333   : > { %3258 = vmatpush1.msra.mxu0 %v4726_v56 }
 0x334   : > { %3259 = vmatprep.subr.mxu0 %v4725_v10  ;;  %v3318_v10 = vld [vmem:[%s7424_s4] sm:$0x3] }
 0x335   : > { %3260 = vmatpush1.msra.mxu0 %v4724_v27 }
 0x336   : > { %3261 = vmatprep.subr.mxu0 %v4723_v51 }
 0x337   : > { %3262 = vmatpush1.msra.mxu0 %v4722_v28 }
 0x338   : > { %3263 = vmatprep.subr.mxu0 %v4721_v60 }
 0x339   : > { %3264 = vmatpush1.msra.mxu0 %v4720_v21 }
 0x33a   : > { %3265 = vmatprep.subr.mxu0 %v4719_v57 }
 0x33b   : > { %3266 = vmatpush1.msra.mxu0 %v4718_v25  ;;  %v3327_v25 = vrot.slane %v3318_v10, %v2208_v52 }
 0x33c   : > { %3267 = vmatprep.subr.mxu0 %v4717_v23 }
 0x33d   : > { %3268 = vmatpush1.msra.mxu0 %v4716_v2 }
 0x33e   : > { %4740 = vmatmul.mubr.msk.f32.vlgmr.msra.gmra.mxu0 %vm2733_vm1, %v3200_v17  ;;  %3567 = vmatprep.subr.mxu0 %v7546_v58 }
 0x33f   : > { %3307 = vmatprep.mubr.f32.mxu0 %v7546_v58  ;;  %4769 = vmatpush1.msk.msra.mxu0 %vm2608_vm12, %v7550_v22  ;;  %vm7570_vm12 = vcmp.eq.s32.totalorder %v7548_v20, %v7547_v12  ;;  %v3651_v20 = vld [vmem:[%s7425_s5 + $0x48] sm:$0xff] }
 0x340   : > { %3569 = vmatprep.subr.mxu0 %v7546_v58 }
 0x341   : > { %4770 = vmatpush1.msk.msra.mxu0 %vm2607_vm11, %v7550_v22  ;;  %vm3338_vm11 = vcmask 80896  }
 0x342   : > { %4741 = vmatmul.mubr.msk.f32.gmra.mxu0 %vm2733_vm1, %v3201_v9  ;;  %3571 = vmatprep.subr.mxu0 %v7546_v58  ;;  %v3323_v9 = vrot.slane %v3318_v10, %v2204_v46  ;;  %vm7576_vm1 = vcmp.eq.s32.totalorder %v7555_v32, %v7547_v12  ;;  %v3647_v32 = vld [vmem:[%s7425_s5 + $0x28] sm:$0xff] }
 0x343   : > { %4771 = vmatpush1.msk.msra.mxu0 %vm2606_vm0, %v7550_v22  ;;  %vm7572_vm0 = vcmp.eq.s32.totalorder %v7551_v42, %v7547_v12  ;;  %v3649_v42 = vld [vmem:[%s7425_s5 + $0x38] sm:$0xff]  ;;  %v4807_v10 = vld [vmem:[%s7425_s5 + $0xc8] sm:$0xff] }
 0x344   : > { %3573 = vmatprep.subr.mxu0 %v7546_v58 }
 0x345   : > { %4772 = vmatpush1.msk.msra.mxu0 %vm2605_vm13, %v7550_v22  ;;  %vm7573_vm13 = vcmp.eq.s32.totalorder %v7552_v39, %v7547_v12  ;;  %v4798_v39 = vld [vmem:[%s7425_s5 + $0x88] sm:$0xff] }
 0x346   : > { %3575 = vmatprep.subr.mxu0 %v7546_v58 }
 0x347   : > { %4773 = vmatpush1.msk.msra.mxu0 %vm2604_vm10, %v7550_v22  ;;  %vm7569_vm10 = vcmp.eq.s32.totalorder %v6388_v13, %v6233_v19 }
 0x348   : > { %3577 = vmatprep.subr.mxu0 %v7546_v58 }
 0x349   : > { %4774 = vmatpush1.msk.msra.mxu0 %vm2603_vm14, %v7550_v22  ;;  %vm7574_vm14 = vcmp.eq.s32.totalorder %v7553_v49, %v7547_v12  ;;  %v3648_v49 = vld [vmem:[%s7425_s5 + $0x30] sm:$0xff] }
 0x34a   : > { %3579 = vmatprep.subr.mxu0 %v7546_v58 }
 0x34b   : > { %4775 = vmatpush1.msk.msra.mxu0 %vm2602_vm9, %v7550_v22  ;;  %vm7568_vm9 = vcmp.eq.s32.totalorder %v6377_v31, %v6233_v19 }
 0x34c   : > { %3581 = vmatprep.subr.mxu0 %v7546_v58 }
 0x34d   : > { %4776 = vmatpush1.msk.msra.mxu0 %vm2601_vm8, %v7550_v22  ;;  %vm7567_vm8 = vcmp.eq.s32.totalorder %v7541_v34, %v6233_v19 }
 0x34e   : > { %3583 = vmatprep.subr.mxu0 %v7546_v58 }
 0x34f   : > { %4777 = vmatpush1.msk.msra.mxu0 %vm2600_vm7, %v7550_v22  ;;  %vm7566_vm7 = vcmp.eq.s32.totalorder %v6215_v0, %v6233_v19 }
 0x350   : > { %3585 = vmatprep.subr.mxu0 %v7546_v58 }
 0x351   : > { %4778 = vmatpush1.msk.msra.mxu0 %vm2599_vm6, %v7550_v22  ;;  %vm7564_vm6 = vcmp.eq.s32.totalorder %v7561_v50, %v6233_v19 }
 0x352   : > { %3587 = vmatprep.subr.mxu0 %v7546_v58 }
 0x353   : > { %4779 = vmatpush1.msk.msra.mxu0 %vm2598_vm5, %v7550_v22  ;;  %vm7565_vm5 = vcmp.eq.s32.totalorder %v7562_v18, %v6233_v19 }
 0x354   : > { %3589 = vmatprep.subr.mxu0 %v7546_v58 }
 0x355   : > { %4780 = vmatpush1.msk.msra.mxu0 %vm7563_vm2, %v7550_v22  ;;  %vm7577_vm2 = vcmp.eq.s32.totalorder %v7556_v47, %v7547_v12  ;;  %v4796_v47 = vld [vmem:[%s7425_s5 + $0x78] sm:$0xff] }
 0x356   : > { %3591 = vmatprep.subr.mxu0 %v7546_v58 }
 0x357   : > { %4781 = vmatpush1.msk.msra.mxu0 %vm7564_vm6, %v7550_v22  ;;  %vm7578_vm6 = vcmp.eq.s32.totalorder %v7557_v15, %v7547_v12  ;;  %v3646_v15 = vld [vmem:[%s7425_s5 + $0x20] sm:$0xff] }
 0x358   : > { %3593 = vmatprep.subr.mxu0 %v7546_v58 }
 0x359   : > { %4782 = vmatpush1.msk.msra.mxu0 %vm7565_vm5, %v7550_v22  ;;  %vm7579_vm5 = vcmp.eq.s32.totalorder %v7558_v41, %v7547_v12  ;;  %v4795_v41 = vld [vmem:[%s7425_s5 + $0x70] sm:$0xff] }
 0x35a   : > { %3595 = vmatprep.subr.mxu0 %v7546_v58 }
 0x35b   : > { %4783 = vmatpush1.msk.msra.mxu0 %vm7566_vm7, %v7550_v22  ;;  %vm7580_vm7 = vcmp.eq.s32.totalorder %v7559_v36, %v7547_v12  ;;  %v3645_v36 = vld [vmem:[%s7425_s5 + $0x18] sm:$0xff] }
 0x35c   : > { %3597 = vmatprep.subr.mxu0 %v7546_v58 }
 0x35d   : > { %4784 = vmatpush1.msk.msra.mxu0 %vm7567_vm8, %v7550_v22  ;;  %vm7581_vm8 = vcmp.eq.s32.totalorder %v7560_v53, %v7547_v12  ;;  %v4794_v53 = vld [vmem:[%s7425_s5 + $0x68] sm:$0xff] }
 0x35e   : > { %3623 = vmatprep.subr.mxu0 %v7546_v58 }
 0x35f   : > { %4785 = vmatpush2.msk.msra.mxu0 %vm7568_vm9, %v7550_v22  ;;  %vm7582_vm9 = vcmp.eq.s32.totalorder %v7561_v50, %v7547_v12  ;;  %v3644_v50 = vld [vmem:[%s7425_s5 + $0x10] sm:$0xff] }
 0x360   : > { %3625 = vmatprep.subr.mxu0 %v7546_v58 }
 0x361   : > { %4786 = vmatpush2.msk.msra.mxu0 %vm7569_vm10, %v7550_v22  ;;  %vm7583_vm10 = vcmp.eq.s32.totalorder %v7562_v18, %v7547_v12  ;;  %v4793_v18 = vld [vmem:[%s7425_s5 + $0x60] sm:$0xff] }
 0x362   : > { %3627 = vmatprep.subr.mxu0 %v7546_v58 }
 0x363   : > { %4787 = vmatpush2.msk.msra.mxu0 %vm2610_vm3, %v7550_v22  ;;  %vm3341_vm3 = vcmask 1041408  }
 0x364   : > { %3629 = vmatprep.subr.mxu0 %v7546_v58 }
 0x365   : > { %4788 = vmatpush2.msk.msra.mxu0 %vm2609_vm4, %v7550_v22  ;;  %vm7575_vm4 = vcmp.eq.s32.totalorder %v7554_v40, %v7547_v12  ;;  %v4797_v40 = vld [vmem:[%s7425_s5 + $0x80] sm:$0xff] }
 0x366   : > { %4950 = vmatprep.subr.mxu0 %v7546_v58 }
 0x3cb   : > { %v2953_v24 = vpop.f32.mrf.mxu1 }
 0x3cd   : > { %v2955_v33 = vpop.f32.mrf.mxu1 }
 0x3cf   : > { %v2864_v6 = vpop.f32.mrf.mxu0 }
 0x3d0   : > { %v2959_v7 = vpop.f32.mrf.mxu1  ;;  %v2954_v3 = vadd.f32 %v2953_v24, %v2864_v6 }
 0x3d1   : > { %v2866_v55 = vpop.f32.mrf.mxu0 }
 0x3d2   : > { %v2961_v54 = vpop.f32.mrf.mxu1  ;;  %v2956_v8 = vadd.f32 %v2955_v33, %v2866_v55 }
 0x3d5   : > { %v2870_v29 = vpop.f32.mrf.mxu0 }
 0x3d6   : > { %v2960_v37 = vadd.f32 %v2959_v7, %v2870_v29 }
 0x3d7   : > { %v2872_v1 = vpop.f32.mrf.mxu0 }
 0x3d8   : > { %v2962_v14 = vadd.f32 %v2961_v54, %v2872_v1 }
 0x3e3   : > { %v3185_v30 = vpop.f32.mrf.mxu1 }
 0x3e5   : > { %v3187_v59 = vpop.f32.mrf.mxu1 }
 0x3e7   : > { %v3067_v61 = vpop.f32.mrf.mxu0  ;;  %v3191_v35 = vpop.f32.mrf.mxu1 }
 0x3e8   : > { %v3078_v38 = vadd.f32 %v3067_v61, %v2954_v3  ;;  %v4811_v3 = vld [vmem:[%s7425_s5 + $0xe8] sm:$0xff] }
 0x3e9   : > { %v3069_v16 = vpop.f32.mrf.mxu0  ;;  %v3193_v28 = vpop.f32.mrf.mxu1 }
 0x3ea   : > { %v3079_v4 = vadd.f32 %v3069_v16, %v2956_v8  ;;  %v3196_v60 = vadd.f32 %v3185_v30, %v3078_v38  ;;  %v4821_v38 = vld [vmem:[%s7425_s5 + $0x130] sm:$0xff] }
 0x3ec   : > { %v3073_v11 = vpop.f32.mrf.mxu0  ;;  %v3197_v27 = vadd.f32 %v3187_v59, %v3079_v4 }
 0x3ed   : > { %v3080_v44 = vadd.f32 %v3073_v11, %v2960_v37 }
 0x3ee   : > { %v3075_v19 = vpop.f32.mrf.mxu0 }
 0x3ef   : > { %v3081_v43 = vadd.f32 %v3075_v19, %v2962_v14  ;;  %v3198_v51 = vadd.f32 %v3191_v35, %v3080_v44  ;;  %v4822_v19 = vld [vmem:[%s7425_s5 + $0x138] sm:$0xff]  ;;  %v4810_v44 = vld [vmem:[%s7425_s5 + $0xe0] sm:$0xff] }
 0x3f0   : > { %v4809_v35 = vld [vmem:[%s7425_s5 + $0xd8] sm:$0xff] }
 0x3f1   : > { %v3199_v2 = vadd.f32 %v3193_v28, %v3081_v43  ;;  %v4808_v43 = vld [vmem:[%s7425_s5 + $0xd0] sm:$0xff] }
 0x3f2   : > { %v4817_v28 = vld [vmem:[%s7425_s5 + $0x110] sm:$0xff] }
 0x3fe   : > { %v3303_v48 = vpop.f32.mrf.mxu0 }
 0x3ff   : > { %v3314_v17 = vadd.f32 %v3303_v48, %v3196_v60  ;;  %v4820_v48 = vld [vmem:[%s7425_s5 + $0x128] sm:$0xff]  ;;  %v4805_v60 = vld [vmem:[%s7425_s5 + $0xb8] sm:$0xff] }
 0x400   : > { %v3305_v56 = vpop.f32.mrf.mxu0 }
 0x401   : > { %v3315_v57 = vadd.f32 %v3305_v56, %v3197_v27  ;;  %v3330_v1 = vadd.f32 %v3323_v9, %v3314_v17  ;;  %v4819_v56 = vld [vmem:[%s7425_s5 + $0x120] sm:$0xff]  ;;  %v4818_v27 = vld [vmem:[%s7425_s5 + $0x118] sm:$0xff] }
 0x402   : > { %v3309_v21 = vpop.f32.mrf.mxu0  ;;  %v4802_v17 = vld [vmem:[%s7425_s5 + $0xa0] sm:$0xff] }
 0x403   : > { %v3316_v23 = vadd.f32 %v3309_v21, %v3198_v51  ;;  %v3331_v29 = vadd.f32 %v3327_v25, %v3315_v57  ;;  %v3334_v16 = vmax.f32 %v3330_v1, 0.0  ;;  %v4806_v51 = vld [vmem:[%s7425_s5 + $0xc0] sm:$0xff]  ;;  %v4816_v21 = vld [vmem:[%s7425_s5 + $0x108] sm:$0xff]  ;;  %v4804_v57 = vld [vmem:[%s7425_s5 + $0xb0] sm:$0xff] }
 0x404   : > { %v3311_v6 = vpop.f32.mrf.mxu0  ;;  %v4830_v1 = vld [vmem:[%s7425_s5 + $0x170] sm:$0xff] }
 0x405   : > { %v3317_v55 = vadd.f32 %v3311_v6, %v3199_v2  ;;  %v3332_v24 = vadd.f32 %v3323_v9, %v3316_v23  ;;  %v3335_v54 = vmax.f32 %v3331_v29, 0.0  ;;  %v4803_v23 = vld [vmem:[%s7425_s5 + $0xa8] sm:$0xff]  ;;  %v4814_v2 = vld [vmem:[%s7425_s5 + $0xf8] sm:$0xff]  ;;  %v4813_v9 = vld [vmem:[%s7425_s5 + $0xf0] sm:$0xff] }
 0x406   : > { %v4832_v29 = vld [vmem:[%s7425_s5 + $0x180] sm:$0xff] }
 0x407   : > { %v3333_v33 = vadd.f32 %v3327_v25, %v3317_v55  ;;  %v3336_v61 = vmax.f32 %v3332_v24, 0.0  ;;  %v4815_v25 = vld [vmem:[%s7425_s5 + $0x100] sm:$0xff]  ;;  %v4833_v24 = vld [vmem:[%s7425_s5 + $0x188] sm:$0xff] }
 0x409   : > { %v3337_v7 = vmax.f32 %v3333_v33, 0.0  ;;  %v4831_v33 = vld [vmem:[%s7425_s5 + $0x178] sm:$0xff] }
 0x40b   : > { %4742 = vmatprep.subr.msk.mxu1 %vm3341_vm3, %v3337_v7 }
 0x40c   : > { %4743 = vmatpush1.msk.msra.mxu1 %vm3341_vm3, %v3336_v61 }
 0x40d   : > { %3378 = vmatprep.subr.mxu1 %v3335_v54 }
 0x40e   : > { %3379 = vmatpush1.msra.mxu1 %v3334_v16 }
 0x40f   : > { %4744 = vmatmul.mubr.msk.f32.vlgmr.msra.gmra.mxu1 %vm3338_vm11, %v6222_v63  ;;  %4745 = vmatprep.subr.msk.mxu1 %vm3341_vm3, %v3337_v7  ;;  %v4829_v7 = vld [vmem:[%s7425_s5 + $0x168] sm:$0xff] }
 0x410   : > { %4746 = vmatpush1.msk.msra.mxu1 %vm3341_vm3, %v3336_v61  ;;  %3485 = vmatprep.mubr.f32.mxu1 %v7546_v58  ;;  %vm7584_vm3 = vcmp.eq.s32.totalorder %v6215_v0, %v7547_v12  ;;  %v4828_v61 = vld [vmem:[%s7425_s5 + $0x160] sm:$0xff] }
 0x411   : > { %3451 = vmatprep.subr.mxu1 %v3335_v54  ;;  %v4827_v54 = vld [vmem:[%s7425_s5 + $0x158] sm:$0xff] }
 0x412   : > { %3452 = vmatpush1.msra.mxu1 %v3334_v16  ;;  %v4826_v16 = vld [vmem:[%s7425_s5 + $0x150] sm:$0xff] }
 0x413   : > { %4747 = vmatmul.mubr.msk.f32.vlgmr.msra.gmra.mxu1 %vm3338_vm11, %v6238_v5  ;;  %3497 = vmatprep.subr.mxu1 %v7546_v58  ;;  %vm7585_vm11 = vcmp.eq.s32.totalorder %v7541_v34, %v7547_v12 }
 0x414   : > { %4748 = vmatpush1.msk.msra.mxu1 %vm7570_vm12, %v7550_v22  ;;  %vm7586_vm12 = vcmp.eq.s32.totalorder %v6377_v31, %v7547_v12  ;;  %v3643_v31 = vld [vmem:[%s7425_s5 + $0x8] sm:$0xff] }
 0x415   : > { %3499 = vmatprep.subr.mxu1 %v7546_v58 }
 0x416   : > { %4749 = vmatpush1.msk.msra.mxu1 %vm7571_vm15, %v7550_v22  ;;  %vm7587_vm15 = vcmp.eq.s32.totalorder %v6388_v13, %v7547_v12  ;;  %v4792_v13 = vld [vmem:[%s7425_s5 + $0x58] sm:$0xff] }
 0x417   : > { %3501 = vmatprep.subr.mxu1 %v7546_v58 }
 0x418   : > { %4750 = vmatpush1.msk.msra.mxu1 %vm7572_vm0, %v7550_v22  ;;  %vm7588_vm0 = vcmp.eq.s32.totalorder %v6405_v26, %v7547_v12  ;;  %v3642_v26 = vld [vmem:[%s7425_s5] sm:$0xff] }
 0x419   : > { %3503 = vmatprep.subr.mxu1 %v7546_v58 }
 0x41a   : > { %4751 = vmatpush1.msk.msra.mxu1 %vm7573_vm13, %v7550_v22  ;;  %vm7589_vm13 = vcmp.eq.s32.totalorder %v6422_v45, %v7547_v12  ;;  %v3650_v12 = vld [vmem:[%s7425_s5 + $0x40] sm:$0xff]  ;;  %v4791_v45 = vld [vmem:[%s7425_s5 + $0x50] sm:$0xff] }
 0x41b   : > { %3505 = vmatprep.subr.mxu1 %v7546_v58 }
 0x41c   : > { %4752 = vmatpush1.msk.msra.mxu1 %vm7574_vm14, %v7550_v22  ;;  %vm7590_vm14 = vcmask 261120  }
 0x41d   : > { %3507 = vmatprep.subr.mxu1 %v7546_v58 }
 0x41e   : > { %4753 = vmatpush1.msk.msra.mxu1 %vm7575_vm4, %v7550_v22  ;;  %vm7591_vm4 = vmmov %vm7590_vm14 }
 0x41f   : > { %3509 = vmatprep.subr.mxu1 %v7546_v58 }
 0x420   : > { %4754 = vmatpush1.msk.msra.mxu1 %vm7576_vm1, %v7550_v22  ;;  %vm5227_vm1 = vmmov 0  }
 0x421   : > { %3511 = vmatprep.subr.mxu1 %v7546_v58 }
 0x422   : > { %4755 = vmatpush1.msk.msra.mxu1 %vm7577_vm2, %v7550_v22  ;;  %vm3638_vm2 = vcmask 651264  }
 0x423   : > { %3513 = vmatprep.subr.mxu1 %v7546_v58 }
 0x424   : > { %4756 = vmatpush1.msk.msra.mxu1 %vm7578_vm6, %v7550_v22  ;;  %vm3652_vm6 = vcmask 654336  }
 0x425   : > { %3515 = vmatprep.subr.mxu1 %v7546_v58 }
 0x426   : > { %4757 = vmatpush1.msk.msra.mxu1 %vm7579_vm5, %v7550_v22  ;;  %vm4247_vm5 = vcmask 73728  }
 0x427   : > { %3517 = vmatprep.subr.mxu1 %v7546_v58 }
 0x428   : > { %4758 = vmatpush1.msk.msra.mxu1 %vm7580_vm7, %v7550_v22 }
 0x429   : > { %3519 = vmatprep.subr.mxu1 %v7546_v58 }
 0x42a   : > { %4759 = vmatpush1.msk.msra.mxu1 %vm7581_vm8, %v7550_v22 }
 0x42b   : > { %3521 = vmatprep.subr.mxu1 %v7546_v58 }
 0x42c   : > { %4760 = vmatpush1.msk.msra.mxu1 %vm7582_vm9, %v7550_v22 }
 0x42d   : > { %3523 = vmatprep.subr.mxu1 %v7546_v58 }
 0x42e   : > { %4761 = vmatpush1.msk.msra.mxu1 %vm7583_vm10, %v7550_v22 }
 0x42f   : > { %3525 = vmatprep.subr.mxu1 %v7546_v58 }
 0x430   : > { %4762 = vmatpush1.msk.msra.mxu1 %vm7584_vm3, %v7550_v22 }
 0x431   : > { %3527 = vmatprep.subr.mxu1 %v7546_v58 }
 0x432   : > { %4763 = vmatpush1.msk.msra.mxu1 %vm7585_vm11, %v7550_v22 }
 0x433   : > { %3553 = vmatprep.subr.mxu1 %v7546_v58 }
 0x434   : > { %4764 = vmatpush2.msk.msra.mxu1 %vm7586_vm12, %v7550_v22 }
 0x435   : > { %3555 = vmatprep.subr.mxu1 %v7546_v58 }
 0x436   : > { %4765 = vmatpush2.msk.msra.mxu1 %vm7587_vm15, %v7550_v22 }
 0x437   : > { %3557 = vmatprep.subr.mxu1 %v7546_v58 }
 0x438   : > { %4766 = vmatpush2.msk.msra.mxu1 %vm7588_vm0, %v7550_v22 }
 0x439   : > { %3559 = vmatprep.subr.mxu1 %v7546_v58 }
 0x43a   : > { %4767 = vmatpush2.msk.msra.mxu1 %vm7589_vm13, %v7550_v22  ;;  %v4799_v22 = vld [vmem:[%s7425_s5 + $0x90] sm:$0xff] }
 0x43b   : > { %4927 = vmatprep.subr.mxu1 %v7546_v58 }
 0x4cf   : > { %v3414_v34 = vpop.f32.mrf.mxu1 }
 0x4d1   : > { %v3416_v46 = vpop.f32.mrf.mxu1 }
 0x4d3   : > { %v3487_v52 = vpop.f32.mrf.mxu1 }
 0x4d4   : > { %v3492_v5 = vmax.f32 %v3414_v34, %v3487_v52  ;;  %v4825_v34 = vld [vmem:[%s7425_s5 + $0x148] sm:$0xff] }
 0x4d5   : > { %v3489_v0 = vpop.f32.mrf.mxu1 }
 0x4d6   : > { %v3493_v63 = vmax.f32 %v3416_v46, %v3489_v0  ;;  %v4824_v46 = vld [vmem:[%s7425_s5 + $0x140] sm:$0xff]  ;;  %v4087_v0 = vld [vmem:[%s7427_s7 + $0x78] sm:$0xff] }
 0x4d8   : > { %4768 = vmatprep.mubr.msk.f32.mxu1 %vm7590_vm14, %v3493_v63  ;;  %4789 = vmatprep.mubr.msk.f32.mxu0 %vm7591_vm4, %v3493_v63  ;;  %v4086_v63 = vld [vmem:[%s7427_s7 + $0x70] sm:$0xff] }
 0x4d9   : > { %3562 = vmatmul.mubr.f32.vlgmr.msra.gmra.mxu1 %v3492_v5  ;;  %3632 = vmatmul.mubr.f32.vlgmr.msra.gmra.mxu0 %v3492_v5  ;;  %v4085_v5 = vld [vmem:[%s7427_s7 + $0x68] sm:$0xff] }
 0x4da   : > { %4928 = vmatpush3.msra.mxu1 %v3651_v20  ;;  %4951 = vmatpush3.msra.mxu0 %v4800_v62  ;;  %v4084_v20 = vld [vmem:[%s7427_s7 + $0x60] sm:$0xff]  ;;  %v4083_v62 = vld [vmem:[%s7427_s7 + $0x58] sm:$0xff] }
 0x4db   : > { %4929 = vmatprep.subr.mxu1 %v7546_v58  ;;  %4952 = vmatprep.subr.mxu0 %v7546_v58 }
 0x4dc   : > { %4930 = vmatpush3.msra.mxu1 %v3650_v12  ;;  %4953 = vmatpush3.msra.mxu0 %v4799_v22  ;;  %v4082_v12 = vld [vmem:[%s7427_s7 + $0x50] sm:$0xff]  ;;  %v4081_v22 = vld [vmem:[%s7427_s7 + $0x48] sm:$0xff] }
 0x4dd   : > { %4931 = vmatprep.subr.mxu1 %v7546_v58  ;;  %4954 = vmatprep.subr.mxu0 %v7546_v58 }
 0x4de   : > { %4932 = vmatpush3.msra.mxu1 %v3649_v42  ;;  %4955 = vmatpush3.msra.mxu0 %v4798_v39  ;;  %v4080_v42 = vld [vmem:[%s7427_s7 + $0x40] sm:$0xff]  ;;  %v4079_v39 = vld [vmem:[%s7427_s7 + $0x38] sm:$0xff] }
 0x4df   : > { %4933 = vmatprep.subr.mxu1 %v7546_v58  ;;  %4956 = vmatprep.subr.mxu0 %v7546_v58 }
 0x4e0   : > { %4934 = vmatpush3.msra.mxu1 %v3648_v49  ;;  %4957 = vmatpush3.msra.mxu0 %v4797_v40  ;;  %v4078_v49 = vld [vmem:[%s7427_s7 + $0x30] sm:$0xff]  ;;  %v4077_v40 = vld [vmem:[%s7427_s7 + $0x28] sm:$0xff] }
 0x4e1   : > { %4935 = vmatprep.subr.mxu1 %v7546_v58  ;;  %4958 = vmatprep.subr.mxu0 %v7546_v58 }
 0x4e2   : > { %4936 = vmatpush3.msra.mxu1 %v3647_v32  ;;  %4959 = vmatpush3.msra.mxu0 %v4796_v47  ;;  %v4076_v32 = vld [vmem:[%s7427_s7 + $0x20] sm:$0xff]  ;;  %v4075_v47 = vld [vmem:[%s7427_s7 + $0x18] sm:$0xff] }
 0x4e3   : > { %4937 = vmatprep.subr.mxu1 %v7546_v58  ;;  %4960 = vmatprep.subr.mxu0 %v7546_v58 }
 0x4e4   : > { %4938 = vmatpush3.msra.mxu1 %v3646_v15  ;;  %4961 = vmatpush3.msra.mxu0 %v4795_v41  ;;  %v4074_v15 = vld [vmem:[%s7427_s7 + $0x10] sm:$0xff]  ;;  %v4073_v41 = vld [vmem:[%s7427_s7 + $0x8] sm:$0xff] }
 0x4e5   : > { %4939 = vmatprep.subr.mxu1 %v7546_v58  ;;  %4962 = vmatprep.subr.mxu0 %v7546_v58 }
 0x4e6   : > { %4940 = vmatpush3.msra.mxu1 %v3645_v36  ;;  %4963 = vmatpush3.msra.mxu0 %v4794_v53  ;;  %v4072_v36 = vld [vmem:[%s7427_s7] sm:$0xff]  ;;  %v4175_v53 = vld [vmem:[%s7429_s9 + $0x78] sm:$0xff] }
 0x4e7   : > { %4941 = vmatprep.subr.mxu1 %v7546_v58  ;;  %4964 = vmatprep.subr.mxu0 %v7546_v58 }
 0x4e8   : > { %4942 = vmatpush3.msra.mxu1 %v3644_v50  ;;  %4965 = vmatpush3.msra.mxu0 %v4793_v18  ;;  %v4174_v50 = vld [vmem:[%s7429_s9 + $0x70] sm:$0xff]  ;;  %v4173_v18 = vld [vmem:[%s7429_s9 + $0x68] sm:$0xff] }
 0x4e9   : > { %4943 = vmatprep.subr.mxu1 %v7546_v58  ;;  %4966 = vmatprep.subr.mxu0 %v7546_v58 }
 0x4ea   : > { %4944 = vmatpush3.msra.mxu1 %v3643_v31  ;;  %4967 = vmatpush3.msra.mxu0 %v4792_v13  ;;  %v4172_v31 = vld [vmem:[%s7429_s9 + $0x60] sm:$0xff]  ;;  %v4171_v13 = vld [vmem:[%s7429_s9 + $0x58] sm:$0xff] }
 0x4eb   : > { %4945 = vmatprep.subr.mxu1 %v7546_v58  ;;  %4968 = vmatprep.subr.mxu0 %v7546_v58 }
 0x4ec   : > { %4946 = vmatpush3.msra.mxu1 %v3642_v26  ;;  %4969 = vmatpush3.msra.mxu0 %v4791_v45  ;;  %v4170_v26 = vld [vmem:[%s7429_s9 + $0x50] sm:$0xff]  ;;  %v4169_v45 = vld [vmem:[%s7429_s9 + $0x48] sm:$0xff] }
 0x4ed   : > { %4947 = vmatprep.mubr.msk.f32.mxu1 %vm5227_vm1, %v7546_v58  ;;  %4970 = vmatprep.mubr.msk.f32.mxu0 %vm5227_vm1, %v7546_v58 }
 0x4ee   : > { %4973 = vmatprep.subr.mxu1 %v7546_v58  ;;  %4996 = vmatprep.subr.mxu0 %v7546_v58 }
 0x599   : > { %v3563_v30 = vpop.f32.mrf.mxu1  ;;  %v3633_v11 = vpop.f32.mrf.mxu0 }
 0x59a   : > { %v3637_v59 = vmax.f32 %v3563_v30, %v3633_v11  ;;  %v4168_v30 = vld [vmem:[%s7429_s9 + $0x40] sm:$0xff]  ;;  %v4167_v11 = vld [vmem:[%s7429_s9 + $0x38] sm:$0xff] }
 0x59b   : > { %v3565_v8 = vpop.f32.mrf.mxu1  ;;  %v3635_v37 = vpop.f32.mrf.mxu0 }
 0x59c   : > { %3639 = vst.msk [vmem:[#allocation3] sm:$0x1f] %vm3638_vm2, %v3637_v59  ;;  %v4166_v59 = vld [vmem:[%s7429_s9 + $0x30] sm:$0xff]  ;;  %v4165_v8 = vld [vmem:[%s7429_s9 + $0x28] sm:$0xff]  ;;  %v4164_v37 = vld [vmem:[%s7429_s9 + $0x20] sm:$0xff] }
 0x5a3   : > { %v3641_v14 = vld [vmem:[#allocation3] sm:$0x1]  ;;  %v3727_v4 = vld [vmem:[#allocation3 + $0x1] sm:$0x1]  ;;  %v3813_v6 = vld [vmem:[#allocation3 + $0x2] sm:$0x1] }
 0x5a4   : > { %4948 = vmatmul.mubr.msk.f32.vlgmr.msra.gmra.mxu1 %vm3652_vm6, %v3641_v14  ;;  %4971 = vmatmul.mubr.msk.f32.vlgmr.msra.gmra.mxu0 %vm3652_vm6, %v3727_v4  ;;  %v3899_v55 = vld [vmem:[#allocation3 + $0x3] sm:$0x1]  ;;  %v3985_v52 = vld [vmem:[#allocation3 + $0x4] sm:$0x1] }
 0x5a5   : > { %4974 = vmatpush3.msra.mxu1 %v4811_v3  ;;  %4997 = vmatpush3.msra.mxu0 %v4822_v19  ;;  %v4163_v3 = vld [vmem:[%s7429_s9 + $0x18] sm:$0xff] }
 0x5a6   : > { %4975 = vmatprep.subr.mxu1 %v7546_v58  ;;  %4998 = vmatprep.subr.mxu0 %v7546_v58 }
 0x5a7   : > { %4976 = vmatpush3.msra.mxu1 %v4810_v44  ;;  %4999 = vmatpush3.msra.mxu0 %v4821_v38 }
 0x5a8   : > { %4977 = vmatprep.subr.mxu1 %v7546_v58  ;;  %5000 = vmatprep.subr.mxu0 %v7546_v58 }
 0x5a9   : > { %4978 = vmatpush3.msra.mxu1 %v4809_v35  ;;  %5001 = vmatpush3.msra.mxu0 %v4820_v48 }
 0x5aa   : > { %4979 = vmatprep.subr.mxu1 %v7546_v58  ;;  %5002 = vmatprep.subr.mxu0 %v7546_v58 }
 0x5ab   : > { %4980 = vmatpush3.msra.mxu1 %v4808_v43  ;;  %5003 = vmatpush3.msra.mxu0 %v4819_v56  ;;  %v3640_v56 = vld [vmem:[%s7426_s6] sm:$0x1] }
 0x5ac   : > { %4981 = vmatprep.subr.mxu1 %v7546_v58  ;;  %5004 = vmatprep.subr.mxu0 %v7546_v58 }
 0x5ad   : > { %4982 = vmatpush3.msra.mxu1 %v4807_v10  ;;  %5005 = vmatpush3.msra.mxu0 %v4818_v27 }
 0x5ae   : > { %4983 = vmatprep.subr.mxu1 %v7546_v58  ;;  %5006 = vmatprep.subr.mxu0 %v7546_v58 }
 0x5af   : > { %4984 = vmatpush3.msra.mxu1 %v4806_v51  ;;  %5007 = vmatpush3.msra.mxu0 %v4817_v28 }
 0x5b0   : > { %4985 = vmatprep.subr.mxu1 %v7546_v58  ;;  %5008 = vmatprep.subr.mxu0 %v7546_v58 }
 0x5b1   : > { %4986 = vmatpush3.msra.mxu1 %v4805_v60  ;;  %5009 = vmatpush3.msra.mxu0 %v4816_v21 }
 0x5b2   : > { %4987 = vmatprep.subr.mxu1 %v7546_v58  ;;  %5010 = vmatprep.subr.mxu0 %v7546_v58 }
 0x5b3   : > { %4988 = vmatpush3.msra.mxu1 %v4804_v57  ;;  %5011 = vmatpush3.msra.mxu0 %v4815_v25 }
 0x5b4   : > { %4989 = vmatprep.subr.mxu1 %v7546_v58  ;;  %5012 = vmatprep.subr.mxu0 %v7546_v58 }
 0x5b5   : > { %4990 = vmatpush3.msra.mxu1 %v4803_v23  ;;  %5013 = vmatpush3.msra.mxu0 %v4814_v2  ;;  %v4162_v23 = vld [vmem:[%s7429_s9 + $0x10] sm:$0xff]  ;;  %v4161_v2 = vld [vmem:[%s7429_s9 + $0x8] sm:$0xff] }
 0x5b6   : > { %4991 = vmatprep.subr.mxu1 %v7546_v58  ;;  %5014 = vmatprep.subr.mxu0 %v7546_v58 }
 0x5b7   : > { %4992 = vmatpush3.msra.mxu1 %v4802_v17  ;;  %4993 = vmatprep.mubr.msk.f32.mxu1 %vm5227_vm1, %v7546_v58  ;;  %v4160_v17 = vld [vmem:[%s7429_s9] sm:$0xff] }
 0x5b8   : > { %5015 = vmatpush3.msra.mxu0 %v4813_v9  ;;  %5016 = vmatprep.mubr.msk.f32.mxu0 %vm5227_vm1, %v7546_v58  ;;  %v4088_v9 = vld [vmem:[%s7428_s8] sm:$0x1] }
 0x5b9   : > { %4994 = vmatmul.mubr.msk.f32.vlgmr.msra.gmra.mxu1 %vm3652_vm6, %v3813_v6  ;;  %5017 = vmatmul.mubr.msk.f32.vlgmr.msra.gmra.mxu0 %vm3652_vm6, %v3899_v55 }
 0x5ba   : > { %5019 = vmatprep.subr.mxu1 %v7546_v58  ;;  %5039 = vmatprep.mubr.msk.f32.mxu1 %vm5227_vm1, %v7546_v58 }
 0x5bb   : > { %5020 = vmatpush3.msra.mxu1 %v4833_v24  ;;  %5042 = vmatprep.subr.mxu0 %v7546_v58 }
 0x5bc   : > { %5021 = vmatprep.subr.mxu1 %v7546_v58  ;;  %5074 = vmatprep.mubr.msk.f32.mxu0 %vm5227_vm1, %v7546_v58 }
 0x5bd   : > { %5022 = vmatpush3.msra.mxu1 %v4832_v29  ;;  %5043 = vmatpush3.msra.mxu0 %v4087_v0 }
 0x5be   : > { %5023 = vmatprep.subr.mxu1 %v7546_v58  ;;  %5044 = vmatprep.subr.mxu0 %v7546_v58 }
 0x5bf   : > { %5024 = vmatpush3.msra.mxu1 %v4831_v33  ;;  %5045 = vmatpush3.msra.mxu0 %v4086_v63 }
 0x5c0   : > { %5025 = vmatprep.subr.mxu1 %v7546_v58  ;;  %5046 = vmatprep.subr.mxu0 %v7546_v58 }
 0x5c1   : > { %5026 = vmatpush3.msra.mxu1 %v4830_v1  ;;  %5047 = vmatpush3.msra.mxu0 %v4085_v5 }
 0x5c2   : > { %5027 = vmatprep.subr.mxu1 %v7546_v58  ;;  %5048 = vmatprep.subr.mxu0 %v7546_v58 }
 0x5c3   : > { %5028 = vmatpush3.msra.mxu1 %v4829_v7  ;;  %5049 = vmatpush3.msra.mxu0 %v4084_v20 }
 0x5c4   : > { %5029 = vmatprep.subr.mxu1 %v7546_v58  ;;  %5050 = vmatprep.subr.mxu0 %v7546_v58 }
 0x5c5   : > { %5030 = vmatpush3.msra.mxu1 %v4828_v61  ;;  %5051 = vmatpush3.msra.mxu0 %v4083_v62 }
 0x5c6   : > { %5031 = vmatprep.subr.mxu1 %v7546_v58  ;;  %5052 = vmatprep.subr.mxu0 %v7546_v58 }
 0x5c7   : > { %5032 = vmatpush3.msra.mxu1 %v4827_v54  ;;  %5053 = vmatpush3.msra.mxu0 %v4082_v12 }
 0x5c8   : > { %5033 = vmatprep.subr.mxu1 %v7546_v58  ;;  %5054 = vmatprep.subr.mxu0 %v7546_v58 }
 0x5c9   : > { %5034 = vmatpush3.msra.mxu1 %v4826_v16  ;;  %5055 = vmatpush3.msra.mxu0 %v4081_v22 }
 0x5ca   : > { %5035 = vmatprep.subr.mxu1 %v7546_v58  ;;  %5056 = vmatprep.subr.mxu0 %v7546_v58 }
 0x5cb   : > { %5036 = vmatpush3.msra.mxu1 %v4825_v34  ;;  %5057 = vmatpush3.msra.mxu0 %v4080_v42 }
 0x5cc   : > { %5037 = vmatprep.subr.mxu1 %v7546_v58  ;;  %5058 = vmatprep.subr.mxu0 %v7546_v58 }
 0x5cd   : > { %5038 = vmatpush3.msra.mxu1 %v4824_v46  ;;  %5059 = vmatpush3.msra.mxu0 %v4079_v39 }
 0x5ce   : > { %5040 = vmatmul.mubr.msk.f32.vlgmr.msra.gmra.mxu1 %vm3652_vm6, %v3985_v52  ;;  %5077 = vmatprep.subr.mxu1 %v7546_v58 }
 0x5cf   : > { %5109 = vmatprep.mubr.msk.f32.mxu1 %vm5227_vm1, %v7546_v58  ;;  %5060 = vmatprep.subr.mxu0 %v7546_v58 }
 0x5d0   : > { %5061 = vmatpush3.msra.mxu0 %v4078_v49  ;;  %5078 = vmatpush3.msra.mxu1 %v4175_v53 }
 0x5d1   : > { %5062 = vmatprep.subr.mxu0 %v7546_v58  ;;  %5079 = vmatprep.subr.mxu1 %v7546_v58 }
 0x5d2   : > { %5063 = vmatpush3.msra.mxu0 %v4077_v40  ;;  %5080 = vmatpush3.msra.mxu1 %v4174_v50 }
 0x5d3   : > { %5064 = vmatprep.subr.mxu0 %v7546_v58  ;;  %5081 = vmatprep.subr.mxu1 %v7546_v58 }
 0x5d4   : > { %5065 = vmatpush3.msra.mxu0 %v4076_v32  ;;  %5082 = vmatpush3.msra.mxu1 %v4173_v18 }
 0x5d5   : > { %5066 = vmatprep.subr.mxu0 %v7546_v58  ;;  %5083 = vmatprep.subr.mxu1 %v7546_v58 }
 0x5d6   : > { %5067 = vmatpush3.msra.mxu0 %v4075_v47  ;;  %5084 = vmatpush3.msra.mxu1 %v4172_v31 }
 0x5d7   : > { %5068 = vmatprep.subr.mxu0 %v7546_v58  ;;  %5085 = vmatprep.subr.mxu1 %v7546_v58 }
 0x5d8   : > { %5069 = vmatpush3.msra.mxu0 %v4074_v15  ;;  %5086 = vmatpush3.msra.mxu1 %v4171_v13 }
 0x5d9   : > { %5070 = vmatprep.subr.mxu0 %v7546_v58  ;;  %5087 = vmatprep.subr.mxu1 %v7546_v58 }
 0x5da   : > { %5071 = vmatpush3.msra.mxu0 %v4073_v41  ;;  %5088 = vmatpush3.msra.mxu1 %v4170_v26 }
 0x5db   : > { %5072 = vmatprep.subr.mxu0 %v7546_v58  ;;  %5089 = vmatprep.subr.mxu1 %v7546_v58 }
 0x5dc   : > { %5073 = vmatpush3.msra.mxu0 %v4072_v36  ;;  %5090 = vmatpush3.msra.mxu1 %v4169_v45 }
 0x5dd   : > { %5091 = vmatprep.subr.mxu1 %v7546_v58 }
 0x5de   : > { %5092 = vmatpush3.msra.mxu1 %v4168_v30 }
 0x5df   : > { %5093 = vmatprep.subr.mxu1 %v7546_v58 }
 0x5e0   : > { %5094 = vmatpush3.msra.mxu1 %v4167_v11 }
 0x5e1   : > { %5095 = vmatprep.subr.mxu1 %v7546_v58 }
 0x5e2   : > { %5096 = vmatpush3.msra.mxu1 %v4166_v59 }
 0x5e3   : > { %5097 = vmatprep.subr.mxu1 %v7546_v58 }
 0x5e4   : > { %5098 = vmatpush3.msra.mxu1 %v4165_v8 }
 0x5e5   : > { %5099 = vmatprep.subr.mxu1 %v7546_v58 }
 0x5e6   : > { %5100 = vmatpush3.msra.mxu1 %v4164_v37 }
 0x5e7   : > { %5101 = vmatprep.subr.mxu1 %v7546_v58 }
 0x5e8   : > { %5102 = vmatpush3.msra.mxu1 %v4163_v3 }
 0x5e9   : > { %5103 = vmatprep.subr.mxu1 %v7546_v58 }
 0x5ea   : > { %5104 = vmatpush3.msra.mxu1 %v4162_v23 }
 0x5eb   : > { %5105 = vmatprep.subr.mxu1 %v7546_v58 }
 0x5ec   : > { %5106 = vmatpush3.msra.mxu1 %v4161_v2 }
 0x5ed   : > { %5107 = vmatprep.subr.mxu1 %v7546_v58  ;;  %v4176_v58 = vld [vmem:[%s7430_s10] sm:$0x1] }
 0x5ee   : > { %5108 = vmatpush3.msra.mxu1 %v4160_v17 }
 0x664   : > { %v3722_v19 = vpop.f32.mrf.mxu1  ;;  %v3808_v14 = vpop.f32.mrf.mxu0 }
 0x665   : > { %v3726_v10 = vadd.f32 %v3722_v19, %v3640_v56 }
 0x666   : > { %v4949_v4 = vpop.f32.mrf.mxu1  ;;  %v4972_v44 = vpop.f32.mrf.mxu0 }
 0x667   : > { %v3812_v27 = vadd.f32 %v3808_v14, %v3726_v10 }
 0x679   : > { %v3894_v38 = vpop.f32.mrf.mxu1  ;;  %v3980_v35 = vpop.f32.mrf.mxu0 }
 0x67a   : > { %v3898_v51 = vadd.f32 %v3894_v38, %v3812_v27 }
 0x67b   : > { %v4995_v48 = vpop.f32.mrf.mxu1  ;;  %v5018_v43 = vpop.f32.mrf.mxu0 }
 0x67c   : > { %v3984_v28 = vadd.f32 %v3980_v35, %v3898_v51 }
 0x68e   : > { %v4066_v60 = vpop.f32.mrf.mxu1 }
 0x68f   : > { %v4070_v21 = vadd.f32 %v4066_v60, %v3984_v28 }
 0x690   : > { %v5041_v57 = vpop.f32.mrf.mxu1 }
 0x691   : > { %v4071_v25 = vmax.f32 %v4070_v21, 0.0 }
 0x693   : > { %5075 = vmatmul.mubr.f32.vlgmr.msra.gmra.mxu0 %v4071_v25 }
 0x753   : > { %v4155_v6 = vpop.f32.mrf.mxu0 }
 0x754   : > { %v4156_v55 = vadd.f32 %v4155_v6, %v4088_v9 }
 0x755   : > { %v5076_v24 = vpop.f32.mrf.mxu0 }
 0x756   : > { %v4159_v29 = vmax.f32 %v4156_v55, 0.0 }
 0x758   : > { %5110 = vmatmul.mubr.f32.vlgmr.msra.gmra.mxu1 %v4159_v29 }
 0x818   : > { %v4243_v33 = vpop.f32.mrf.mxu1 }
 0x819   : > { %v4244_v1 = vadd.f32 %v4243_v33, %v4176_v58 }
 0x81a   : > { %v5111_v7 = vpop.f32.mrf.mxu1 }
 0x81b   : > { %4248 = vst.msk [vmem:[%s378_s12] sm:$0x1] %vm4247_vm5, %v4244_v1 }
 0x81c   : > { %5176 = shalt.err (!%p5173_p3)
}
 0x81d   : > { %s5177_s26 = scalar_lea.hbm %s7385_s16, 16  ;;  %s5181_s12 = scalar_lea.hbm %s7431_s11, 32 }
 0x81e   : > { %p5178_p4 = scmp.ne.s32.totalorder %s7385_s16, %s5177_s26  ;;  %p5182_p9 = scmp.lt.s32.totalorder %s7385_s16, %s7431_s11 }
 0x81f   : > { %p5183_p10 = scmp.lt.s32.totalorder %s5181_s12, %s5177_s26 }
 0x820   : > { %p5179_p7 = pnand %p5178_p4, %p5327_p5 }
 0x821   : > { %p5184_p11 = por %p5183_p10, %p5182_p9 }
 0x822   : > { %p5180_p8 = pneg %p5179_p7 }
 0x824   : > { %p5185_p12 = pnand %p5184_p11, %p5180_p8 }
 0x826   : > { %5188 = shalt.err (!%p5185_p12)
}
 0x827   : > { %5121 = dma.vmem_to_hbm [thread:$0]  (%p5327_p5), %s4263_s13, 16, %s7385_s16, %s4250_s22  }
 0x828 PF: > { %p5127_p13 = scmp.ge.s32.totalorder %s5223_s20, 2  ;;  %s4274_s24 = sand.u32 1, %s5211_s17  }
 0x829   : > { %s4275_s21 = scalar_lea.sflag [#allocation5], %s4274_s24 }
 0x82a   : > { %p5124_p0 = pnand %p5127_p13, %p5331_p6 }
 0x82c   : > { %p5125_p1 = pneg %p5124_p0 }
 0x82e   : > { %5206 = dma.done.wait (%p5125_p1), %s4275_s21, 16  }
 0x82f   : > { %5208 = vsyncadd (%p5125_p1), %s4275_s21, 4294967280  ;;  %s7592_s25 = sld [smem:[#allocation7_spill]]  ;;  %p21_p2 = scmp.ge.s32.totalorder %s5314_s23, 4  }
 0x830   : > { %s7593_s19 = sld [smem:[#allocation8_spill]]  ;;  %s7594_s17 = smov %s5215_s18 }
 0x831   : > { %s7596_s20 = smov %s5314_s23  ;;  %23 = sbr.rel (!%p21_p2) target bundleno = 3 (0x3), region = 123 }
 0x835   : > { %s7595_s18 = smov %s7592_s25 }
 0x836   :  { %4279 = vsyncpa [#allocation5], 1 }
 0x837   :  { %4281 = vsyncpa [#allocation5 + $0x1], 1 }

</bundles_post_ra>
